<compile_context>
chip_gen: v5e
topology: v5e:2x2
jax: 0.10.0
libtpu: 0.0.40
codegen_flags: <defaults>
</compile_context>

<pallas_src>
import functools

import jax
import jax.numpy as jnp
from jax import lax
from jax.experimental import pallas as pl
from jax.experimental.pallas import tpu as pltpu


def _attention_dca_kernel(qt_ref, k_ref, zoh_ref, w_ref, v2_ref, vvt_ref,
                          out_ref, acc_ref, sfh_ref, *, q, tm, n_heads, lambd):
    mt = pl.program_id(0)
    h = pl.program_id(1)
    nh = pl.num_programs(1)

    @pl.when(h == 0)
    def _init():
        acc_ref[...] = jnp.zeros_like(acc_ref)

    # ---- per-head attention: e = Q_h^T K_h, mask self-interaction, softmax over j ----
    qt = qt_ref[0]                                                    # (N, d)
    k = k_ref[0]                                                      # (d, N)
    e = jnp.dot(qt, k, preferred_element_type=jnp.float32)            # (N, N)
    n = e.shape[0]
    ii = lax.broadcasted_iota(jnp.int32, (n, n), 0)
    jj = lax.broadcasted_iota(jnp.int32, (n, n), 1)
    e = jnp.where(ii == jj, jnp.float32(-1e9), e)
    e_max = jnp.max(e, axis=1, keepdims=True)
    p = jnp.exp(e - e_max)
    sf = p * pl.reciprocal(jnp.sum(p, axis=1, keepdims=True), approx=True)  # (N, N); diag == 0

    # keep sf for the fused regularization (only the mt == 0 pass needs it)
    @pl.when(mt == 0)
    def _keep_sf():
        sfh_ref[h] = sf

    # ---- mat_ene accumulation: T = sf @ onehot(Z) on the MXU (bf16 in / f32 accumulate) ----
    zoh = zoh_ref[0]                                                  # (N, q*tm) bf16, c-major lanes
    t = jnp.dot(sf.astype(jnp.bfloat16), zoh,
                preferred_element_type=jnp.float32)                   # (N, q*tm)
    # apply the tiny (q, q) V_h:  acc[:, a*tm:(a+1)*tm] += sum_c V_h[a, c] * t[:, c*tm:(c+1)*tm]
    for a in range(q):
        slab = v2_ref[h, a * q] * t[:, 0:tm]
        for c in range(1, q):
            slab = slab + v2_ref[h, a * q + c] * t[:, c * tm:(c + 1) * tm]
        acc_ref[:, a * tm:(a + 1) * tm] += slab

    # ---- finalize: per-(i, m) logsumexp over symbols + observed-symbol energy -> partial loss ----
    @pl.when(h == nh - 1)
    def _finalize():
        acc = acc_ref[...]                                            # (N, q*tm), a-major lanes
        zoh_f = zoh_ref[0].astype(jnp.float32)                        # doubles as the row selector
        gmax = acc[:, 0:tm]
        for a in range(1, q):
            gmax = jnp.maximum(gmax, acc[:, a * tm:(a + 1) * tm])     # per-(i, m) group max
        gsum = jnp.exp(acc[:, 0:tm] - gmax)
        sel = zoh_f[:, 0:tm] * acc[:, 0:tm]
        for a in range(1, q):
            gsum = gsum + jnp.exp(acc[:, a * tm:(a + 1) * tm] - gmax)
            sel = sel + zoh_f[:, a * tm:(a + 1) * tm] * acc[:, a * tm:(a + 1) * tm]
        lge = gmax + jnp.log(gsum)                                    # (N, tm)
        w = w_ref[0]                                                  # (1, tm)
        pl_part = -jnp.sum(w * (sel - lge), keepdims=True)            # (1, 1)
        out_ref[...] = pl_part.reshape(1, 1, 1)

        # fused regularization, added once (on the mt == 0 tile):
        #   reg = lambd * sum_{h,k} (sum_ij sf_h[ij] sf_k[ij]) * (V V^T)[h, k]
        @pl.when(mt == 0)
        def _add_reg():
            reg = jnp.zeros((1, 1), dtype=jnp.float32)
            for hh in range(n_heads):
                for kk in range(hh + 1):
                    s = jnp.sum(sfh_ref[hh] * sfh_ref[kk], keepdims=True)   # (1, 1)
                    factor = 1.0 if kk == hh else 2.0
                    reg = reg + (factor * vvt_ref[hh, kk]) * s
            out_ref[...] += (jnp.float32(lambd) * reg).reshape(1, 1, 1)


def _choose_m_tile(M, q, target_lanes=1024):
    """Pick the m-tile so the lane axis (q * TM) is large and 128-aligned when possible."""
    if M <= 128:
        return M
    chunks = max(1, (target_lanes // q) // 128)
    chunks = min(chunks, pl.cdiv(M, 128))
    return 128 * chunks


def attention_dca_loss(Q, K, V, Z, weights, lambd=0.001, m_tile=None):
    # TODO(synk): only the default branch (index_last_domain1 == 0, H1 == H2 == 0) is implemented;
    # the per-domain attention-mask branch of the module is not translated.
    H, d, N = Q.shape
    q = V.shape[1]
    M = Z.shape[1]
    f32 = jnp.float32

    TM = m_tile if m_tile is not None else _choose_m_tile(M, q)
    MT = pl.cdiv(M, TM)
    Mp = MT * TM
    pad = Mp - M

    # ---- glue: index plumbing & tiny parameter-only precompute (plain JAX) ----
    QT = jnp.transpose(Q, (0, 2, 1)).astype(f32)                       # (H, N, d)
    Kf = K.astype(f32)                                                 # (H, d, N)
    Zp = jnp.pad(Z, ((0, 0), (0, pad)))                                # padded columns carry weight 0
    wp = jnp.pad(weights.astype(f32), (0, pad))
    # one-hot(Z), c-major within each m-tile: Zoh[mt, j, c*TM + m] = (Z[j, mt*TM + m] == c)
    Zoh = jax.nn.one_hot(Zp, q, dtype=jnp.bfloat16)                    # (N, Mp, q)
    Zoh = Zoh.reshape(N, MT, TM, q).transpose(1, 0, 3, 2).reshape(MT, N, q * TM)
    W3 = wp.reshape(MT, 1, TM)
    V2 = V.reshape(H, q * q).astype(f32)                               # V scalars for SMEM
    VVT = jnp.dot(V2, V2.T)                                            # (H, H) tiny, parameter-only

    kernel = functools.partial(_attention_dca_kernel, q=q, tm=TM, n_heads=H,
                               lambd=float(lambd))
    grid_spec = pltpu.PrefetchScalarGridSpec(
        num_scalar_prefetch=0,
        grid=(MT, H),
        in_specs=[
            pl.BlockSpec((1, N, d), lambda mt, h: (h, 0, 0)),          # Q^T per head
            pl.BlockSpec((1, d, N), lambda mt, h: (h, 0, 0)),          # K per head
            pl.BlockSpec((1, N, q * TM), lambda mt, h: (mt, 0, 0)),    # one-hot(Z), head-invariant
            pl.BlockSpec((1, 1, TM), lambda mt, h: (mt, 0, 0)),        # sequence weights per tile
            pl.BlockSpec(memory_space=pltpu.MemorySpace.SMEM),         # V as (H, q*q) scalars
            pl.BlockSpec(memory_space=pltpu.MemorySpace.SMEM),         # V V^T (H, H)
        ],
        out_specs=pl.BlockSpec((1, 1, 1), lambda mt, h: (mt, 0, 0)),
        scratch_shapes=[
            pltpu.VMEM((N, q * TM), jnp.float32),                      # mat_ene accumulator (a-major)
            pltpu.VMEM((H, N, N), jnp.float32),                        # sf per head (fused reg)
        ],
    )
    out_partial = pl.pallas_call(
        kernel,
        out_shape=jax.ShapeDtypeStruct((MT, 1, 1), f32),
        grid_spec=grid_spec,
        compiler_params=pltpu.CompilerParams(
            dimension_semantics=("parallel", "arbitrary"),
            vmem_limit_bytes=32 * 1024 * 1024),
    )(QT, Kf, Zoh, W3, V2, VVT)
    return jnp.sum(out_partial)


def reference_loss(Q, K, V, Z, weights, lambd):
    """Pure-JAX transcription of AttentionModel.loss_wo_J (default-branch semantics)."""
    H, d, N = Q.shape
    q = V.shape[1]
    e = jnp.einsum('hdi,hdj->ijh', Q, K)
    eye = jnp.eye(N, dtype=bool)
    e = jnp.where(eye[:, :, None], -1e9, e)
    sf = jax.nn.softmax(e, axis=1)
    Vz = V[:, :, Z]                                     # (H, q, N, M)
    mat_ene = jnp.einsum('ijh,hajm->aim', sf, Vz)       # (q, N, M)
    lge = jax.scipy.special.logsumexp(mat_ene, axis=0)  # (N, M)
    sel = jnp.take_along_axis(mat_ene, Z[None, :, :], axis=0)[0]
    pl_term = -jnp.sum(weights[None, :] * (sel - lge))
    mask = 1.0 - jnp.eye(N)
    m_mat = jnp.einsum('ijh,ijk,ij->hk', sf, sf, mask)
    vv = V.reshape(H, -1)
    reg = lambd * jnp.sum(m_mat * (vv @ vv.T))
    return pl_term + reg


if __name__ == "__main__":
    H, d, N, q, M = 4, 8, 16, 8, 256
    lambd = 0.001

    key = jax.random.PRNGKey(0)
    kq, kk, kv, kz, kw = jax.random.split(key, 5)
    Q = jax.random.normal(kq, (H, d, N), dtype=jnp.float32)
    K = jax.random.normal(kk, (H, d, N), dtype=jnp.float32)
    V = jax.random.normal(kv, (H, q, q), dtype=jnp.float32)
    Z = jax.random.randint(kz, (N, M), 0, q, dtype=jnp.int32)
    weights = jax.random.uniform(kw, (M,), dtype=jnp.float32) / M

    loss = attention_dca_loss(Q, K, V, Z, weights, lambd)
    loss = jax.block_until_ready(loss)

    ref = reference_loss(Q, K, V, Z, weights, lambd)
    assert bool(jnp.isfinite(loss)), "kernel produced non-finite loss"
    assert jnp.allclose(loss, ref, rtol=1e-2, atol=1e-1), (float(loss), float(ref))
    print("KERNEL_OK")
</pallas_src>

<mosaic_0001>
module attributes {stable_mosaic.version = 11 : i64} {
  func.func @_attention_dca_kernel(%arg0: i32, %arg1: i32, %arg2: memref<1x16x8xf32, #tpu.memory_space<vmem>>, %arg3: memref<1x8x16xf32, #tpu.memory_space<vmem>>, %arg4: memref<1x16x1024xbf16, #tpu.memory_space<vmem>>, %arg5: memref<1x1x128xf32, #tpu.memory_space<vmem>>, %arg6: memref<4x64xf32, #tpu.memory_space<smem>>, %arg7: memref<4x4xf32, #tpu.memory_space<smem>>, %arg8: memref<1x1x1xf32, #tpu.memory_space<vmem>>, %arg9: memref<16x1024xf32, #tpu.memory_space<vmem>>, %arg10: memref<4x16x16xf32, #tpu.memory_space<vmem>>) attributes {dimension_semantics = [#tpu.dimension_semantics<parallel>, #tpu.dimension_semantics<arbitrary>], iteration_bounds = array<i64: 2, 4>, scalar_prefetch = 0 : i64, scratch_operands = 2 : i64, tpu.core_type = #tpu.core_type<tc>, window_params = [{transform_indices = @transform_0, window_bounds = array<i64: 1, 16, 8>}, {transform_indices = @transform_1, window_bounds = array<i64: 1, 8, 16>}, {transform_indices = @transform_2, window_bounds = array<i64: 1, 16, 1024>}, {transform_indices = @transform_3, window_bounds = array<i64: 1, 1, 128>}, {transform_indices = @transform_4, window_bounds = array<i64: 4, 64>}, {transform_indices = @transform_5, window_bounds = array<i64: 4, 4>}, {transform_indices = @transform_6, window_bounds = array<i64: 1, 1, 1>}]} {
    %c0_i32 = arith.constant 0 : i32
    %0 = arith.cmpi eq, %arg1, %c0_i32 : i32
    %1 = arith.extui %0 : i1 to i32
    %c0_i32_0 = arith.constant 0 : i32
    %2 = arith.cmpi ne, %1, %c0_i32_0 : i32
    scf.if %2 {
      %cst_42 = arith.constant 0.000000e+00 : f32
      %433 = vector.broadcast %cst_42 : f32 to vector<16x1024xf32>
      %c0_43 = arith.constant 0 : index
      %c0_44 = arith.constant 0 : index
      %434 = vector.load %arg9[%c0_43, %c0_44] : memref<16x1024xf32, #tpu.memory_space<vmem>>, vector<16x1024xf32>
      tpu.vector_store %arg9[%c0_43, %c0_44], %433 {strides = array<i32>} : memref<16x1024xf32, #tpu.memory_space<vmem>>, vector<16x1024xf32>,
    } else {
    }
    %c0 = arith.constant 0 : index
    %c0_1 = arith.constant 0 : index
    %c0_2 = arith.constant 0 : index
    %3 = vector.load %arg2[%c0, %c0_1, %c0_2] : memref<1x16x8xf32, #tpu.memory_space<vmem>>, vector<1x16x8xf32>
    %4 = vector.shape_cast %3 : vector<1x16x8xf32> to vector<16x8xf32>
    %c0_3 = arith.constant 0 : index
    %c0_4 = arith.constant 0 : index
    %c0_5 = arith.constant 0 : index
    %5 = vector.load %arg3[%c0_3, %c0_4, %c0_5] : memref<1x8x16xf32, #tpu.memory_space<vmem>>, vector<1x8x16xf32>
    %6 = vector.shape_cast %5 : vector<1x8x16xf32> to vector<8x16xf32>
    %cst = arith.constant dense<0.000000e+00> : vector<16x16xf32>
    %7 = tpu.matmul %4, %6, %cst {dimension_numbers = #tpu.dot_dimension_numbers<[1], [0], [0], [1], [0, 0, 1, 1], [], []>} : vector<16x8xf32>, vector<8x16xf32>, vector<16x16xf32> -> vector<16x16xf32>
    %8 = tpu.iota {dimensions = array<i32: 0>} : vector<16x16xi32>
    %9 = tpu.iota {dimensions = array<i32: 1>} : vector<16x16xi32>
    %10 = arith.cmpi eq, %8, %9 : vector<16x16xi32>
    %cst_6 = arith.constant -1.000000e+09 : f32
    %11 = vector.broadcast %cst_6 : f32 to vector<16x16xf32>
    %12 = arith.select %10, %11, %7 : vector<16x16xi1>, vector<16x16xf32>
    %cst_7 = arith.constant dense<0xFF800000> : vector<16xf32>
    %13 = vector.multi_reduction <maximumf>, %12, %cst_7 [1] : vector<16x16xf32> to vector<16xf32>
    %14 = vector.shape_cast %13 : vector<16xf32> to vector<16x1xf32>
    %15 = vector.broadcast %14 : vector<16x1xf32> to vector<16x16xf32>
    %16 = arith.subf %12, %15 : vector<16x16xf32>
    %17 = math.exp %16 : vector<16x16xf32>
    %cst_8 = arith.constant dense<0.000000e+00> : vector<16xf32>
    %18 = vector.multi_reduction <add>, %17, %cst_8 [1] : vector<16x16xf32> to vector<16xf32>
    %19 = vector.shape_cast %18 : vector<16xf32> to vector<16x1xf32>
    %20 = tpu.reciprocal %19 {approx = true} : vector<16x1xf32> -> vector<16x1xf32>
    %21 = vector.broadcast %20 : vector<16x1xf32> to vector<16x16xf32>
    %22 = arith.mulf %17, %21 : vector<16x16xf32>
    %c0_i32_9 = arith.constant 0 : i32
    %23 = arith.cmpi eq, %arg0, %c0_i32_9 : i32
    %24 = arith.extui %23 : i1 to i32
    %c0_i32_10 = arith.constant 0 : i32
    %25 = arith.cmpi ne, %24, %c0_i32_10 : i32
    scf.if %25 {
      %433 = arith.index_cast %arg1 : i32 to index
      %c0_42 = arith.constant 0 : index
      %c0_43 = arith.constant 0 : index
      %434 = vector.load %arg10[%433, %c0_42, %c0_43] : memref<4x16x16xf32, #tpu.memory_space<vmem>>, vector<1x16x16xf32>
      %435 = vector.shape_cast %434 : vector<1x16x16xf32> to vector<16x16xf32>
      %436 = vector.shape_cast %22 : vector<16x16xf32> to vector<1x16x16xf32>
      tpu.vector_store %arg10[%433, %c0_42, %c0_43], %436 {strides = array<i32>} : memref<4x16x16xf32, #tpu.memory_space<vmem>>, vector<1x16x16xf32>,
    } else {
    }
    %c0_11 = arith.constant 0 : index
    %c0_12 = arith.constant 0 : index
    %c0_13 = arith.constant 0 : index
    %26 = vector.load %arg4[%c0_11, %c0_12, %c0_13] : memref<1x16x1024xbf16, #tpu.memory_space<vmem>>, vector<1x16x1024xbf16>
    %27 = vector.shape_cast %26 : vector<1x16x1024xbf16> to vector<16x1024xbf16>
    %28 = arith.truncf %22 : vector<16x16xf32> to vector<16x16xbf16>
    %cst_14 = arith.constant dense<0.000000e+00> : vector<16x1024xf32>
    %29 = tpu.matmul %28, %27, %cst_14 {dimension_numbers = #tpu.dot_dimension_numbers<[1], [0], [0], [1], [0, 0, 1, 1], [], []>} : vector<16x16xbf16>, vector<16x1024xbf16>, vector<16x1024xf32> -> vector<16x1024xf32>
    %30 = arith.index_cast %arg1 : i32 to index
    %c0_15 = arith.constant 0 : index
    %31 = memref.load %arg6[%30, %c0_15] : memref<4x64xf32, #tpu.memory_space<smem>>
    %32 = vector.extract_strided_slice %29 {offsets = [0, 0], sizes = [16, 128], strides = [1, 1]} : vector<16x1024xf32> to vector<16x128xf32>
    %33 = vector.broadcast %31 : f32 to vector<16x128xf32>
    %34 = arith.mulf %33, %32 : vector<16x128xf32>
    %35 = arith.index_cast %arg1 : i32 to index
    %c1 = arith.constant 1 : index
    %36 = memref.load %arg6[%35, %c1] : memref<4x64xf32, #tpu.memory_space<smem>>
    %37 = vector.extract_strided_slice %29 {offsets = [0, 128], sizes = [16, 128], strides = [1, 1]} : vector<16x1024xf32> to vector<16x128xf32>
    %38 = vector.broadcast %36 : f32 to vector<16x128xf32>
    %39 = arith.mulf %38, %37 : vector<16x128xf32>
    %40 = arith.addf %34, %39 : vector<16x128xf32>
    %41 = arith.index_cast %arg1 : i32 to index
    %c2 = arith.constant 2 : index
    %42 = memref.load %arg6[%41, %c2] : memref<4x64xf32, #tpu.memory_space<smem>>
    %43 = vector.extract_strided_slice %29 {offsets = [0, 256], sizes = [16, 128], strides = [1, 1]} : vector<16x1024xf32> to vector<16x128xf32>
    %44 = vector.broadcast %42 : f32 to vector<16x128xf32>
    %45 = arith.mulf %44, %43 : vector<16x128xf32>
    %46 = arith.addf %40, %45 : vector<16x128xf32>
    %47 = arith.index_cast %arg1 : i32 to index
    %c3 = arith.constant 3 : index
    %48 = memref.load %arg6[%47, %c3] : memref<4x64xf32, #tpu.memory_space<smem>>
    %49 = vector.extract_strided_slice %29 {offsets = [0, 384], sizes = [16, 128], strides = [1, 1]} : vector<16x1024xf32> to vector<16x128xf32>
    %50 = vector.broadcast %48 : f32 to vector<16x128xf32>
    %51 = arith.mulf %50, %49 : vector<16x128xf32>
    %52 = arith.addf %46, %51 : vector<16x128xf32>
    %53 = arith.index_cast %arg1 : i32 to index
    %c4 = arith.constant 4 : index
    %54 = memref.load %arg6[%53, %c4] : memref<4x64xf32, #tpu.memory_space<smem>>
    %55 = vector.extract_strided_slice %29 {offsets = [0, 512], sizes = [16, 128], strides = [1, 1]} : vector<16x1024xf32> to vector<16x128xf32>
    %56 = vector.broadcast %54 : f32 to vector<16x128xf32>
    %57 = arith.mulf %56, %55 : vector<16x128xf32>
    %58 = arith.addf %52, %57 : vector<16x128xf32>
    %59 = arith.index_cast %arg1 : i32 to index
    %c5 = arith.constant 5 : index
    %60 = memref.load %arg6[%59, %c5] : memref<4x64xf32, #tpu.memory_space<smem>>
    %61 = vector.extract_strided_slice %29 {offsets = [0, 640], sizes = [16, 128], strides = [1, 1]} : vector<16x1024xf32> to vector<16x128xf32>
    %62 = vector.broadcast %60 : f32 to vector<16x128xf32>
    %63 = arith.mulf %62, %61 : vector<16x128xf32>
    %64 = arith.addf %58, %63 : vector<16x128xf32>
    %65 = arith.index_cast %arg1 : i32 to index
    %c6 = arith.constant 6 : index
    %66 = memref.load %arg6[%65, %c6] : memref<4x64xf32, #tpu.memory_space<smem>>
    %67 = vector.extract_strided_slice %29 {offsets = [0, 768], sizes = [16, 128], strides = [1, 1]} : vector<16x1024xf32> to vector<16x128xf32>
    %68 = vector.broadcast %66 : f32 to vector<16x128xf32>
    %69 = arith.mulf %68, %67 : vector<16x128xf32>
    %70 = arith.addf %64, %69 : vector<16x128xf32>
    %71 = arith.index_cast %arg1 : i32 to index
    %c7 = arith.constant 7 : index
    %72 = memref.load %arg6[%71, %c7] : memref<4x64xf32, #tpu.memory_space<smem>>
    %73 = vector.extract_strided_slice %29 {offsets = [0, 896], sizes = [16, 128], strides = [1, 1]} : vector<16x1024xf32> to vector<16x128xf32>
    %74 = vector.broadcast %72 : f32 to vector<16x128xf32>
    %75 = arith.mulf %74, %73 : vector<16x128xf32>
    %76 = arith.addf %70, %75 : vector<16x128xf32>
    %c0_16 = arith.constant 0 : index
    %c0_17 = arith.constant 0 : index
    %77 = vector.load %arg9[%c0_16, %c0_17] : memref<16x1024xf32, #tpu.memory_space<vmem>>, vector<16x128xf32>
    %78 = arith.addf %77, %76 : vector<16x128xf32>
    %c0_18 = arith.constant 0 : index
    %c0_19 = arith.constant 0 : index
    %79 = vector.load %arg9[%c0_18, %c0_19] : memref<16x1024xf32, #tpu.memory_space<vmem>>, vector<16x128xf32>
    tpu.vector_store %arg9[%c0_18, %c0_19], %78 {strides = array<i32>} : memref<16x1024xf32, #tpu.memory_space<vmem>>, vector<16x128xf32>,
    %80 = arith.index_cast %arg1 : i32 to index
    %c8 = arith.constant 8 : index
    %81 = memref.load %arg6[%80, %c8] : memref<4x64xf32, #tpu.memory_space<smem>>
    %82 = vector.extract_strided_slice %29 {offsets = [0, 0], sizes = [16, 128], strides = [1, 1]} : vector<16x1024xf32> to vector<16x128xf32>
    %83 = vector.broadcast %81 : f32 to vector<16x128xf32>
    %84 = arith.mulf %83, %82 : vector<16x128xf32>
    %85 = arith.index_cast %arg1 : i32 to index
    %c9 = arith.constant 9 : index
    %86 = memref.load %arg6[%85, %c9] : memref<4x64xf32, #tpu.memory_space<smem>>
    %87 = vector.extract_strided_slice %29 {offsets = [0, 128], sizes = [16, 128], strides = [1, 1]} : vector<16x1024xf32> to vector<16x128xf32>
    %88 = vector.broadcast %86 : f32 to vector<16x128xf32>
    %89 = arith.mulf %88, %87 : vector<16x128xf32>
    %90 = arith.addf %84, %89 : vector<16x128xf32>
    %91 = arith.index_cast %arg1 : i32 to index
    %c10 = arith.constant 10 : index
    %92 = memref.load %arg6[%91, %c10] : memref<4x64xf32, #tpu.memory_space<smem>>
    %93 = vector.extract_strided_slice %29 {offsets = [0, 256], sizes = [16, 128], strides = [1, 1]} : vector<16x1024xf32> to vector<16x128xf32>
    %94 = vector.broadcast %92 : f32 to vector<16x128xf32>
    %95 = arith.mulf %94, %93 : vector<16x128xf32>
    %96 = arith.addf %90, %95 : vector<16x128xf32>
    %97 = arith.index_cast %arg1 : i32 to index
    %c11 = arith.constant 11 : index
    %98 = memref.load %arg6[%97, %c11] : memref<4x64xf32, #tpu.memory_space<smem>>
    %99 = vector.extract_strided_slice %29 {offsets = [0, 384], sizes = [16, 128], strides = [1, 1]} : vector<16x1024xf32> to vector<16x128xf32>
    %100 = vector.broadcast %98 : f32 to vector<16x128xf32>
    %101 = arith.mulf %100, %99 : vector<16x128xf32>
    %102 = arith.addf %96, %101 : vector<16x128xf32>
    %103 = arith.index_cast %arg1 : i32 to index
    %c12 = arith.constant 12 : index
    %104 = memref.load %arg6[%103, %c12] : memref<4x64xf32, #tpu.memory_space<smem>>
    %105 = vector.extract_strided_slice %29 {offsets = [0, 512], sizes = [16, 128], strides = [1, 1]} : vector<16x1024xf32> to vector<16x128xf32>
    %106 = vector.broadcast %104 : f32 to vector<16x128xf32>
    %107 = arith.mulf %106, %105 : vector<16x128xf32>
    %108 = arith.addf %102, %107 : vector<16x128xf32>
    %109 = arith.index_cast %arg1 : i32 to index
    %c13 = arith.constant 13 : index
    %110 = memref.load %arg6[%109, %c13] : memref<4x64xf32, #tpu.memory_space<smem>>
    %111 = vector.extract_strided_slice %29 {offsets = [0, 640], sizes = [16, 128], strides = [1, 1]} : vector<16x1024xf32> to vector<16x128xf32>
    %112 = vector.broadcast %110 : f32 to vector<16x128xf32>
    %113 = arith.mulf %112, %111 : vector<16x128xf32>
    %114 = arith.addf %108, %113 : vector<16x128xf32>
    %115 = arith.index_cast %arg1 : i32 to index
    %c14 = arith.constant 14 : index
    %116 = memref.load %arg6[%115, %c14] : memref<4x64xf32, #tpu.memory_space<smem>>
    %117 = vector.extract_strided_slice %29 {offsets = [0, 768], sizes = [16, 128], strides = [1, 1]} : vector<16x1024xf32> to vector<16x128xf32>
    %118 = vector.broadcast %116 : f32 to vector<16x128xf32>
    %119 = arith.mulf %118, %117 : vector<16x128xf32>
    %120 = arith.addf %114, %119 : vector<16x128xf32>
    %121 = arith.index_cast %arg1 : i32 to index
    %c15 = arith.constant 15 : index
    %122 = memref.load %arg6[%121, %c15] : memref<4x64xf32, #tpu.memory_space<smem>>
    %123 = vector.extract_strided_slice %29 {offsets = [0, 896], sizes = [16, 128], strides = [1, 1]} : vector<16x1024xf32> to vector<16x128xf32>
    %124 = vector.broadcast %122 : f32 to vector<16x128xf32>
    %125 = arith.mulf %124, %123 : vector<16x128xf32>
    %126 = arith.addf %120, %125 : vector<16x128xf32>
    %c0_20 = arith.constant 0 : index
    %c128 = arith.constant 128 : index
    %127 = vector.load %arg9[%c0_20, %c128] : memref<16x1024xf32, #tpu.memory_space<vmem>>, vector<16x128xf32>
    %128 = arith.addf %127, %126 : vector<16x128xf32>
    %c0_21 = arith.constant 0 : index
    %c128_22 = arith.constant 128 : index
    %129 = vector.load %arg9[%c0_21, %c128_22] : memref<16x1024xf32, #tpu.memory_space<vmem>>, vector<16x128xf32>
    tpu.vector_store %arg9[%c0_21, %c128_22], %128 {strides = array<i32>} : memref<16x1024xf32, #tpu.memory_space<vmem>>, vector<16x128xf32>,
    %130 = arith.index_cast %arg1 : i32 to index
    %c16 = arith.constant 16 : index
    %131 = memref.load %arg6[%130, %c16] : memref<4x64xf32, #tpu.memory_space<smem>>
    %132 = vector.extract_strided_slice %29 {offsets = [0, 0], sizes = [16, 128], strides = [1, 1]} : vector<16x1024xf32> to vector<16x128xf32>
    %133 = vector.broadcast %131 : f32 to vector<16x128xf32>
    %134 = arith.mulf %133, %132 : vector<16x128xf32>
    %135 = arith.index_cast %arg1 : i32 to index
    %c17 = arith.constant 17 : index
    %136 = memref.load %arg6[%135, %c17] : memref<4x64xf32, #tpu.memory_space<smem>>
    %137 = vector.extract_strided_slice %29 {offsets = [0, 128], sizes = [16, 128], strides = [1, 1]} : vector<16x1024xf32> to vector<16x128xf32>
    %138 = vector.broadcast %136 : f32 to vector<16x128xf32>
    %139 = arith.mulf %138, %137 : vector<16x128xf32>
    %140 = arith.addf %134, %139 : vector<16x128xf32>
    %141 = arith.index_cast %arg1 : i32 to index
    %c18 = arith.constant 18 : index
    %142 = memref.load %arg6[%141, %c18] : memref<4x64xf32, #tpu.memory_space<smem>>
    %143 = vector.extract_strided_slice %29 {offsets = [0, 256], sizes = [16, 128], strides = [1, 1]} : vector<16x1024xf32> to vector<16x128xf32>
    %144 = vector.broadcast %142 : f32 to vector<16x128xf32>
    %145 = arith.mulf %144, %143 : vector<16x128xf32>
    %146 = arith.addf %140, %145 : vector<16x128xf32>
    %147 = arith.index_cast %arg1 : i32 to index
    %c19 = arith.constant 19 : index
    %148 = memref.load %arg6[%147, %c19] : memref<4x64xf32, #tpu.memory_space<smem>>
    %149 = vector.extract_strided_slice %29 {offsets = [0, 384], sizes = [16, 128], strides = [1, 1]} : vector<16x1024xf32> to vector<16x128xf32>
    %150 = vector.broadcast %148 : f32 to vector<16x128xf32>
    %151 = arith.mulf %150, %149 : vector<16x128xf32>
    %152 = arith.addf %146, %151 : vector<16x128xf32>
    %153 = arith.index_cast %arg1 : i32 to index
    %c20 = arith.constant 20 : index
    %154 = memref.load %arg6[%153, %c20] : memref<4x64xf32, #tpu.memory_space<smem>>
    %155 = vector.extract_strided_slice %29 {offsets = [0, 512], sizes = [16, 128], strides = [1, 1]} : vector<16x1024xf32> to vector<16x128xf32>
    %156 = vector.broadcast %154 : f32 to vector<16x128xf32>
    %157 = arith.mulf %156, %155 : vector<16x128xf32>
    %158 = arith.addf %152, %157 : vector<16x128xf32>
    %159 = arith.index_cast %arg1 : i32 to index
    %c21 = arith.constant 21 : index
    %160 = memref.load %arg6[%159, %c21] : memref<4x64xf32, #tpu.memory_space<smem>>
    %161 = vector.extract_strided_slice %29 {offsets = [0, 640], sizes = [16, 128], strides = [1, 1]} : vector<16x1024xf32> to vector<16x128xf32>
    %162 = vector.broadcast %160 : f32 to vector<16x128xf32>
    %163 = arith.mulf %162, %161 : vector<16x128xf32>
    %164 = arith.addf %158, %163 : vector<16x128xf32>
    %165 = arith.index_cast %arg1 : i32 to index
    %c22 = arith.constant 22 : index
    %166 = memref.load %arg6[%165, %c22] : memref<4x64xf32, #tpu.memory_space<smem>>
    %167 = vector.extract_strided_slice %29 {offsets = [0, 768], sizes = [16, 128], strides = [1, 1]} : vector<16x1024xf32> to vector<16x128xf32>
    %168 = vector.broadcast %166 : f32 to vector<16x128xf32>
    %169 = arith.mulf %168, %167 : vector<16x128xf32>
    %170 = arith.addf %164, %169 : vector<16x128xf32>
    %171 = arith.index_cast %arg1 : i32 to index
    %c23 = arith.constant 23 : index
    %172 = memref.load %arg6[%171, %c23] : memref<4x64xf32, #tpu.memory_space<smem>>
    %173 = vector.extract_strided_slice %29 {offsets = [0, 896], sizes = [16, 128], strides = [1, 1]} : vector<16x1024xf32> to vector<16x128xf32>
    %174 = vector.broadcast %172 : f32 to vector<16x128xf32>
    %175 = arith.mulf %174, %173 : vector<16x128xf32>
    %176 = arith.addf %170, %175 : vector<16x128xf32>
    %c0_23 = arith.constant 0 : index
    %c256 = arith.constant 256 : index
    %177 = vector.load %arg9[%c0_23, %c256] : memref<16x1024xf32, #tpu.memory_space<vmem>>, vector<16x128xf32>
    %178 = arith.addf %177, %176 : vector<16x128xf32>
    %c0_24 = arith.constant 0 : index
    %c256_25 = arith.constant 256 : index
    %179 = vector.load %arg9[%c0_24, %c256_25] : memref<16x1024xf32, #tpu.memory_space<vmem>>, vector<16x128xf32>
    tpu.vector_store %arg9[%c0_24, %c256_25], %178 {strides = array<i32>} : memref<16x1024xf32, #tpu.memory_space<vmem>>, vector<16x128xf32>,
    %180 = arith.index_cast %arg1 : i32 to index
    %c24 = arith.constant 24 : index
    %181 = memref.load %arg6[%180, %c24] : memref<4x64xf32, #tpu.memory_space<smem>>
    %182 = vector.extract_strided_slice %29 {offsets = [0, 0], sizes = [16, 128], strides = [1, 1]} : vector<16x1024xf32> to vector<16x128xf32>
    %183 = vector.broadcast %181 : f32 to vector<16x128xf32>
    %184 = arith.mulf %183, %182 : vector<16x128xf32>
    %185 = arith.index_cast %arg1 : i32 to index
    %c25 = arith.constant 25 : index
    %186 = memref.load %arg6[%185, %c25] : memref<4x64xf32, #tpu.memory_space<smem>>
    %187 = vector.extract_strided_slice %29 {offsets = [0, 128], sizes = [16, 128], strides = [1, 1]} : vector<16x1024xf32> to vector<16x128xf32>
    %188 = vector.broadcast %186 : f32 to vector<16x128xf32>
    %189 = arith.mulf %188, %187 : vector<16x128xf32>
    %190 = arith.addf %184, %189 : vector<16x128xf32>
    %191 = arith.index_cast %arg1 : i32 to index
    %c26 = arith.constant 26 : index
    %192 = memref.load %arg6[%191, %c26] : memref<4x64xf32, #tpu.memory_space<smem>>
    %193 = vector.extract_strided_slice %29 {offsets = [0, 256], sizes = [16, 128], strides = [1, 1]} : vector<16x1024xf32> to vector<16x128xf32>
    %194 = vector.broadcast %192 : f32 to vector<16x128xf32>
    %195 = arith.mulf %194, %193 : vector<16x128xf32>
    %196 = arith.addf %190, %195 : vector<16x128xf32>
    %197 = arith.index_cast %arg1 : i32 to index
    %c27 = arith.constant 27 : index
    %198 = memref.load %arg6[%197, %c27] : memref<4x64xf32, #tpu.memory_space<smem>>
    %199 = vector.extract_strided_slice %29 {offsets = [0, 384], sizes = [16, 128], strides = [1, 1]} : vector<16x1024xf32> to vector<16x128xf32>
    %200 = vector.broadcast %198 : f32 to vector<16x128xf32>
    %201 = arith.mulf %200, %199 : vector<16x128xf32>
    %202 = arith.addf %196, %201 : vector<16x128xf32>
    %203 = arith.index_cast %arg1 : i32 to index
    %c28 = arith.constant 28 : index
    %204 = memref.load %arg6[%203, %c28] : memref<4x64xf32, #tpu.memory_space<smem>>
    %205 = vector.extract_strided_slice %29 {offsets = [0, 512], sizes = [16, 128], strides = [1, 1]} : vector<16x1024xf32> to vector<16x128xf32>
    %206 = vector.broadcast %204 : f32 to vector<16x128xf32>
    %207 = arith.mulf %206, %205 : vector<16x128xf32>
    %208 = arith.addf %202, %207 : vector<16x128xf32>
    %209 = arith.index_cast %arg1 : i32 to index
    %c29 = arith.constant 29 : index
    %210 = memref.load %arg6[%209, %c29] : memref<4x64xf32, #tpu.memory_space<smem>>
    %211 = vector.extract_strided_slice %29 {offsets = [0, 640], sizes = [16, 128], strides = [1, 1]} : vector<16x1024xf32> to vector<16x128xf32>
    %212 = vector.broadcast %210 : f32 to vector<16x128xf32>
    %213 = arith.mulf %212, %211 : vector<16x128xf32>
    %214 = arith.addf %208, %213 : vector<16x128xf32>
    %215 = arith.index_cast %arg1 : i32 to index
    %c30 = arith.constant 30 : index
    %216 = memref.load %arg6[%215, %c30] : memref<4x64xf32, #tpu.memory_space<smem>>
    %217 = vector.extract_strided_slice %29 {offsets = [0, 768], sizes = [16, 128], strides = [1, 1]} : vector<16x1024xf32> to vector<16x128xf32>
    %218 = vector.broadcast %216 : f32 to vector<16x128xf32>
    %219 = arith.mulf %218, %217 : vector<16x128xf32>
    %220 = arith.addf %214, %219 : vector<16x128xf32>
    %221 = arith.index_cast %arg1 : i32 to index
    %c31 = arith.constant 31 : index
    %222 = memref.load %arg6[%221, %c31] : memref<4x64xf32, #tpu.memory_space<smem>>
    %223 = vector.extract_strided_slice %29 {offsets = [0, 896], sizes = [16, 128], strides = [1, 1]} : vector<16x1024xf32> to vector<16x128xf32>
    %224 = vector.broadcast %222 : f32 to vector<16x128xf32>
    %225 = arith.mulf %224, %223 : vector<16x128xf32>
    %226 = arith.addf %220, %225 : vector<16x128xf32>
    %c0_26 = arith.constant 0 : index
    %c384 = arith.constant 384 : index
    %227 = vector.load %arg9[%c0_26, %c384] : memref<16x1024xf32, #tpu.memory_space<vmem>>, vector<16x128xf32>
    %228 = arith.addf %227, %226 : vector<16x128xf32>
    %c0_27 = arith.constant 0 : index
    %c384_28 = arith.constant 384 : index
    %229 = vector.load %arg9[%c0_27, %c384_28] : memref<16x1024xf32, #tpu.memory_space<vmem>>, vector<16x128xf32>
    tpu.vector_store %arg9[%c0_27, %c384_28], %228 {strides = array<i32>} : memref<16x1024xf32, #tpu.memory_space<vmem>>, vector<16x128xf32>,
    %230 = arith.index_cast %arg1 : i32 to index
    %c32 = arith.constant 32 : index
    %231 = memref.load %arg6[%230, %c32] : memref<4x64xf32, #tpu.memory_space<smem>>
    %232 = vector.extract_strided_slice %29 {offsets = [0, 0], sizes = [16, 128], strides = [1, 1]} : vector<16x1024xf32> to vector<16x128xf32>
    %233 = vector.broadcast %231 : f32 to vector<16x128xf32>
    %234 = arith.mulf %233, %232 : vector<16x128xf32>
    %235 = arith.index_cast %arg1 : i32 to index
    %c33 = arith.constant 33 : index
    %236 = memref.load %arg6[%235, %c33] : memref<4x64xf32, #tpu.memory_space<smem>>
    %237 = vector.extract_strided_slice %29 {offsets = [0, 128], sizes = [16, 128], strides = [1, 1]} : vector<16x1024xf32> to vector<16x128xf32>
    %238 = vector.broadcast %236 : f32 to vector<16x128xf32>
    %239 = arith.mulf %238, %237 : vector<16x128xf32>
    %240 = arith.addf %234, %239 : vector<16x128xf32>
    %241 = arith.index_cast %arg1 : i32 to index
    %c34 = arith.constant 34 : index
    %242 = memref.load %arg6[%241, %c34] : memref<4x64xf32, #tpu.memory_space<smem>>
    %243 = vector.extract_strided_slice %29 {offsets = [0, 256], sizes = [16, 128], strides = [1, 1]} : vector<16x1024xf32> to vector<16x128xf32>
    %244 = vector.broadcast %242 : f32 to vector<16x128xf32>
    %245 = arith.mulf %244, %243 : vector<16x128xf32>
    %246 = arith.addf %240, %245 : vector<16x128xf32>
    %247 = arith.index_cast %arg1 : i32 to index
    %c35 = arith.constant 35 : index
    %248 = memref.load %arg6[%247, %c35] : memref<4x64xf32, #tpu.memory_space<smem>>
    %249 = vector.extract_strided_slice %29 {offsets = [0, 384], sizes = [16, 128], strides = [1, 1]} : vector<16x1024xf32> to vector<16x128xf32>
    %250 = vector.broadcast %248 : f32 to vector<16x128xf32>
    %251 = arith.mulf %250, %249 : vector<16x128xf32>
    %252 = arith.addf %246, %251 : vector<16x128xf32>
    %253 = arith.index_cast %arg1 : i32 to index
    %c36 = arith.constant 36 : index
    %254 = memref.load %arg6[%253, %c36] : memref<4x64xf32, #tpu.memory_space<smem>>
    %255 = vector.extract_strided_slice %29 {offsets = [0, 512], sizes = [16, 128], strides = [1, 1]} : vector<16x1024xf32> to vector<16x128xf32>
    %256 = vector.broadcast %254 : f32 to vector<16x128xf32>
    %257 = arith.mulf %256, %255 : vector<16x128xf32>
    %258 = arith.addf %252, %257 : vector<16x128xf32>
    %259 = arith.index_cast %arg1 : i32 to index
    %c37 = arith.constant 37 : index
    %260 = memref.load %arg6[%259, %c37] : memref<4x64xf32, #tpu.memory_space<smem>>
    %261 = vector.extract_strided_slice %29 {offsets = [0, 640], sizes = [16, 128], strides = [1, 1]} : vector<16x1024xf32> to vector<16x128xf32>
    %262 = vector.broadcast %260 : f32 to vector<16x128xf32>
    %263 = arith.mulf %262, %261 : vector<16x128xf32>
    %264 = arith.addf %258, %263 : vector<16x128xf32>
    %265 = arith.index_cast %arg1 : i32 to index
    %c38 = arith.constant 38 : index
    %266 = memref.load %arg6[%265, %c38] : memref<4x64xf32, #tpu.memory_space<smem>>
    %267 = vector.extract_strided_slice %29 {offsets = [0, 768], sizes = [16, 128], strides = [1, 1]} : vector<16x1024xf32> to vector<16x128xf32>
    %268 = vector.broadcast %266 : f32 to vector<16x128xf32>
    %269 = arith.mulf %268, %267 : vector<16x128xf32>
    %270 = arith.addf %264, %269 : vector<16x128xf32>
    %271 = arith.index_cast %arg1 : i32 to index
    %c39 = arith.constant 39 : index
    %272 = memref.load %arg6[%271, %c39] : memref<4x64xf32, #tpu.memory_space<smem>>
    %273 = vector.extract_strided_slice %29 {offsets = [0, 896], sizes = [16, 128], strides = [1, 1]} : vector<16x1024xf32> to vector<16x128xf32>
    %274 = vector.broadcast %272 : f32 to vector<16x128xf32>
    %275 = arith.mulf %274, %273 : vector<16x128xf32>
    %276 = arith.addf %270, %275 : vector<16x128xf32>
    %c0_29 = arith.constant 0 : index
    %c512 = arith.constant 512 : index
    %277 = vector.load %arg9[%c0_29, %c512] : memref<16x1024xf32, #tpu.memory_space<vmem>>, vector<16x128xf32>
    %278 = arith.addf %277, %276 : vector<16x128xf32>
    %c0_30 = arith.constant 0 : index
    %c512_31 = arith.constant 512 : index
    %279 = vector.load %arg9[%c0_30, %c512_31] : memref<16x1024xf32, #tpu.memory_space<vmem>>, vector<16x128xf32>
    tpu.vector_store %arg9[%c0_30, %c512_31], %278 {strides = array<i32>} : memref<16x1024xf32, #tpu.memory_space<vmem>>, vector<16x128xf32>,
    %280 = arith.index_cast %arg1 : i32 to index
    %c40 = arith.constant 40 : index
    %281 = memref.load %arg6[%280, %c40] : memref<4x64xf32, #tpu.memory_space<smem>>
    %282 = vector.extract_strided_slice %29 {offsets = [0, 0], sizes = [16, 128], strides = [1, 1]} : vector<16x1024xf32> to vector<16x128xf32>
    %283 = vector.broadcast %281 : f32 to vector<16x128xf32>
    %284 = arith.mulf %283, %282 : vector<16x128xf32>
    %285 = arith.index_cast %arg1 : i32 to index
    %c41 = arith.constant 41 : index
    %286 = memref.load %arg6[%285, %c41] : memref<4x64xf32, #tpu.memory_space<smem>>
    %287 = vector.extract_strided_slice %29 {offsets = [0, 128], sizes = [16, 128], strides = [1, 1]} : vector<16x1024xf32> to vector<16x128xf32>
    %288 = vector.broadcast %286 : f32 to vector<16x128xf32>
    %289 = arith.mulf %288, %287 : vector<16x128xf32>
    %290 = arith.addf %284, %289 : vector<16x128xf32>
    %291 = arith.index_cast %arg1 : i32 to index
    %c42 = arith.constant 42 : index
    %292 = memref.load %arg6[%291, %c42] : memref<4x64xf32, #tpu.memory_space<smem>>
    %293 = vector.extract_strided_slice %29 {offsets = [0, 256], sizes = [16, 128], strides = [1, 1]} : vector<16x1024xf32> to vector<16x128xf32>
    %294 = vector.broadcast %292 : f32 to vector<16x128xf32>
    %295 = arith.mulf %294, %293 : vector<16x128xf32>
    %296 = arith.addf %290, %295 : vector<16x128xf32>
    %297 = arith.index_cast %arg1 : i32 to index
    %c43 = arith.constant 43 : index
    %298 = memref.load %arg6[%297, %c43] : memref<4x64xf32, #tpu.memory_space<smem>>
    %299 = vector.extract_strided_slice %29 {offsets = [0, 384], sizes = [16, 128], strides = [1, 1]} : vector<16x1024xf32> to vector<16x128xf32>
    %300 = vector.broadcast %298 : f32 to vector<16x128xf32>
    %301 = arith.mulf %300, %299 : vector<16x128xf32>
    %302 = arith.addf %296, %301 : vector<16x128xf32>
    %303 = arith.index_cast %arg1 : i32 to index
    %c44 = arith.constant 44 : index
    %304 = memref.load %arg6[%303, %c44] : memref<4x64xf32, #tpu.memory_space<smem>>
    %305 = vector.extract_strided_slice %29 {offsets = [0, 512], sizes = [16, 128], strides = [1, 1]} : vector<16x1024xf32> to vector<16x128xf32>
    %306 = vector.broadcast %304 : f32 to vector<16x128xf32>
    %307 = arith.mulf %306, %305 : vector<16x128xf32>
    %308 = arith.addf %302, %307 : vector<16x128xf32>
    %309 = arith.index_cast %arg1 : i32 to index
    %c45 = arith.constant 45 : index
    %310 = memref.load %arg6[%309, %c45] : memref<4x64xf32, #tpu.memory_space<smem>>
    %311 = vector.extract_strided_slice %29 {offsets = [0, 640], sizes = [16, 128], strides = [1, 1]} : vector<16x1024xf32> to vector<16x128xf32>
    %312 = vector.broadcast %310 : f32 to vector<16x128xf32>
    %313 = arith.mulf %312, %311 : vector<16x128xf32>
    %314 = arith.addf %308, %313 : vector<16x128xf32>
    %315 = arith.index_cast %arg1 : i32 to index
    %c46 = arith.constant 46 : index
    %316 = memref.load %arg6[%315, %c46] : memref<4x64xf32, #tpu.memory_space<smem>>
    %317 = vector.extract_strided_slice %29 {offsets = [0, 768], sizes = [16, 128], strides = [1, 1]} : vector<16x1024xf32> to vector<16x128xf32>
    %318 = vector.broadcast %316 : f32 to vector<16x128xf32>
    %319 = arith.mulf %318, %317 : vector<16x128xf32>
    %320 = arith.addf %314, %319 : vector<16x128xf32>
    %321 = arith.index_cast %arg1 : i32 to index
    %c47 = arith.constant 47 : index
    %322 = memref.load %arg6[%321, %c47] : memref<4x64xf32, #tpu.memory_space<smem>>
    %323 = vector.extract_strided_slice %29 {offsets = [0, 896], sizes = [16, 128], strides = [1, 1]} : vector<16x1024xf32> to vector<16x128xf32>
    %324 = vector.broadcast %322 : f32 to vector<16x128xf32>
    %325 = arith.mulf %324, %323 : vector<16x128xf32>
    %326 = arith.addf %320, %325 : vector<16x128xf32>
    %c0_32 = arith.constant 0 : index
    %c640 = arith.constant 640 : index
    %327 = vector.load %arg9[%c0_32, %c640] : memref<16x1024xf32, #tpu.memory_space<vmem>>, vector<16x128xf32>
    %328 = arith.addf %327, %326 : vector<16x128xf32>
    %c0_33 = arith.constant 0 : index
    %c640_34 = arith.constant 640 : index
    %329 = vector.load %arg9[%c0_33, %c640_34] : memref<16x1024xf32, #tpu.memory_space<vmem>>, vector<16x128xf32>
    tpu.vector_store %arg9[%c0_33, %c640_34], %328 {strides = array<i32>} : memref<16x1024xf32, #tpu.memory_space<vmem>>, vector<16x128xf32>,
    %330 = arith.index_cast %arg1 : i32 to index
    %c48 = arith.constant 48 : index
    %331 = memref.load %arg6[%330, %c48] : memref<4x64xf32, #tpu.memory_space<smem>>
    %332 = vector.extract_strided_slice %29 {offsets = [0, 0], sizes = [16, 128], strides = [1, 1]} : vector<16x1024xf32> to vector<16x128xf32>
    %333 = vector.broadcast %331 : f32 to vector<16x128xf32>
    %334 = arith.mulf %333, %332 : vector<16x128xf32>
    %335 = arith.index_cast %arg1 : i32 to index
    %c49 = arith.constant 49 : index
    %336 = memref.load %arg6[%335, %c49] : memref<4x64xf32, #tpu.memory_space<smem>>
    %337 = vector.extract_strided_slice %29 {offsets = [0, 128], sizes = [16, 128], strides = [1, 1]} : vector<16x1024xf32> to vector<16x128xf32>
    %338 = vector.broadcast %336 : f32 to vector<16x128xf32>
    %339 = arith.mulf %338, %337 : vector<16x128xf32>
    %340 = arith.addf %334, %339 : vector<16x128xf32>
    %341 = arith.index_cast %arg1 : i32 to index
    %c50 = arith.constant 50 : index
    %342 = memref.load %arg6[%341, %c50] : memref<4x64xf32, #tpu.memory_space<smem>>
    %343 = vector.extract_strided_slice %29 {offsets = [0, 256], sizes = [16, 128], strides = [1, 1]} : vector<16x1024xf32> to vector<16x128xf32>
    %344 = vector.broadcast %342 : f32 to vector<16x128xf32>
    %345 = arith.mulf %344, %343 : vector<16x128xf32>
    %346 = arith.addf %340, %345 : vector<16x128xf32>
    %347 = arith.index_cast %arg1 : i32 to index
    %c51 = arith.constant 51 : index
    %348 = memref.load %arg6[%347, %c51] : memref<4x64xf32, #tpu.memory_space<smem>>
    %349 = vector.extract_strided_slice %29 {offsets = [0, 384], sizes = [16, 128], strides = [1, 1]} : vector<16x1024xf32> to vector<16x128xf32>
    %350 = vector.broadcast %348 : f32 to vector<16x128xf32>
    %351 = arith.mulf %350, %349 : vector<16x128xf32>
    %352 = arith.addf %346, %351 : vector<16x128xf32>
    %353 = arith.index_cast %arg1 : i32 to index
    %c52 = arith.constant 52 : index
    %354 = memref.load %arg6[%353, %c52] : memref<4x64xf32, #tpu.memory_space<smem>>
    %355 = vector.extract_strided_slice %29 {offsets = [0, 512], sizes = [16, 128], strides = [1, 1]} : vector<16x1024xf32> to vector<16x128xf32>
    %356 = vector.broadcast %354 : f32 to vector<16x128xf32>
    %357 = arith.mulf %356, %355 : vector<16x128xf32>
    %358 = arith.addf %352, %357 : vector<16x128xf32>
    %359 = arith.index_cast %arg1 : i32 to index
    %c53 = arith.constant 53 : index
    %360 = memref.load %arg6[%359, %c53] : memref<4x64xf32, #tpu.memory_space<smem>>
    %361 = vector.extract_strided_slice %29 {offsets = [0, 640], sizes = [16, 128], strides = [1, 1]} : vector<16x1024xf32> to vector<16x128xf32>
    %362 = vector.broadcast %360 : f32 to vector<16x128xf32>
    %363 = arith.mulf %362, %361 : vector<16x128xf32>
    %364 = arith.addf %358, %363 : vector<16x128xf32>
    %365 = arith.index_cast %arg1 : i32 to index
    %c54 = arith.constant 54 : index
    %366 = memref.load %arg6[%365, %c54] : memref<4x64xf32, #tpu.memory_space<smem>>
    %367 = vector.extract_strided_slice %29 {offsets = [0, 768], sizes = [16, 128], strides = [1, 1]} : vector<16x1024xf32> to vector<16x128xf32>
    %368 = vector.broadcast %366 : f32 to vector<16x128xf32>
    %369 = arith.mulf %368, %367 : vector<16x128xf32>
    %370 = arith.addf %364, %369 : vector<16x128xf32>
    %371 = arith.index_cast %arg1 : i32 to index
    %c55 = arith.constant 55 : index
    %372 = memref.load %arg6[%371, %c55] : memref<4x64xf32, #tpu.memory_space<smem>>
    %373 = vector.extract_strided_slice %29 {offsets = [0, 896], sizes = [16, 128], strides = [1, 1]} : vector<16x1024xf32> to vector<16x128xf32>
    %374 = vector.broadcast %372 : f32 to vector<16x128xf32>
    %375 = arith.mulf %374, %373 : vector<16x128xf32>
    %376 = arith.addf %370, %375 : vector<16x128xf32>
    %c0_35 = arith.constant 0 : index
    %c768 = arith.constant 768 : index
    %377 = vector.load %arg9[%c0_35, %c768] : memref<16x1024xf32, #tpu.memory_space<vmem>>, vector<16x128xf32>
    %378 = arith.addf %377, %376 : vector<16x128xf32>
    %c0_36 = arith.constant 0 : index
    %c768_37 = arith.constant 768 : index
    %379 = vector.load %arg9[%c0_36, %c768_37] : memref<16x1024xf32, #tpu.memory_space<vmem>>, vector<16x128xf32>
    tpu.vector_store %arg9[%c0_36, %c768_37], %378 {strides = array<i32>} : memref<16x1024xf32, #tpu.memory_space<vmem>>, vector<16x128xf32>,
    %380 = arith.index_cast %arg1 : i32 to index
    %c56 = arith.constant 56 : index
    %381 = memref.load %arg6[%380, %c56] : memref<4x64xf32, #tpu.memory_space<smem>>
    %382 = vector.extract_strided_slice %29 {offsets = [0, 0], sizes = [16, 128], strides = [1, 1]} : vector<16x1024xf32> to vector<16x128xf32>
    %383 = vector.broadcast %381 : f32 to vector<16x128xf32>
    %384 = arith.mulf %383, %382 : vector<16x128xf32>
    %385 = arith.index_cast %arg1 : i32 to index
    %c57 = arith.constant 57 : index
    %386 = memref.load %arg6[%385, %c57] : memref<4x64xf32, #tpu.memory_space<smem>>
    %387 = vector.extract_strided_slice %29 {offsets = [0, 128], sizes = [16, 128], strides = [1, 1]} : vector<16x1024xf32> to vector<16x128xf32>
    %388 = vector.broadcast %386 : f32 to vector<16x128xf32>
    %389 = arith.mulf %388, %387 : vector<16x128xf32>
    %390 = arith.addf %384, %389 : vector<16x128xf32>
    %391 = arith.index_cast %arg1 : i32 to index
    %c58 = arith.constant 58 : index
    %392 = memref.load %arg6[%391, %c58] : memref<4x64xf32, #tpu.memory_space<smem>>
    %393 = vector.extract_strided_slice %29 {offsets = [0, 256], sizes = [16, 128], strides = [1, 1]} : vector<16x1024xf32> to vector<16x128xf32>
    %394 = vector.broadcast %392 : f32 to vector<16x128xf32>
    %395 = arith.mulf %394, %393 : vector<16x128xf32>
    %396 = arith.addf %390, %395 : vector<16x128xf32>
    %397 = arith.index_cast %arg1 : i32 to index
    %c59 = arith.constant 59 : index
    %398 = memref.load %arg6[%397, %c59] : memref<4x64xf32, #tpu.memory_space<smem>>
    %399 = vector.extract_strided_slice %29 {offsets = [0, 384], sizes = [16, 128], strides = [1, 1]} : vector<16x1024xf32> to vector<16x128xf32>
    %400 = vector.broadcast %398 : f32 to vector<16x128xf32>
    %401 = arith.mulf %400, %399 : vector<16x128xf32>
    %402 = arith.addf %396, %401 : vector<16x128xf32>
    %403 = arith.index_cast %arg1 : i32 to index
    %c60 = arith.constant 60 : index
    %404 = memref.load %arg6[%403, %c60] : memref<4x64xf32, #tpu.memory_space<smem>>
    %405 = vector.extract_strided_slice %29 {offsets = [0, 512], sizes = [16, 128], strides = [1, 1]} : vector<16x1024xf32> to vector<16x128xf32>
    %406 = vector.broadcast %404 : f32 to vector<16x128xf32>
    %407 = arith.mulf %406, %405 : vector<16x128xf32>
    %408 = arith.addf %402, %407 : vector<16x128xf32>
    %409 = arith.index_cast %arg1 : i32 to index
    %c61 = arith.constant 61 : index
    %410 = memref.load %arg6[%409, %c61] : memref<4x64xf32, #tpu.memory_space<smem>>
    %411 = vector.extract_strided_slice %29 {offsets = [0, 640], sizes = [16, 128], strides = [1, 1]} : vector<16x1024xf32> to vector<16x128xf32>
    %412 = vector.broadcast %410 : f32 to vector<16x128xf32>
    %413 = arith.mulf %412, %411 : vector<16x128xf32>
    %414 = arith.addf %408, %413 : vector<16x128xf32>
    %415 = arith.index_cast %arg1 : i32 to index
    %c62 = arith.constant 62 : index
    %416 = memref.load %arg6[%415, %c62] : memref<4x64xf32, #tpu.memory_space<smem>>
    %417 = vector.extract_strided_slice %29 {offsets = [0, 768], sizes = [16, 128], strides = [1, 1]} : vector<16x1024xf32> to vector<16x128xf32>
    %418 = vector.broadcast %416 : f32 to vector<16x128xf32>
    %419 = arith.mulf %418, %417 : vector<16x128xf32>
    %420 = arith.addf %414, %419 : vector<16x128xf32>
    %421 = arith.index_cast %arg1 : i32 to index
    %c63 = arith.constant 63 : index
    %422 = memref.load %arg6[%421, %c63] : memref<4x64xf32, #tpu.memory_space<smem>>
    %423 = vector.extract_strided_slice %29 {offsets = [0, 896], sizes = [16, 128], strides = [1, 1]} : vector<16x1024xf32> to vector<16x128xf32>
    %424 = vector.broadcast %422 : f32 to vector<16x128xf32>
    %425 = arith.mulf %424, %423 : vector<16x128xf32>
    %426 = arith.addf %420, %425 : vector<16x128xf32>
    %c0_38 = arith.constant 0 : index
    %c896 = arith.constant 896 : index
    %427 = vector.load %arg9[%c0_38, %c896] : memref<16x1024xf32, #tpu.memory_space<vmem>>, vector<16x128xf32>
    %428 = arith.addf %427, %426 : vector<16x128xf32>
    %c0_39 = arith.constant 0 : index
    %c896_40 = arith.constant 896 : index
    %429 = vector.load %arg9[%c0_39, %c896_40] : memref<16x1024xf32, #tpu.memory_space<vmem>>, vector<16x128xf32>
    tpu.vector_store %arg9[%c0_39, %c896_40], %428 {strides = array<i32>} : memref<16x1024xf32, #tpu.memory_space<vmem>>, vector<16x128xf32>,
    %c3_i32 = arith.constant 3 : i32
    %430 = arith.cmpi eq, %arg1, %c3_i32 : i32
    %431 = arith.extui %430 : i1 to i32
    %c0_i32_41 = arith.constant 0 : i32
    %432 = arith.cmpi ne, %431, %c0_i32_41 : i32
    scf.if %432 {
      %c0_42 = arith.constant 0 : index
      %c0_43 = arith.constant 0 : index
      %433 = vector.load %arg9[%c0_42, %c0_43] : memref<16x1024xf32, #tpu.memory_space<vmem>>, vector<16x1024xf32>
      %c0_44 = arith.constant 0 : index
      %c0_45 = arith.constant 0 : index
      %c0_46 = arith.constant 0 : index
      %434 = vector.load %arg4[%c0_44, %c0_45, %c0_46] : memref<1x16x1024xbf16, #tpu.memory_space<vmem>>, vector<1x16x1024xbf16>
      %435 = vector.shape_cast %434 : vector<1x16x1024xbf16> to vector<16x1024xbf16>
      %436 = arith.extf %435 : vector<16x1024xbf16> to vector<16x1024xf32>
      %437 = vector.extract_strided_slice %433 {offsets = [0, 0], sizes = [16, 128], strides = [1, 1]} : vector<16x1024xf32> to vector<16x128xf32>
      %438 = vector.extract_strided_slice %433 {offsets = [0, 128], sizes = [16, 128], strides = [1, 1]} : vector<16x1024xf32> to vector<16x128xf32>
      %439 = arith.maximumf %437, %438 : vector<16x128xf32>
      %440 = vector.extract_strided_slice %433 {offsets = [0, 256], sizes = [16, 128], strides = [1, 1]} : vector<16x1024xf32> to vector<16x128xf32>
      %441 = arith.maximumf %439, %440 : vector<16x128xf32>
      %442 = vector.extract_strided_slice %433 {offsets = [0, 384], sizes = [16, 128], strides = [1, 1]} : vector<16x1024xf32> to vector<16x128xf32>
      %443 = arith.maximumf %441, %442 : vector<16x128xf32>
      %444 = vector.extract_strided_slice %433 {offsets = [0, 512], sizes = [16, 128], strides = [1, 1]} : vector<16x1024xf32> to vector<16x128xf32>
      %445 = arith.maximumf %443, %444 : vector<16x128xf32>
      %446 = vector.extract_strided_slice %433 {offsets = [0, 640], sizes = [16, 128], strides = [1, 1]} : vector<16x1024xf32> to vector<16x128xf32>
      %447 = arith.maximumf %445, %446 : vector<16x128xf32>
      %448 = vector.extract_strided_slice %433 {offsets = [0, 768], sizes = [16, 128], strides = [1, 1]} : vector<16x1024xf32> to vector<16x128xf32>
      %449 = arith.maximumf %447, %448 : vector<16x128xf32>
      %450 = vector.extract_strided_slice %433 {offsets = [0, 896], sizes = [16, 128], strides = [1, 1]} : vector<16x1024xf32> to vector<16x128xf32>
      %451 = arith.maximumf %449, %450 : vector<16x128xf32>
      %452 = vector.extract_strided_slice %433 {offsets = [0, 0], sizes = [16, 128], strides = [1, 1]} : vector<16x1024xf32> to vector<16x128xf32>
      %453 = arith.subf %452, %451 : vector<16x128xf32>
      %454 = math.exp %453 : vector<16x128xf32>
      %455 = vector.extract_strided_slice %436 {offsets = [0, 0], sizes = [16, 128], strides = [1, 1]} : vector<16x1024xf32> to vector<16x128xf32>
      %456 = vector.extract_strided_slice %433 {offsets = [0, 0], sizes = [16, 128], strides = [1, 1]} : vector<16x1024xf32> to vector<16x128xf32>
      %457 = arith.mulf %455, %456 : vector<16x128xf32>
      %458 = vector.extract_strided_slice %433 {offsets = [0, 128], sizes = [16, 128], strides = [1, 1]} : vector<16x1024xf32> to vector<16x128xf32>
      %459 = arith.subf %458, %451 : vector<16x128xf32>
      %460 = math.exp %459 : vector<16x128xf32>
      %461 = arith.addf %454, %460 : vector<16x128xf32>
      %462 = vector.extract_strided_slice %436 {offsets = [0, 128], sizes = [16, 128], strides = [1, 1]} : vector<16x1024xf32> to vector<16x128xf32>
      %463 = vector.extract_strided_slice %433 {offsets = [0, 128], sizes = [16, 128], strides = [1, 1]} : vector<16x1024xf32> to vector<16x128xf32>
      %464 = arith.mulf %462, %463 : vector<16x128xf32>
      %465 = arith.addf %457, %464 : vector<16x128xf32>
      %466 = vector.extract_strided_slice %433 {offsets = [0, 256], sizes = [16, 128], strides = [1, 1]} : vector<16x1024xf32> to vector<16x128xf32>
      %467 = arith.subf %466, %451 : vector<16x128xf32>
      %468 = math.exp %467 : vector<16x128xf32>
      %469 = arith.addf %461, %468 : vector<16x128xf32>
      %470 = vector.extract_strided_slice %436 {offsets = [0, 256], sizes = [16, 128], strides = [1, 1]} : vector<16x1024xf32> to vector<16x128xf32>
      %471 = vector.extract_strided_slice %433 {offsets = [0, 256], sizes = [16, 128], strides = [1, 1]} : vector<16x1024xf32> to vector<16x128xf32>
      %472 = arith.mulf %470, %471 : vector<16x128xf32>
      %473 = arith.addf %465, %472 : vector<16x128xf32>
      %474 = vector.extract_strided_slice %433 {offsets = [0, 384], sizes = [16, 128], strides = [1, 1]} : vector<16x1024xf32> to vector<16x128xf32>
      %475 = arith.subf %474, %451 : vector<16x128xf32>
      %476 = math.exp %475 : vector<16x128xf32>
      %477 = arith.addf %469, %476 : vector<16x128xf32>
      %478 = vector.extract_strided_slice %436 {offsets = [0, 384], sizes = [16, 128], strides = [1, 1]} : vector<16x1024xf32> to vector<16x128xf32>
      %479 = vector.extract_strided_slice %433 {offsets = [0, 384], sizes = [16, 128], strides = [1, 1]} : vector<16x1024xf32> to vector<16x128xf32>
      %480 = arith.mulf %478, %479 : vector<16x128xf32>
      %481 = arith.addf %473, %480 : vector<16x128xf32>
      %482 = vector.extract_strided_slice %433 {offsets = [0, 512], sizes = [16, 128], strides = [1, 1]} : vector<16x1024xf32> to vector<16x128xf32>
      %483 = arith.subf %482, %451 : vector<16x128xf32>
      %484 = math.exp %483 : vector<16x128xf32>
      %485 = arith.addf %477, %484 : vector<16x128xf32>
      %486 = vector.extract_strided_slice %436 {offsets = [0, 512], sizes = [16, 128], strides = [1, 1]} : vector<16x1024xf32> to vector<16x128xf32>
      %487 = vector.extract_strided_slice %433 {offsets = [0, 512], sizes = [16, 128], strides = [1, 1]} : vector<16x1024xf32> to vector<16x128xf32>
      %488 = arith.mulf %486, %487 : vector<16x128xf32>
      %489 = arith.addf %481, %488 : vector<16x128xf32>
      %490 = vector.extract_strided_slice %433 {offsets = [0, 640], sizes = [16, 128], strides = [1, 1]} : vector<16x1024xf32> to vector<16x128xf32>
      %491 = arith.subf %490, %451 : vector<16x128xf32>
      %492 = math.exp %491 : vector<16x128xf32>
      %493 = arith.addf %485, %492 : vector<16x128xf32>
      %494 = vector.extract_strided_slice %436 {offsets = [0, 640], sizes = [16, 128], strides = [1, 1]} : vector<16x1024xf32> to vector<16x128xf32>
      %495 = vector.extract_strided_slice %433 {offsets = [0, 640], sizes = [16, 128], strides = [1, 1]} : vector<16x1024xf32> to vector<16x128xf32>
      %496 = arith.mulf %494, %495 : vector<16x128xf32>
      %497 = arith.addf %489, %496 : vector<16x128xf32>
      %498 = vector.extract_strided_slice %433 {offsets = [0, 768], sizes = [16, 128], strides = [1, 1]} : vector<16x1024xf32> to vector<16x128xf32>
      %499 = arith.subf %498, %451 : vector<16x128xf32>
      %500 = math.exp %499 : vector<16x128xf32>
      %501 = arith.addf %493, %500 : vector<16x128xf32>
      %502 = vector.extract_strided_slice %436 {offsets = [0, 768], sizes = [16, 128], strides = [1, 1]} : vector<16x1024xf32> to vector<16x128xf32>
      %503 = vector.extract_strided_slice %433 {offsets = [0, 768], sizes = [16, 128], strides = [1, 1]} : vector<16x1024xf32> to vector<16x128xf32>
      %504 = arith.mulf %502, %503 : vector<16x128xf32>
      %505 = arith.addf %497, %504 : vector<16x128xf32>
      %506 = vector.extract_strided_slice %433 {offsets = [0, 896], sizes = [16, 128], strides = [1, 1]} : vector<16x1024xf32> to vector<16x128xf32>
      %507 = arith.subf %506, %451 : vector<16x128xf32>
      %508 = math.exp %507 : vector<16x128xf32>
      %509 = arith.addf %501, %508 : vector<16x128xf32>
      %510 = vector.extract_strided_slice %436 {offsets = [0, 896], sizes = [16, 128], strides = [1, 1]} : vector<16x1024xf32> to vector<16x128xf32>
      %511 = vector.extract_strided_slice %433 {offsets = [0, 896], sizes = [16, 128], strides = [1, 1]} : vector<16x1024xf32> to vector<16x128xf32>
      %512 = arith.mulf %510, %511 : vector<16x128xf32>
      %513 = arith.addf %505, %512 : vector<16x128xf32>
      %514 = math.log %509 : vector<16x128xf32>
      %515 = arith.addf %451, %514 : vector<16x128xf32>
      %c0_47 = arith.constant 0 : index
      %c0_48 = arith.constant 0 : index
      %c0_49 = arith.constant 0 : index
      %516 = vector.load %arg5[%c0_47, %c0_48, %c0_49] : memref<1x1x128xf32, #tpu.memory_space<vmem>>, vector<1x1x128xf32>
      %517 = vector.shape_cast %516 : vector<1x1x128xf32> to vector<1x128xf32>
      %518 = arith.subf %513, %515 : vector<16x128xf32>
      %519 = vector.broadcast %517 : vector<1x128xf32> to vector<16x128xf32>
      %520 = arith.mulf %519, %518 : vector<16x128xf32>
      %521 = vector.shape_cast %520 : vector<16x128xf32> to vector<1x16x128xf32>
      %cst_50 = arith.constant dense<0.000000e+00> : vector<1xf32>
      %522 = vector.multi_reduction <add>, %521, %cst_50 [1, 2] : vector<1x16x128xf32> to vector<1xf32>
      %523 = vector.shape_cast %522 : vector<1xf32> to vector<1x1x1xf32>
      %524 = vector.extract %523[0, 0, 0] : f32 from vector<1x1x1xf32>
      %525 = vector.broadcast %524 : f32 to vector<1x1xf32>
      %cst_51 = arith.constant 0.000000e+00 : f32
      %526 = vector.broadcast %cst_51 : f32 to vector<1x1xf32>
      %527 = arith.subf %526, %525 : vector<1x1xf32>
      %528 = vector.shape_cast %527 : vector<1x1xf32> to vector<1x1x1xf32>
      %c0_52 = arith.constant 0 : index
      %c0_53 = arith.constant 0 : index
      %c0_54 = arith.constant 0 : index
      %529 = vector.load %arg8[%c0_52, %c0_53, %c0_54] : memref<1x1x1xf32, #tpu.memory_space<vmem>>, vector<1x1x1xf32>
      tpu.vector_store %arg8[%c0_52, %c0_53, %c0_54], %528 {strides = array<i32>} : memref<1x1x1xf32, #tpu.memory_space<vmem>>, vector<1x1x1xf32>,
      %c0_i32_55 = arith.constant 0 : i32
      %530 = arith.cmpi eq, %arg0, %c0_i32_55 : i32
      %531 = arith.extui %530 : i1 to i32
      %c0_i32_56 = arith.constant 0 : i32
      %532 = arith.cmpi ne, %531, %c0_i32_56 : i32
      scf.if %532 {
        %cst_57 = arith.constant 0.000000e+00 : f32
        %533 = vector.broadcast %cst_57 : f32 to vector<1x1xf32>
        %c0_58 = arith.constant 0 : index
        %c0_59 = arith.constant 0 : index
        %c0_60 = arith.constant 0 : index
        %534 = vector.load %arg10[%c0_58, %c0_59, %c0_60] : memref<4x16x16xf32, #tpu.memory_space<vmem>>, vector<1x16x16xf32>
        %535 = vector.shape_cast %534 : vector<1x16x16xf32> to vector<16x16xf32>
        %c0_61 = arith.constant 0 : index
        %c0_62 = arith.constant 0 : index
        %c0_63 = arith.constant 0 : index
        %536 = vector.load %arg10[%c0_61, %c0_62, %c0_63] : memref<4x16x16xf32, #tpu.memory_space<vmem>>, vector<1x16x16xf32>
        %537 = vector.shape_cast %536 : vector<1x16x16xf32> to vector<16x16xf32>
        %538 = arith.mulf %535, %537 : vector<16x16xf32>
        %539 = vector.shape_cast %538 : vector<16x16xf32> to vector<1x16x16xf32>
        %cst_64 = arith.constant dense<0.000000e+00> : vector<1xf32>
        %540 = vector.multi_reduction <add>, %539, %cst_64 [1, 2] : vector<1x16x16xf32> to vector<1xf32>
        %541 = vector.shape_cast %540 : vector<1xf32> to vector<1x1x1xf32>
        %542 = vector.extract %541[0, 0, 0] : f32 from vector<1x1x1xf32>
        %543 = vector.broadcast %542 : f32 to vector<1x1xf32>
        %c0_65 = arith.constant 0 : index
        %c0_66 = arith.constant 0 : index
        %544 = memref.load %arg7[%c0_65, %c0_66] : memref<4x4xf32, #tpu.memory_space<smem>>
        %cst_67 = arith.constant 1.000000e+00 : f32
        %545 = arith.mulf %cst_67, %544 : f32
        %546 = vector.broadcast %545 : f32 to vector<1x1xf32>
        %547 = arith.mulf %546, %543 : vector<1x1xf32>
        %548 = arith.addf %533, %547 : vector<1x1xf32>
        %c1_68 = arith.constant 1 : index
        %c0_69 = arith.constant 0 : index
        %c0_70 = arith.constant 0 : index
        %549 = vector.load %arg10[%c1_68, %c0_69, %c0_70] : memref<4x16x16xf32, #tpu.memory_space<vmem>>, vector<1x16x16xf32>
        %550 = vector.shape_cast %549 : vector<1x16x16xf32> to vector<16x16xf32>
        %c0_71 = arith.constant 0 : index
        %c0_72 = arith.constant 0 : index
        %c0_73 = arith.constant 0 : index
        %551 = vector.load %arg10[%c0_71, %c0_72, %c0_73] : memref<4x16x16xf32, #tpu.memory_space<vmem>>, vector<1x16x16xf32>
        %552 = vector.shape_cast %551 : vector<1x16x16xf32> to vector<16x16xf32>
        %553 = arith.mulf %550, %552 : vector<16x16xf32>
        %554 = vector.shape_cast %553 : vector<16x16xf32> to vector<1x16x16xf32>
        %cst_74 = arith.constant dense<0.000000e+00> : vector<1xf32>
        %555 = vector.multi_reduction <add>, %554, %cst_74 [1, 2] : vector<1x16x16xf32> to vector<1xf32>
        %556 = vector.shape_cast %555 : vector<1xf32> to vector<1x1x1xf32>
        %557 = vector.extract %556[0, 0, 0] : f32 from vector<1x1x1xf32>
        %558 = vector.broadcast %557 : f32 to vector<1x1xf32>
        %c1_75 = arith.constant 1 : index
        %c0_76 = arith.constant 0 : index
        %559 = memref.load %arg7[%c1_75, %c0_76] : memref<4x4xf32, #tpu.memory_space<smem>>
        %cst_77 = arith.constant 2.000000e+00 : f32
        %560 = arith.mulf %cst_77, %559 : f32
        %561 = vector.broadcast %560 : f32 to vector<1x1xf32>
        %562 = arith.mulf %561, %558 : vector<1x1xf32>
        %563 = arith.addf %548, %562 : vector<1x1xf32>
        %c1_78 = arith.constant 1 : index
        %c0_79 = arith.constant 0 : index
        %c0_80 = arith.constant 0 : index
        %564 = vector.load %arg10[%c1_78, %c0_79, %c0_80] : memref<4x16x16xf32, #tpu.memory_space<vmem>>, vector<1x16x16xf32>
        %565 = vector.shape_cast %564 : vector<1x16x16xf32> to vector<16x16xf32>
        %c1_81 = arith.constant 1 : index
        %c0_82 = arith.constant 0 : index
        %c0_83 = arith.constant 0 : index
        %566 = vector.load %arg10[%c1_81, %c0_82, %c0_83] : memref<4x16x16xf32, #tpu.memory_space<vmem>>, vector<1x16x16xf32>
        %567 = vector.shape_cast %566 : vector<1x16x16xf32> to vector<16x16xf32>
        %568 = arith.mulf %565, %567 : vector<16x16xf32>
        %569 = vector.shape_cast %568 : vector<16x16xf32> to vector<1x16x16xf32>
        %cst_84 = arith.constant dense<0.000000e+00> : vector<1xf32>
        %570 = vector.multi_reduction <add>, %569, %cst_84 [1, 2] : vector<1x16x16xf32> to vector<1xf32>
        %571 = vector.shape_cast %570 : vector<1xf32> to vector<1x1x1xf32>
        %572 = vector.extract %571[0, 0, 0] : f32 from vector<1x1x1xf32>
        %573 = vector.broadcast %572 : f32 to vector<1x1xf32>
        %c1_85 = arith.constant 1 : index
        %c1_86 = arith.constant 1 : index
        %574 = memref.load %arg7[%c1_85, %c1_86] : memref<4x4xf32, #tpu.memory_space<smem>>
        %cst_87 = arith.constant 1.000000e+00 : f32
        %575 = arith.mulf %cst_87, %574 : f32
        %576 = vector.broadcast %575 : f32 to vector<1x1xf32>
        %577 = arith.mulf %576, %573 : vector<1x1xf32>
        %578 = arith.addf %563, %577 : vector<1x1xf32>
        %c2_88 = arith.constant 2 : index
        %c0_89 = arith.constant 0 : index
        %c0_90 = arith.constant 0 : index
        %579 = vector.load %arg10[%c2_88, %c0_89, %c0_90] : memref<4x16x16xf32, #tpu.memory_space<vmem>>, vector<1x16x16xf32>
        %580 = vector.shape_cast %579 : vector<1x16x16xf32> to vector<16x16xf32>
        %c0_91 = arith.constant 0 : index
        %c0_92 = arith.constant 0 : index
        %c0_93 = arith.constant 0 : index
        %581 = vector.load %arg10[%c0_91, %c0_92, %c0_93] : memref<4x16x16xf32, #tpu.memory_space<vmem>>, vector<1x16x16xf32>
        %582 = vector.shape_cast %581 : vector<1x16x16xf32> to vector<16x16xf32>
        %583 = arith.mulf %580, %582 : vector<16x16xf32>
        %584 = vector.shape_cast %583 : vector<16x16xf32> to vector<1x16x16xf32>
        %cst_94 = arith.constant dense<0.000000e+00> : vector<1xf32>
        %585 = vector.multi_reduction <add>, %584, %cst_94 [1, 2] : vector<1x16x16xf32> to vector<1xf32>
        %586 = vector.shape_cast %585 : vector<1xf32> to vector<1x1x1xf32>
        %587 = vector.extract %586[0, 0, 0] : f32 from vector<1x1x1xf32>
        %588 = vector.broadcast %587 : f32 to vector<1x1xf32>
        %c2_95 = arith.constant 2 : index
        %c0_96 = arith.constant 0 : index
        %589 = memref.load %arg7[%c2_95, %c0_96] : memref<4x4xf32, #tpu.memory_space<smem>>
        %cst_97 = arith.constant 2.000000e+00 : f32
        %590 = arith.mulf %cst_97, %589 : f32
        %591 = vector.broadcast %590 : f32 to vector<1x1xf32>
        %592 = arith.mulf %591, %588 : vector<1x1xf32>
        %593 = arith.addf %578, %592 : vector<1x1xf32>
        %c2_98 = arith.constant 2 : index
        %c0_99 = arith.constant 0 : index
        %c0_100 = arith.constant 0 : index
        %594 = vector.load %arg10[%c2_98, %c0_99, %c0_100] : memref<4x16x16xf32, #tpu.memory_space<vmem>>, vector<1x16x16xf32>
        %595 = vector.shape_cast %594 : vector<1x16x16xf32> to vector<16x16xf32>
        %c1_101 = arith.constant 1 : index
        %c0_102 = arith.constant 0 : index
        %c0_103 = arith.constant 0 : index
        %596 = vector.load %arg10[%c1_101, %c0_102, %c0_103] : memref<4x16x16xf32, #tpu.memory_space<vmem>>, vector<1x16x16xf32>
        %597 = vector.shape_cast %596 : vector<1x16x16xf32> to vector<16x16xf32>
        %598 = arith.mulf %595, %597 : vector<16x16xf32>
        %599 = vector.shape_cast %598 : vector<16x16xf32> to vector<1x16x16xf32>
        %cst_104 = arith.constant dense<0.000000e+00> : vector<1xf32>
        %600 = vector.multi_reduction <add>, %599, %cst_104 [1, 2] : vector<1x16x16xf32> to vector<1xf32>
        %601 = vector.shape_cast %600 : vector<1xf32> to vector<1x1x1xf32>
        %602 = vector.extract %601[0, 0, 0] : f32 from vector<1x1x1xf32>
        %603 = vector.broadcast %602 : f32 to vector<1x1xf32>
        %c2_105 = arith.constant 2 : index
        %c1_106 = arith.constant 1 : index
        %604 = memref.load %arg7[%c2_105, %c1_106] : memref<4x4xf32, #tpu.memory_space<smem>>
        %cst_107 = arith.constant 2.000000e+00 : f32
        %605 = arith.mulf %cst_107, %604 : f32
        %606 = vector.broadcast %605 : f32 to vector<1x1xf32>
        %607 = arith.mulf %606, %603 : vector<1x1xf32>
        %608 = arith.addf %593, %607 : vector<1x1xf32>
        %c2_108 = arith.constant 2 : index
        %c0_109 = arith.constant 0 : index
        %c0_110 = arith.constant 0 : index
        %609 = vector.load %arg10[%c2_108, %c0_109, %c0_110] : memref<4x16x16xf32, #tpu.memory_space<vmem>>, vector<1x16x16xf32>
        %610 = vector.shape_cast %609 : vector<1x16x16xf32> to vector<16x16xf32>
        %c2_111 = arith.constant 2 : index
        %c0_112 = arith.constant 0 : index
        %c0_113 = arith.constant 0 : index
        %611 = vector.load %arg10[%c2_111, %c0_112, %c0_113] : memref<4x16x16xf32, #tpu.memory_space<vmem>>, vector<1x16x16xf32>
        %612 = vector.shape_cast %611 : vector<1x16x16xf32> to vector<16x16xf32>
        %613 = arith.mulf %610, %612 : vector<16x16xf32>
        %614 = vector.shape_cast %613 : vector<16x16xf32> to vector<1x16x16xf32>
        %cst_114 = arith.constant dense<0.000000e+00> : vector<1xf32>
        %615 = vector.multi_reduction <add>, %614, %cst_114 [1, 2] : vector<1x16x16xf32> to vector<1xf32>
        %616 = vector.shape_cast %615 : vector<1xf32> to vector<1x1x1xf32>
        %617 = vector.extract %616[0, 0, 0] : f32 from vector<1x1x1xf32>
        %618 = vector.broadcast %617 : f32 to vector<1x1xf32>
        %c2_115 = arith.constant 2 : index
        %c2_116 = arith.constant 2 : index
        %619 = memref.load %arg7[%c2_115, %c2_116] : memref<4x4xf32, #tpu.memory_space<smem>>
        %cst_117 = arith.constant 1.000000e+00 : f32
        %620 = arith.mulf %cst_117, %619 : f32
        %621 = vector.broadcast %620 : f32 to vector<1x1xf32>
        %622 = arith.mulf %621, %618 : vector<1x1xf32>
        %623 = arith.addf %608, %622 : vector<1x1xf32>
        %c3_118 = arith.constant 3 : index
        %c0_119 = arith.constant 0 : index
        %c0_120 = arith.constant 0 : index
        %624 = vector.load %arg10[%c3_118, %c0_119, %c0_120] : memref<4x16x16xf32, #tpu.memory_space<vmem>>, vector<1x16x16xf32>
        %625 = vector.shape_cast %624 : vector<1x16x16xf32> to vector<16x16xf32>
        %c0_121 = arith.constant 0 : index
        %c0_122 = arith.constant 0 : index
        %c0_123 = arith.constant 0 : index
        %626 = vector.load %arg10[%c0_121, %c0_122, %c0_123] : memref<4x16x16xf32, #tpu.memory_space<vmem>>, vector<1x16x16xf32>
        %627 = vector.shape_cast %626 : vector<1x16x16xf32> to vector<16x16xf32>
        %628 = arith.mulf %625, %627 : vector<16x16xf32>
        %629 = vector.shape_cast %628 : vector<16x16xf32> to vector<1x16x16xf32>
        %cst_124 = arith.constant dense<0.000000e+00> : vector<1xf32>
        %630 = vector.multi_reduction <add>, %629, %cst_124 [1, 2] : vector<1x16x16xf32> to vector<1xf32>
        %631 = vector.shape_cast %630 : vector<1xf32> to vector<1x1x1xf32>
        %632 = vector.extract %631[0, 0, 0] : f32 from vector<1x1x1xf32>
        %633 = vector.broadcast %632 : f32 to vector<1x1xf32>
        %c3_125 = arith.constant 3 : index
        %c0_126 = arith.constant 0 : index
        %634 = memref.load %arg7[%c3_125, %c0_126] : memref<4x4xf32, #tpu.memory_space<smem>>
        %cst_127 = arith.constant 2.000000e+00 : f32
        %635 = arith.mulf %cst_127, %634 : f32
        %636 = vector.broadcast %635 : f32 to vector<1x1xf32>
        %637 = arith.mulf %636, %633 : vector<1x1xf32>
        %638 = arith.addf %623, %637 : vector<1x1xf32>
        %c3_128 = arith.constant 3 : index
        %c0_129 = arith.constant 0 : index
        %c0_130 = arith.constant 0 : index
        %639 = vector.load %arg10[%c3_128, %c0_129, %c0_130] : memref<4x16x16xf32, #tpu.memory_space<vmem>>, vector<1x16x16xf32>
        %640 = vector.shape_cast %639 : vector<1x16x16xf32> to vector<16x16xf32>
        %c1_131 = arith.constant 1 : index
        %c0_132 = arith.constant 0 : index
        %c0_133 = arith.constant 0 : index
        %641 = vector.load %arg10[%c1_131, %c0_132, %c0_133] : memref<4x16x16xf32, #tpu.memory_space<vmem>>, vector<1x16x16xf32>
        %642 = vector.shape_cast %641 : vector<1x16x16xf32> to vector<16x16xf32>
        %643 = arith.mulf %640, %642 : vector<16x16xf32>
        %644 = vector.shape_cast %643 : vector<16x16xf32> to vector<1x16x16xf32>
        %cst_134 = arith.constant dense<0.000000e+00> : vector<1xf32>
        %645 = vector.multi_reduction <add>, %644, %cst_134 [1, 2] : vector<1x16x16xf32> to vector<1xf32>
        %646 = vector.shape_cast %645 : vector<1xf32> to vector<1x1x1xf32>
        %647 = vector.extract %646[0, 0, 0] : f32 from vector<1x1x1xf32>
        %648 = vector.broadcast %647 : f32 to vector<1x1xf32>
        %c3_135 = arith.constant 3 : index
        %c1_136 = arith.constant 1 : index
        %649 = memref.load %arg7[%c3_135, %c1_136] : memref<4x4xf32, #tpu.memory_space<smem>>
        %cst_137 = arith.constant 2.000000e+00 : f32
        %650 = arith.mulf %cst_137, %649 : f32
        %651 = vector.broadcast %650 : f32 to vector<1x1xf32>
        %652 = arith.mulf %651, %648 : vector<1x1xf32>
        %653 = arith.addf %638, %652 : vector<1x1xf32>
        %c3_138 = arith.constant 3 : index
        %c0_139 = arith.constant 0 : index
        %c0_140 = arith.constant 0 : index
        %654 = vector.load %arg10[%c3_138, %c0_139, %c0_140] : memref<4x16x16xf32, #tpu.memory_space<vmem>>, vector<1x16x16xf32>
        %655 = vector.shape_cast %654 : vector<1x16x16xf32> to vector<16x16xf32>
        %c2_141 = arith.constant 2 : index
        %c0_142 = arith.constant 0 : index
        %c0_143 = arith.constant 0 : index
        %656 = vector.load %arg10[%c2_141, %c0_142, %c0_143] : memref<4x16x16xf32, #tpu.memory_space<vmem>>, vector<1x16x16xf32>
        %657 = vector.shape_cast %656 : vector<1x16x16xf32> to vector<16x16xf32>
        %658 = arith.mulf %655, %657 : vector<16x16xf32>
        %659 = vector.shape_cast %658 : vector<16x16xf32> to vector<1x16x16xf32>
        %cst_144 = arith.constant dense<0.000000e+00> : vector<1xf32>
        %660 = vector.multi_reduction <add>, %659, %cst_144 [1, 2] : vector<1x16x16xf32> to vector<1xf32>
        %661 = vector.shape_cast %660 : vector<1xf32> to vector<1x1x1xf32>
        %662 = vector.extract %661[0, 0, 0] : f32 from vector<1x1x1xf32>
        %663 = vector.broadcast %662 : f32 to vector<1x1xf32>
        %c3_145 = arith.constant 3 : index
        %c2_146 = arith.constant 2 : index
        %664 = memref.load %arg7[%c3_145, %c2_146] : memref<4x4xf32, #tpu.memory_space<smem>>
        %cst_147 = arith.constant 2.000000e+00 : f32
        %665 = arith.mulf %cst_147, %664 : f32
        %666 = vector.broadcast %665 : f32 to vector<1x1xf32>
        %667 = arith.mulf %666, %663 : vector<1x1xf32>
        %668 = arith.addf %653, %667 : vector<1x1xf32>
        %c3_148 = arith.constant 3 : index
        %c0_149 = arith.constant 0 : index
        %c0_150 = arith.constant 0 : index
        %669 = vector.load %arg10[%c3_148, %c0_149, %c0_150] : memref<4x16x16xf32, #tpu.memory_space<vmem>>, vector<1x16x16xf32>
        %670 = vector.shape_cast %669 : vector<1x16x16xf32> to vector<16x16xf32>
        %c3_151 = arith.constant 3 : index
        %c0_152 = arith.constant 0 : index
        %c0_153 = arith.constant 0 : index
        %671 = vector.load %arg10[%c3_151, %c0_152, %c0_153] : memref<4x16x16xf32, #tpu.memory_space<vmem>>, vector<1x16x16xf32>
        %672 = vector.shape_cast %671 : vector<1x16x16xf32> to vector<16x16xf32>
        %673 = arith.mulf %670, %672 : vector<16x16xf32>
        %674 = vector.shape_cast %673 : vector<16x16xf32> to vector<1x16x16xf32>
        %cst_154 = arith.constant dense<0.000000e+00> : vector<1xf32>
        %675 = vector.multi_reduction <add>, %674, %cst_154 [1, 2] : vector<1x16x16xf32> to vector<1xf32>
        %676 = vector.shape_cast %675 : vector<1xf32> to vector<1x1x1xf32>
        %677 = vector.extract %676[0, 0, 0] : f32 from vector<1x1x1xf32>
        %678 = vector.broadcast %677 : f32 to vector<1x1xf32>
        %c3_155 = arith.constant 3 : index
        %c3_156 = arith.constant 3 : index
        %679 = memref.load %arg7[%c3_155, %c3_156] : memref<4x4xf32, #tpu.memory_space<smem>>
        %cst_157 = arith.constant 1.000000e+00 : f32
        %680 = arith.mulf %cst_157, %679 : f32
        %681 = vector.broadcast %680 : f32 to vector<1x1xf32>
        %682 = arith.mulf %681, %678 : vector<1x1xf32>
        %683 = arith.addf %668, %682 : vector<1x1xf32>
        %c0_158 = arith.constant 0 : index
        %c0_159 = arith.constant 0 : index
        %c0_160 = arith.constant 0 : index
        %684 = vector.load %arg8[%c0_158, %c0_159, %c0_160] : memref<1x1x1xf32, #tpu.memory_space<vmem>>, vector<1x1x1xf32>
        %cst_161 = arith.constant 1.000000e-03 : f32
        %685 = vector.broadcast %cst_161 : f32 to vector<1x1xf32>
        %686 = arith.mulf %685, %683 : vector<1x1xf32>
        %687 = vector.shape_cast %686 : vector<1x1xf32> to vector<1x1x1xf32>
        %688 = arith.addf %684, %687 : vector<1x1x1xf32>
        %c0_162 = arith.constant 0 : index
        %c0_163 = arith.constant 0 : index
        %c0_164 = arith.constant 0 : index
        %689 = vector.load %arg8[%c0_162, %c0_163, %c0_164] : memref<1x1x1xf32, #tpu.memory_space<vmem>>, vector<1x1x1xf32>
        tpu.vector_store %arg8[%c0_162, %c0_163, %c0_164], %688 {strides = array<i32>} : memref<1x1x1xf32, #tpu.memory_space<vmem>>, vector<1x1x1xf32>,
      } else {
      }
    } else {
    }
    return
  }
  func.func @transform_0(%arg0: i32, %arg1: i32) -> (i32, i32, i32) {
    %c0_i32 = arith.constant 0 : i32
    %c0_i32_0 = arith.constant 0 : i32
    %c0_i32_1 = arith.constant 0 : i32
    return %arg1, %c0_i32, %c0_i32_0 : i32, i32, i32
  }
  func.func @transform_1(%arg0: i32, %arg1: i32) -> (i32, i32, i32) {
    %c0_i32 = arith.constant 0 : i32
    %c0_i32_0 = arith.constant 0 : i32
    %c0_i32_1 = arith.constant 0 : i32
    return %arg1, %c0_i32, %c0_i32_0 : i32, i32, i32
  }
  func.func @transform_2(%arg0: i32, %arg1: i32) -> (i32, i32, i32) {
    %c0_i32 = arith.constant 0 : i32
    %c0_i32_0 = arith.constant 0 : i32
    %c0_i32_1 = arith.constant 0 : i32
    return %arg0, %c0_i32, %c0_i32_0 : i32, i32, i32
  }
  func.func @transform_3(%arg0: i32, %arg1: i32) -> (i32, i32, i32) {
    %c0_i32 = arith.constant 0 : i32
    %c0_i32_0 = arith.constant 0 : i32
    %c0_i32_1 = arith.constant 0 : i32
    return %arg0, %c0_i32, %c0_i32_0 : i32, i32, i32
  }
  func.func @transform_4(%arg0: i32, %arg1: i32) -> (i32, i32) {
    %c0_i32 = arith.constant 0 : i32
    %c0_i32_0 = arith.constant 0 : i32
    %c0_i32_1 = arith.constant 0 : i32
    return %c0_i32, %c0_i32_0 : i32, i32
  }
  func.func @transform_5(%arg0: i32, %arg1: i32) -> (i32, i32) {
    %c0_i32 = arith.constant 0 : i32
    %c0_i32_0 = arith.constant 0 : i32
    %c0_i32_1 = arith.constant 0 : i32
    return %c0_i32, %c0_i32_0 : i32, i32
  }
  func.func @transform_6(%arg0: i32, %arg1: i32) -> (i32, i32, i32) {
    %c0_i32 = arith.constant 0 : i32
    %c0_i32_0 = arith.constant 0 : i32
    %c0_i32_1 = arith.constant 0 : i32
    return %arg0, %c0_i32, %c0_i32_0 : i32, i32, i32
  }
}

</mosaic_0001>

<bundles_post_ra>
// kernel: tpu_custom_call.1
= control target key start
LH: loop header
LB: loop body
LE: loop exit
PB: predicated region body
PF: predicated region fallthrough
CT: control target
= control target key end

     0   :  { %s3068_s0 = inlined_call_operand.vmem [shape: f32[4,16,8], index: 0, kind: input, shape index: {}]   ;;  %s3069_s1 = inlined_call_operand.vmem [shape: f32[4,8,16], index: 1, kind: input, shape index: {}]   ;;  %s3070_s2 = inlined_call_operand.hbm [shape: bf16[2,16,1024], index: 2, kind: input, shape index: {}]   ;;  %s3071_s3 = inlined_call_operand.vmem [shape: f32[2,1,128], index: 3, kind: input, shape index: {}]   ;;  %s3072_s4 = inlined_call_operand.vmem [shape: f32[4,64], index: 4, kind: input, shape index: {}]   ;;  %s3073_s5 = inlined_call_operand.vmem [shape: f32[4,4], index: 5, kind: input, shape index: {}]   ;;  %s3074_s6 = inlined_call_operand.vmem [shape: f32[2,1,1], index: 6, kind: output, shape index: {}]  }
   0x1   :  { %3150 = sst [smem:[#allocation57_spill]] %s3068_s0 }
   0x2   :  { %3151 = sst [smem:[#allocation58_spill]] %s3069_s1 }
   0x3   :  { %3152 = sst [smem:[#allocation59_spill]] %s3070_s2 }
   0x4   :  { %3153 = sst [smem:[#allocation60_spill]] %s3071_s3 }
   0x5   :  { %3154 = sst [smem:[#allocation61_spill]] %s3072_s4 }
   0x6   :  { %3155 = sst [smem:[#allocation62_spill]] %s3073_s5 }
   0x7   :  { %3156 = sst [smem:[#allocation63_spill]] %s3074_s6 }
   0x8   :  { %11 = vsyncpa [#allocation5], 0 }
   0x9   :  { %13 = vsyncpa [#allocation5 + $0x1], 0 }
   0xa   :  { %14 = vsyncpa [#allocation6], 0 }
   0xb   :  { %15 = vsyncpa [#allocation9], 0  ;;  %s2041_s21 = smov 0   ;;  %s2043_s22 = smov 0  }
   0xc   :  { %s2045_s23 = smov 0   ;;  %s2047_s24 = smov 0  }
   0xd   :  { %s2049_s25 = smov 0   ;;  %s2051_s26 = smov 0  }
   0xe   :  { %s2053_s27 = smov 0   ;;  %s2055_s28 = smov 0  }
   0xf LB: > { %3157 = sst [smem:[#allocation13_spill]] %s1975_s22  ;;  %s1617_s29 = sadd.s32 4294967295, %s1999_s28   ;;  %s1999_s28 = sphi %s2055_s28, %s21_s28   ;;  %s1995_s27 = sphi %s2053_s27, %s3300_s27   ;;  %s1991_s26 = sphi %s2051_s26, %s3299_s26   ;;  %s1987_s25 = sphi %s2049_s25, %s3298_s25   ;;  %s1983_s24 = sphi %s2047_s24, %s3297_s24   ;;  %s1979_s23 = sphi %s2045_s23, %s3296_s23   ;;  %s1975_s22 = sphi %s2043_s22, %s3295_s22   ;;  %s1971_s21 = sphi %s2041_s21, %s3294_s21  }
  0x10   : > { %3158 = sst [smem:[#allocation14_spill]] %s1979_s23  ;;  %s92_s30 = sadd.s32 1, %s1979_s23 }
  0x11   : > { %3159 = sst [smem:[#allocation15_spill]] %s1983_s24  ;;  %p99_p0 = scmp.ne.s32.totalorder %s1979_s23, %s1975_s22 }
  0x12   : > { %3160 = sst [smem:[#allocation16_spill]] %s1987_s25  ;;  %p100_p1 = scmp.eq.s32.totalorder %s1999_s28, 0 }
  0x13   : > { %3161 = sst [smem:[#allocation17_spill]] %s1991_s26  ;;  %p105_p2 = scmp.ne.s32.totalorder %s1975_s22, %s1971_s21 }
  0x14   : > { %3162 = sst [smem:[#allocation18_spill]] %s1995_s27  ;;  %p2085_p3 = scmp.eq.s32.totalorder %s1617_s29, 0 }
  0x15   : > { %3163 = sst [smem:[#allocation19_spill]] %s1999_s28  ;;  %p101_p4 = por %p100_p1, %p99_p0 }
  0x16   : > { %p1619_p5 = scmp.ge.s32.totalorder %s1999_s28, 1  ;;  %p2092_p6 = por %p2085_p3, %p105_p2 }
  0x17   : > { %p210_p7 = scmp.lt.s32.totalorder %s1999_s28, 9  ;;  %s3166_s4 = sld [smem:[#allocation61_spill]] }
  0x18   : > { %p1748_p10 = scmp.lt.s32.totalorder %s1999_s28, 8  ;;  %s3168_s5 = sld [smem:[#allocation62_spill]] }
  0x19   : > { %p2100_p8 = pnand %p1619_p5, %p210_p7  ;;  %s2001_s17 = smov [#allocation7]  }
  0x1a   : > { %p2112_p12 = pnand %p1748_p10, %p101_p4  ;;  %s2002_s18 = smov [#allocation8]  }
  0x1b   : > { %p1735_p9 = pneg %p2100_p8  ;;  %s30_s19 = sadd.s32 1, %s1991_s26 }
  0x1c   : > { %p31_p13 = scmp.ge.s32.totalorder %s30_s19, 4  ;;  %s33_s20 = sadd.s32 1, %s1995_s27 }
  0x1d   : > { %s222_s11 = sshll.u32 %s3166_s4, 4  ;;  %p1736_p11 = pnand %p1735_p9, %p2085_p3  ;;  %s223_s11 = int_to_ptr.vmem [resolvable:$true] %s222_s11 }
  0x1e   : > { %s232_s15 = sshll.u32 %s3168_s5, 4  ;;  %s258_s21 = sand.u32 1, %s1979_s23   ;;  %s233_s15 = int_to_ptr.vmem [resolvable:$true] %s232_s15 }
  0x1f   : > { %1738 = dma.vmem_to_smem (!%p1736_p11), %s223_s11, 64, %s2001_s17, [#allocation6]  }
  0x20   : > { %1741 = dma.vmem_to_smem (!%p1736_p11), %s233_s15, 64, %s2002_s18, [#allocation9]  }
  0x21   : > { %s1692_s29 = sshll.u32 %s1995_s27, 6  ;;  %s3302_s19 = smov (%p31_p13, %s30_s19), 0 }
  0x22   : > { %3170 = sst [smem:[#allocation20_spill]] %s3302_s19  ;;  %s3304_s20 = smov (!%p31_p13, %s33_s20), %s1995_s27 }
  0x23   : > { %s1623_s9 = sshll.u32 %s258_s21, 6  ;;  %p35_p0 = scmp.ge.s32.totalorder %s3304_s20, 2 }
  0x24   : > { %s3171_s2 = sld [smem:[#allocation59_spill]]  ;;  %s262_s14 = scalar_lea.vmem [#allocation4], %s1623_s9 }
  0x25   : > { %s270_s15 = sshll.u32 %s262_s14, 4  ;;  %s3306_s20 = smov (%p35_p0, %s3304_s20), 0  ;;  %s271_s15 = int_to_ptr.vmem [resolvable:$true] %s270_s15 }
  0x26   : > { %3172 = sst [smem:[#allocation21_spill]] %s3306_s20  ;;  %s89_s18 = ssub.s32 %s1995_s27, %s3306_s20 }
  0x27   : > { %p90_p1 = scmp.eq.s32.totalorder %s89_s18, 0  ;;  %s259_s5 = scalar_lea.sflag [#allocation5], %s258_s21 }
  0x28   : > { %s2003_s19 = smov 512   ;;  %s2004_s26 = smov 32  }
  0x29   : > { %s2133_s4 = scalar_select %p90_p1, %s1979_s23, %s92_s30  }
  0x2a   : > { %s267_s11 = scalar_lea.hbm %s3171_s2, %s1692_s29  ;;  %288 = sbr.rel (%p2100_p8) target bundleno = 1164 (0x48c), region = 44 }
  0x2b   : > { %s268_s17 = sshll.u32 %s267_s11, 4  ;;  %3173 = sst [smem:[#allocation22_spill]] %s2133_s4  ;;  %s269_s17 = int_to_ptr.hbm [resolvable:$true] %s268_s17 }
  0x2c   : > { %1745 = dma.hbm_to_vmem [thread:$0]  (!%p2112_p12), %s269_s17, 1024, %s271_s15, %s259_s5, %s2003_s19, %s2003_s19, %s2004_s26  }
  0x2f   : > { %s290_s29 = sand.u32 1, %s1975_s22  }
  0x30   : > { %s1627_s9 = sshll.u32 %s290_s29, 6  ;;  %s291_s10 = scalar_lea.sflag [#allocation5], %s290_s29 }
  0x31   : > { %s2140_s13 = scalar_lea.vmem [#allocation4], %s1627_s9 }
  0x32   : > { %3174 = sst [smem:[#allocation23_spill]] %s2140_s13 }
  0x33   : > { %1958 = dma.done.wait (%p2092_p6), %s291_s10, 1024  }
  0x34   : > { %1960 = vsyncadd (%p2092_p6), %s291_s10, 4294966272 }
  0x35   : > { %1962 = dma.done.wait (%p2085_p3), [#allocation6], 64  }
  0x36   : > { %1964 = vsyncadd (%p2085_p3), [#allocation6], 4294967232 }
  0x37   : > { %1966 = dma.done.wait (%p2085_p3), [#allocation9], 64  }
  0x38   : > { %1968 = vsyncadd (%p2085_p3), [#allocation9], 4294967232 }
  0x39   : > { %310 = sfence }
  0x3a   : > { %p345_p2 = scmp.lt.s32.totalorder %s1983_s24, 3  ;;  %p354_p4 = scmp.lt.s32.totalorder %s1987_s25, 1 }
  0x3b   : > { %s3176_s0 = sld [smem:[#allocation57_spill]]  ;;  %p1633_p3 = scmp.ne.s32.totalorder %s1983_s24, 0 }
  0x3c   : > { %s346_s5 = scalar_select %p345_p2, %s1983_s24, 3 }
  0x3d   : > { %s2158_s26 = scalar_select %p354_p4, %s1987_s25, 1 }
  0x3e   : > { %s1693_s30 = sshll.u32 %s346_s5, 4  ;;  %s1632_s8 = sshll.u32 %s346_s5, 3 }
  0x3f   : > { %3175 = sst [smem:[#allocation24_spill]] %s2158_s26 }
  0x40   : > { %s3177_s1 = sld [smem:[#allocation58_spill]] }
  0x41   : > { %s349_s19 = scalar_lea.vmem %s3176_s0, %s1693_s30  ;;  %s3179_s6 = sld [smem:[#allocation63_spill]] }
  0x44   : > { %364 = sbr.rel (%p1633_p3) target bundleno = 90 (0x5a), region = 60 }
  0x46   : > { %s353_s11 = scalar_lea.vmem %s3177_s1, %s1632_s8 }
  0x47   : > { %s2174_s9 = scalar_lea.vmem %s3179_s6, %s2158_s26 }
  0x48   : > { %3180 = sst [smem:[#allocation25_spill]] %s2174_s9 }
  0x49   : > { %v2005_v0 = vmov 0.0  }
  0x4a   : > { %365 = vst [vmem:[#allocation2 + $0x30] sm:$0xff] %v2005_v0 }
  0x4b   : > { %366 = vst [vmem:[#allocation2] sm:$0xff] %v2005_v0 }
  0x4c   : > { %367 = vst [vmem:[#allocation2 + $0x58] sm:$0xff] %v2005_v0 }
  0x4d   : > { %368 = vst [vmem:[#allocation2 + $0x18] sm:$0xff] %v2005_v0 }
  0x4e   : > { %369 = vst [vmem:[#allocation2 + $0x50] sm:$0xff] %v2005_v0 }
  0x4f   : > { %370 = vst [vmem:[#allocation2 + $0x68] sm:$0xff] %v2005_v0 }
  0x50   : > { %371 = vst [vmem:[#allocation2 + $0x8] sm:$0xff] %v2005_v0 }
  0x51   : > { %372 = vst [vmem:[#allocation2 + $0x48] sm:$0xff] %v2005_v0 }
  0x52   : > { %373 = vst [vmem:[#allocation2 + $0x40] sm:$0xff] %v2005_v0 }
  0x53   : > { %374 = vst [vmem:[#allocation2 + $0x20] sm:$0xff] %v2005_v0 }
  0x54   : > { %375 = vst [vmem:[#allocation2 + $0x10] sm:$0xff] %v2005_v0 }
  0x55   : > { %376 = vst [vmem:[#allocation2 + $0x38] sm:$0xff] %v2005_v0 }
  0x56   : > { %377 = vst [vmem:[#allocation2 + $0x60] sm:$0xff] %v2005_v0 }
  0x57   : > { %378 = vst [vmem:[#allocation2 + $0x70] sm:$0xff] %v2005_v0 }
  0x58   : > { %379 = vst [vmem:[#allocation2 + $0x78] sm:$0xff] %v2005_v0 }
  0x59   : > { %380 = vst [vmem:[#allocation2 + $0x28] sm:$0xff] %v2005_v0 }
  0x5a PF: > { %v383_v1 = vld [vmem:[%s353_s11] sm:$0xff]  ;;  %vm384_vm0 = vcmask 64512   ;;  %v382_v3 = vld [vmem:[%s349_s19 + $0x8] sm:$0xff]  ;;  %v414_v4 = vlaneseq  ;;  %vm423_vm2 = vcmask 130048   ;;  %p1636_p5 = scmp.ne.s32.totalorder %s1987_s25, 0 }
  0x5b   : > { %v381_v2 = vld [vmem:[%s349_s19] sm:$0xff]  ;;  %406 = vmatpush.msra.mxu0 %v383_v1  ;;  %1702 = vmatpush.msra.mxu1 %v383_v1  ;;  %s1637_s10 = sshll.u32 (!%p1636_p5), %s1983_s24, 4 }
  0x5c   : > { %1634 = vmatmul.msk.f32.vlgmr.msra.gmra.mxu0 %vm384_vm0, %v381_v2  ;;  %1635 = vmatmul.msk.f32.vlgmr.msra.gmra.mxu1 %vm384_vm0, %v382_v3  ;;  %v415_v5 = vshrl.u32 %v414_v4, 7  ;;  %v418_v6 = vand.u32 127, %v414_v4  ;;  %s451_s5 = scalar_lea.vmem (!%p1636_p5), [#allocation3], %s1637_s10 }
  0x5e   : > { %vm419_vm1 = vcmp.eq.s32.totalorder %v415_v5, %v418_v6  ;;  %v416_v7 = vadd.s32 8, %v415_v5 }
  0x60   : > { %vm420_vm3 = vcmp.eq.s32.totalorder %v416_v7, %v418_v6 }
  0xd9   : > { %v408_v8 = vpop.f32.mrf.mxu0  ;;  %v411_v11 = vpop.f32.mrf.mxu1 }
  0xda   : > { %v421_v9 = vsel %vm419_vm1, -1e+09, %v408_v8  ;;  %v422_v12 = vsel %vm420_vm3, -1e+09, %v411_v11 }
  0xdb   : > { %v424_v10 = vsel %vm423_vm2, %v421_v9, -inf  ;;  %v427_v13 = vsel %vm423_vm2, %v422_v12, -inf }
  0xdc   : > { %425 = vmax.xlane.f32.xlu0 %v424_v10 }
  0xe4   : > { %428 = vmax.xlane.f32.xlu0 %v427_v13 }
 0x14f   : > { %v426_v14 = vpop.xlane.xlu0 %425 }
 0x150   : > { %v430_v15 = vsub.f32 %v421_v9, %v426_v14 }
 0x152   : > { %v432_v16 = vmul.f32 1.442695, %v430_v15 }
 0x154   : > { %1820 = vpow2.f32 %v432_v16 }
 0x157   : > { %v429_v17 = vpop.xlane.xlu0 %428 }
 0x158   : > { %v431_v18 = vsub.f32 %v422_v12, %v429_v17 }
 0x15a   : > { %v1821_v19 = vpop.eup %1820  ;;  %v434_v20 = vmul.f32 1.442695, %v431_v18 }
 0x15b   : > { %v436_v21 = vsel %vm423_vm2, %v1821_v19, 0.0 }
 0x15c   : > { %1822 = vpow2.f32 %v434_v20  ;;  %437 = vadd.xlane.f32.xlu1 %v436_v21 }
 0x162   : > { %v1823_v22 = vpop.eup %1822 }
 0x163   : > { %v439_v23 = vsel %vm423_vm2, %v1823_v22, 0.0 }
 0x164   : > { %440 = vadd.xlane.f32.xlu1 %v439_v23 }
 0x1cf   : > { %v438_v24 = vpop.xlane.xlu1 %437 }
 0x1d0   : > { %1824 = vrcp.f32 %v438_v24 }
 0x1d6   : > { %v1825_v25 = vpop.eup %1824 }
 0x1d7   : > { %v444_v26 = vmul.f32 %v1825_v25, %v1821_v19  ;;  %v441_v27 = vpop.xlane.xlu1 %440 }
 0x1d8   : > { %1826 = vrcp.f32 %v441_v27 }
 0x1db   : > { %449 = sbr.rel (%p1636_p5) target bundleno = 482 (0x1e2), region = 64 }
 0x1de   : > { %v1827_v28 = vpop.eup %1826 }
 0x1df   : > { %v445_v29 = vmul.f32 %v1827_v28, %v1823_v22 }
 0x1e0   : > { %452 = vst.msk [vmem:[%s451_s5] sm:$0xff] %vm423_vm2, %v444_v26 }
 0x1e1   : > { %453 = vst.msk [vmem:[%s451_s5 + $0x8] sm:$0xff] %vm423_vm2, %v445_v29 }
 0x1e2 PF: > { %v1640_v30 = vld [vmem:[%s2140_s13] sm:$0xf]  ;;  %v1694_v32 = vld [vmem:[%s2140_s13 + $0x4] sm:$0xf]  ;;  %v1648_v35 = vld [vmem:[%s2140_s13 + $0x8] sm:$0xf]  ;;  %v462_v41 = vpack.c.bf16 %v445_v29, %v444_v26 }
 0x1e3   : > { %v1698_v31 = vld [vmem:[%s2140_s13 + $0x1c] sm:$0xf0]  ;;  %v1642_v34 = vld [vmem:[%s2140_s13 + $0x20] sm:$0xf0]  ;;  %v1699_v36 = vld [vmem:[%s2140_s13 + $0x24] sm:$0xf0] }
 0x1e4   : > { %v1641_v33 = vor.u32 %v1698_v31, %v1640_v30  ;;  %v1645_v37 = vor.u32 %v1694_v32, %v1642_v34  ;;  %v1649_v38 = vor.u32 %v1699_v36, %v1648_v35  ;;  %v1695_v39 = vld [vmem:[%s2140_s13 + $0xc] sm:$0xf]  ;;  %v1696_v42 = vld [vmem:[%s2140_s13 + $0x14] sm:$0xf]  ;;  %v1664_v45 = vld [vmem:[%s2140_s13 + $0x18] sm:$0xf] }
 0x1e5   : > { %v1650_v40 = vld [vmem:[%s2140_s13 + $0x28] sm:$0xf0]  ;;  %v1658_v44 = vld [vmem:[%s2140_s13 + $0x30] sm:$0xf0]  ;;  %v1701_v46 = vld [vmem:[%s2140_s13 + $0x34] sm:$0xf0] }
 0x1e6   : > { %513 = vmatpush.bf16.msrb.mxu1 %v1641_v33  ;;  %v1653_v43 = vor.u32 %v1695_v39, %v1650_v40  ;;  %527 = vmatpush.bf16.msra.mxu2 %v1645_v37  ;;  %v1661_v47 = vor.u32 %v1696_v42, %v1658_v44  ;;  %v1665_v48 = vor.u32 %v1701_v46, %v1664_v45  ;;  %v1656_v49 = vld [vmem:[%s2140_s13 + $0x10] sm:$0xf]  ;;  %v1697_v51 = vld [vmem:[%s2140_s13 + $0x1c] sm:$0xf]  ;;  %s2212_s30 = sshll.u32 %s1983_s24, 7 }
 0x1e7   : > { %541 = vmatpush.bf16.msra.mxu3 %v1649_v38  ;;  %v1700_v50 = vld [vmem:[%s2140_s13 + $0x2c] sm:$0xf0]  ;;  %v1666_v53 = vld [vmem:[%s2140_s13 + $0x38] sm:$0xf0]  ;;  %3181 = sst [smem:[#allocation26_spill]] %s2212_s30  ;;  %s678_s8 = sadd.s32 8, %s2212_s30 }
 0x1e8   : > { %555 = vmatpush.bf16.msrb.mxu0 %v1653_v43  ;;  %v1657_v52 = vor.u32 %v1700_v50, %v1656_v49  ;;  %v1669_v54 = vor.u32 %v1697_v51, %v1666_v53  ;;  %s738_s12 = sadd.s32 16, %s2212_s30  ;;  %s2217_s16 = sld [smem:[#allocation7 + %s2212_s30]] }
 0x1e9   : > { %1670 = vmatmul.msk.bf16.vlgmr.msrb.gmra.mxu1 %vm423_vm2, %v462_v41  ;;  %1671 = vmatmul.msk.bf16.vlgmr.msra.gmra.mxu2 %vm423_vm2, %v462_v41  ;;  %s798_s19 = sadd.s32 24, %s2212_s30  ;;  %s2220_s7 = sld [smem:[#allocation7 + %s678_s8]] }
 0x1ea   : > { %583 = vmatpush.bf16.msrb.mxu2 %v1661_v47  ;;  %1672 = vmatmul.msk.bf16.vlgmr.msra.gmra.mxu3 %vm423_vm2, %v462_v41  ;;  %s858_s21 = sadd.s32 32, %s2212_s30  ;;  %s2223_s11 = sld [smem:[#allocation7 + %s738_s12]] }
 0x1eb   : > { %1673 = vmatmul.msk.bf16.vlgmr.msrb.gmra.mxu0 %vm423_vm2, %v462_v41  ;;  %597 = vmatpush.bf16.msrb.mxu3 %v1665_v48  ;;  %s918_s14 = sadd.s32 40, %s2212_s30  ;;  %s2226_s15 = sld [smem:[#allocation7 + %s798_s19]] }
 0x1ec   : > { %569 = vmatpush.bf16.msra.mxu1 %v1657_v52  ;;  %611 = vmatpush.bf16.msra.mxu0 %v1669_v54  ;;  %s978_s18 = sadd.s32 48, %s2212_s30  ;;  %s2229_s29 = sld [smem:[#allocation7 + %s858_s21]] }
 0x1ed   : > { %s1038_s10 = sadd.s32 56, %s2212_s30  ;;  %s2232_s5 = sld [smem:[#allocation7 + %s918_s14]] }
 0x1ee   : > { %3182 = sst [smem:[#allocation27_spill]] %s2217_s16  ;;  %s637_s17 = sadd.s32 3, %s2212_s30  ;;  %v620_v55 = vstv %s2217_s16 }
 0x1ef   : > { %3183 = sst [smem:[#allocation28_spill]] %s2220_s7  ;;  %s697_s0 = sadd.s32 11, %s2212_s30  ;;  %v680_v56 = vstv %s2220_s7 }
 0x1f0   : > { %3184 = sst [smem:[#allocation29_spill]] %s2223_s11  ;;  %s757_s1 = sadd.s32 19, %s2212_s30  ;;  %v740_v57 = vstv %s2223_s11 }
 0x1f1   : > { %3185 = sst [smem:[#allocation30_spill]] %s2226_s15  ;;  %s817_s2 = sadd.s32 27, %s2212_s30  ;;  %v800_v58 = vstv %s2226_s15 }
 0x1f2   : > { %3186 = sst [smem:[#allocation31_spill]] %s2229_s29  ;;  %s877_s6 = sadd.s32 35, %s2212_s30  ;;  %v860_v59 = vstv %s2229_s29 }
 0x1f3   : > { %3187 = sst [smem:[#allocation32_spill]] %s2232_s5  ;;  %s937_s20 = sadd.s32 43, %s2212_s30  ;;  %v920_v60 = vstv %s2232_s5 }
 0x1f4   : > { %s2235_s8 = sld [smem:[#allocation7 + %s978_s18]]  ;;  %s997_s27 = sadd.s32 51, %s2212_s30 }
 0x1f5   : > { %s2238_s12 = sld [smem:[#allocation7 + %s1038_s10]]  ;;  %s1057_s4 = sadd.s32 59, %s2212_s30 }
 0x1f6   : > { %s2241_s19 = sld [smem:[#allocation7 + %s637_s17]]  ;;  %s623_s23 = sadd.s32 1, %s2212_s30 }
 0x1f7   : > { %s2244_s21 = sld [smem:[#allocation7 + %s697_s0]]  ;;  %s683_s22 = sadd.s32 9, %s2212_s30 }
 0x1f8   : > { %s2247_s14 = sld [smem:[#allocation7 + %s757_s1]]  ;;  %s743_s28 = sadd.s32 17, %s2212_s30 }
 0x1f9   : > { %1674 = vmatmul.msk.bf16.vlgmr.msra.gmra.mxu1 %vm423_vm2, %v462_v41  ;;  %1675 = vmatmul.msk.bf16.vlgmr.msrb.gmra.mxu2 %vm423_vm2, %v462_v41  ;;  %s2250_s18 = sld [smem:[#allocation7 + %s817_s2]]  ;;  %s803_s25 = sadd.s32 25, %s2212_s30 }
 0x1fa   : > { %1676 = vmatmul.msk.bf16.vlgmr.msrb.gmra.mxu3 %vm423_vm2, %v462_v41  ;;  %3188 = sst [smem:[#allocation33_spill]] %s2235_s8  ;;  %s863_s9 = sadd.s32 33, %s2212_s30  ;;  %v980_v61 = vstv %s2235_s8 }
 0x1fb   : > { %1677 = vmatmul.msk.bf16.vlgmr.msra.gmra.mxu0 %vm423_vm2, %v462_v41  ;;  %3189 = sst [smem:[#allocation34_spill]] %s2238_s12  ;;  %s923_s3 = sadd.s32 41, %s2212_s30  ;;  %v1040_v62 = vstv %s2238_s12 }
 0x1fc   : > { %s2253_s10 = sld [smem:[#allocation7 + %s877_s6]]  ;;  %s983_s26 = sadd.s32 49, %s2212_s30  ;;  %v639_v63 = vstv %s2241_s19 }
 0x1fd   : > { %3190 = sst [smem:[#allocation35_spill]] %s2244_s21  ;;  %s1043_s13 = sadd.s32 57, %s2212_s30  ;;  %v699_v0 = vstv %s2244_s21 }
 0x1fe   : > { %3191 = sst [smem:[#allocation36_spill]] %s2247_s14  ;;  %s630_s24 = sadd.s32 2, %s2212_s30  ;;  %v759_v1 = vstv %s2247_s14 }
 0x1ff   : > { %s2256_s17 = sld [smem:[#allocation7 + %s937_s20]]  ;;  %s944_s16 = sadd.s32 44, %s2212_s30  ;;  %v819_v2 = vstv %s2250_s18 }
 0x200   : > { %s2259_s0 = sld [smem:[#allocation7 + %s997_s27]] }
 0x201   : > { %s2262_s1 = sld [smem:[#allocation7 + %s1057_s4]] }
 0x202   : > { %3192 = sst [smem:[#allocation37_spill]] %s2253_s10  ;;  %v879_v3 = vstv %s2253_s10 }
 0x203   : > { %s2265_s2 = sld [smem:[#allocation7 + %s623_s23]] }
 0x204   : > { %s2268_s6 = sld [smem:[#allocation7 + %s683_s22]] }
 0x205   : > { %3193 = sst [smem:[#allocation38_spill]] %s2256_s17  ;;  %v939_v4 = vstv %s2256_s17 }
 0x206   : > { %3194 = sst [smem:[#allocation39_spill]] %s2259_s0  ;;  %v999_v5 = vstv %s2259_s0 }
 0x207   : > { %3195 = sst [smem:[#allocation40_spill]] %s2262_s1  ;;  %v3142_v6 = vstv %s2262_s1 }
 0x208   : > { %s2271_s20 = sld [smem:[#allocation7 + %s743_s28]] }
 0x209   : > { %s2274_s27 = sld [smem:[#allocation7 + %s803_s25]]  ;;  %v625_v7 = vstv %s2265_s2 }
 0x20a   : > { %3196 = sst [smem:[#allocation41_spill]] %s2268_s6  ;;  %s690_s6 = sadd.s32 10, %s2212_s30 }
 0x20b   : > { %s2277_s4 = sld [smem:[#allocation7 + %s863_s9]] }
 0x20c   : > { %s2280_s23 = sld [smem:[#allocation7 + %s923_s3]] }
 0x20d   : > { %s2283_s22 = sld [smem:[#allocation7 + %s983_s26]] }
 0x20e   : > { %3197 = sst [smem:[#allocation42_spill]] %s2271_s20  ;;  %s750_s20 = sadd.s32 18, %s2212_s30 }
 0x20f   : > { %3198 = sst [smem:[#allocation43_spill]] %s2274_s27  ;;  %s810_s27 = sadd.s32 26, %s2212_s30 }
 0x210   : > { %s2286_s28 = sld [smem:[#allocation7 + %s1043_s13]] }
 0x211   : > { %3199 = sst [smem:[#allocation44_spill]] %s2277_s4  ;;  %s870_s4 = sadd.s32 34, %s2212_s30 }
 0x212   : > { %3200 = sst [smem:[#allocation45_spill]] %s2280_s23  ;;  %s930_s23 = sadd.s32 42, %s2212_s30 }
 0x213   : > { %3201 = sst [smem:[#allocation46_spill]] %s2283_s22  ;;  %s990_s22 = sadd.s32 50, %s2212_s30 }
 0x214   : > { %s2289_s25 = sld [smem:[#allocation7 + %s630_s24]]  ;;  %s1050_s24 = sadd.s32 58, %s2212_s30 }
 0x215   : > { %s2292_s9 = sld [smem:[#allocation7 + %s690_s6]]  ;;  %s644_s6 = sadd.s32 4, %s2212_s30 }
 0x216   : > { %s2295_s3 = sld [smem:[#allocation7 + %s750_s20]]  ;;  %s704_s20 = sadd.s32 12, %s2212_s30  ;;  %v1045_v15 = vstv %s2286_s28 }
 0x217   : > { %s2298_s26 = sld [smem:[#allocation7 + %s810_s27]]  ;;  %s764_s27 = sadd.s32 20, %s2212_s30 }
 0x218   : > { %s2301_s13 = sld [smem:[#allocation7 + %s870_s4]]  ;;  %s824_s4 = sadd.s32 28, %s2212_s30 }
 0x219   : > { %s3216_s7 = sld [smem:[#allocation44_spill]] }
 0x21a   : > { %3202 = sst [smem:[#allocation47_spill]] %s2289_s25 }
 0x21b   : > { %3203 = sst [smem:[#allocation48_spill]] %s2292_s9 }
 0x21c   : > { %3204 = sst [smem:[#allocation49_spill]] %s2295_s3 }
 0x21d   : > { %3205 = sst [smem:[#allocation50_spill]] %s2298_s26 }
 0x21e   : > { %3206 = sst [smem:[#allocation51_spill]] %s2301_s13 }
 0x21f   : > { %s2304_s25 = sld [smem:[#allocation7 + %s930_s23]]  ;;  %v3143_v11 = vstv %s3216_s7 }
 0x220   : > { %s2307_s9 = sld [smem:[#allocation7 + %s990_s22]]  ;;  %s884_s22 = sadd.s32 36, %s2212_s30 }
 0x221   : > { %s2310_s3 = sld [smem:[#allocation7 + %s1050_s24]] }
 0x222   : > { %s2313_s26 = sld [smem:[#allocation7 + %s644_s6]] }
 0x223   : > { %s2316_s13 = sld [smem:[#allocation7 + %s704_s20]] }
 0x224   : > { %s2321_s23 = sld [smem:[#allocation7 + %s764_s27]] }
 0x225   : > { %3207 = sst [smem:[#allocation52_spill]] %s2304_s25  ;;  %v932_v21 = vstv %s2304_s25 }
 0x226   : > { %3208 = sst [smem:[#allocation53_spill]] %s2307_s9  ;;  %v992_v22 = vstv %s2307_s9  ;;  %s1064_s9 = sadd.s32 60, %s2212_s30 }
 0x227   : > { %s3212_s24 = sld [smem:[#allocation41_spill]]  ;;  %v1052_v23 = vstv %s2310_s3 }
 0x228   : > { %3209 = sst [smem:[#allocation54_spill]] %s2313_s26 }
 0x229   : > { %3210 = sst [smem:[#allocation55_spill]] %s2316_s13 }
 0x22a   : > { %3211 = sst [smem:[#allocation56_spill]] %s2321_s23  ;;  %s1004_s23 = sadd.s32 52, %s2212_s30 }
 0x22b   : > { %s3213_s6 = sld [smem:[#allocation42_spill]] }
 0x22c   : > { %s2328_s20 = sld [smem:[#allocation7 + %s824_s4]] }
 0x22d   : > { %s3215_s13 = sld [smem:[#allocation43_spill]]  ;;  %v685_v8 = vstv %s3212_s24 }
 0x22e   : > { %s3217_s11 = sld [smem:[#allocation45_spill]] }
 0x22f   : > { %s3218_s27 = sld [smem:[#allocation46_spill]] }
 0x230   : > { %s3219_s29 = sld [smem:[#allocation47_spill]] }
 0x231   : > { %s3220_s5 = sld [smem:[#allocation48_spill]]  ;;  %v3146_v9 = vstv %s3213_s6 }
 0x232   : > { %3214 = sst [smem:[#allocation41_spill]] %s2328_s20 }
 0x233   : > { %s3221_s8 = sld [smem:[#allocation49_spill]]  ;;  %v3144_v10 = vstv %s3215_s13 }
 0x234   : > { %s2340_s4 = sld [smem:[#allocation7 + %s884_s22]]  ;;  %v3145_v12 = vstv %s3217_s11 }
 0x235   : > { %s3223_s15 = sld [smem:[#allocation50_spill]]  ;;  %v3147_v13 = vstv %s3218_s27 }
 0x236   : > { %s3224_s12 = sld [smem:[#allocation51_spill]]  ;;  %v632_v16 = vstv %s3219_s29 }
 0x237   : > { %s2346_s14 = sld [smem:[#allocation7 + %s944_s16]]  ;;  %v692_v17 = vstv %s3220_s5 }
 0x238   : > { %s3243_s20 = sld [smem:[#allocation42_spill]] }
 0x239   : > { %v752_v18 = vstv %s3221_s8  ;;  %s3244_s17 = sld [smem:[#allocation43_spill]] }
 0x23a   : > { %3222 = sst [smem:[#allocation46_spill]] %s2340_s4 }
 0x23b   : > { %s2352_s4 = sld [smem:[#allocation7 + %s1004_s23]]  ;;  %v812_v19 = vstv %s3223_s15 }
 0x23c   : > { %v872_v20 = vstv %s3224_s12  ;;  %s3245_s10 = sld [smem:[#allocation44_spill]] }
 0x23d   : > { %3225 = sst [smem:[#allocation48_spill]] %s2346_s14 }
 0x23e   : > { %s3246_s30 = sld [smem:[#allocation45_spill]] }
 0x23f   : > { %s2412_s21 = sld [smem:[#allocation7 + %s1064_s9]] }
 0x240   : > { %s3255_s0 = sld [smem:[#allocation40_spill]] }
 0x241   : > { %3230 = sst [smem:[#allocation51_spill]] %s2352_s4 }
 0x242   : > { %s3261_s7 = sld [smem:[#allocation26_spill]] }
 0x243   : > { %s3264_s11 = sld [smem:[#allocation55_spill]] }
 0x244   : > { %s3267_s8 = sld [smem:[#allocation56_spill]] }
 0x245   : > { %3247 = sst [smem:[#allocation27_spill]] %s2412_s21 }
 0x246   : > { %s3270_s14 = sld [smem:[#allocation41_spill]] }
 0x247   : > { %s3273_s1 = sld [smem:[#allocation46_spill]] }
 0x248   : > { %s665_s29 = sadd.s32 7, %s3261_s7  ;;  %s725_s15 = sadd.s32 15, %s3261_s7 }
 0x249   : > { %s785_s5 = sadd.s32 23, %s3261_s7  ;;  %s2570_s12 = sld [smem:[#allocation7 + %s665_s29]] }
 0x24a   : > { %s845_s19 = sadd.s32 31, %s3261_s7  ;;  %s905_s18 = sadd.s32 39, %s3261_s7 }
 0x24b   : > { %s2595_s2 = sld [smem:[#allocation7 + %s845_s19]]  ;;  %s1025_s28 = sadd.s32 55, %s3261_s7 }
 0x24c   : > { %s2608_s25 = sld [smem:[#allocation7 + %s905_s18]]  ;;  %s1085_s3 = sadd.s32 63, %s3261_s7 }
 0x24d   : > { %s3276_s26 = sld [smem:[#allocation48_spill]]  ;;  %s651_s24 = sadd.s32 5, %s3261_s7 }
 0x24e   : > { %s2627_s6 = sld [smem:[#allocation7 + %s1025_s28]]  ;;  %s771_s22 = sadd.s32 21, %s3261_s7 }
 0x24f   : > { %s2640_s4 = sld [smem:[#allocation7 + %s1085_s3]]  ;;  %s831_s9 = sadd.s32 29, %s3261_s7 }
 0x250   : > { %s2650_s16 = sld [smem:[#allocation7 + %s651_s24]]  ;;  %s1018_s24 = sadd.s32 54, %s3261_s7 }
 0x251   : > { %s2687_s29 = sld [smem:[#allocation7 + %s831_s9]] }
 0x266   : > { %v515_v14 = vpop.f32.mrf.mxu1 }
 0x267   : > { %v621_v27 = vmul.f32 %v620_v55, %v515_v14  ;;  %v681_v28 = vmul.f32 %v680_v56, %v515_v14  ;;  %v741_v29 = vmul.f32 %v740_v57, %v515_v14  ;;  %v801_v31 = vmul.f32 %v800_v58, %v515_v14 }
 0x268   : > { %v861_v32 = vmul.f32 %v860_v59, %v515_v14  ;;  %v921_v33 = vmul.f32 %v920_v60, %v515_v14  ;;  %v981_v34 = vmul.f32 %v980_v61, %v515_v14  ;;  %v557_v35 = vpop.f32.mrf.mxu0  ;;  %v1041_v36 = vmul.f32 %v1040_v62, %v515_v14 }
 0x269   : > { %v2386_v37 = vmul.f32 %v639_v63, %v557_v35  ;;  %v2390_v38 = vmul.f32 %v699_v0, %v557_v35  ;;  %v2394_v39 = vmul.f32 %v759_v1, %v557_v35  ;;  %v2398_v40 = vmul.f32 %v819_v2, %v557_v35 }
 0x26a   : > { %v2402_v41 = vmul.f32 %v879_v3, %v557_v35  ;;  %v2406_v42 = vmul.f32 %v939_v4, %v557_v35  ;;  %v2410_v43 = vmul.f32 %v999_v5, %v557_v35  ;;  %v2416_v44 = vmul.f32 %v3142_v6, %v557_v35 }
 0x26c   : > { %v529_v45 = vpop.f32.mrf.mxu2 }
 0x26d   : > { %v626_v49 = vmul.f32 %v625_v7, %v529_v45  ;;  %v686_v50 = vmul.f32 %v685_v8, %v529_v45  ;;  %v746_v51 = vmul.f32 %v3146_v9, %v529_v45  ;;  %v806_v52 = vmul.f32 %v3144_v10, %v529_v45  ;;  %v543_v10 = vpop.f32.mrf.mxu3 }
 0x26e   : > { %v517_v53 = vpop.f32.mrf.mxu1  ;;  %v866_v54 = vmul.f32 %v3143_v11, %v529_v45  ;;  %v926_v14 = vmul.f32 %v3145_v12, %v529_v45  ;;  %v986_v35 = vmul.f32 %v3147_v13, %v529_v45  ;;  %v1046_v48 = vmul.f32 %v1045_v15, %v529_v45 }
 0x26f   : > { %v628_v47 = vadd.f32 %v626_v49, %v621_v27  ;;  %v688_v46 = vadd.f32 %v686_v50, %v681_v28  ;;  %v748_v30 = vadd.f32 %v746_v51, %v741_v29  ;;  %v808_v26 = vadd.f32 %v806_v52, %v801_v31 }
 0x270   : > { %v868_v25 = vadd.f32 %v866_v54, %v861_v32  ;;  %v928_v24 = vadd.f32 %v926_v14, %v921_v33  ;;  %v988_v6 = vadd.f32 %v986_v35, %v981_v34  ;;  %v1048_v11 = vadd.f32 %v1046_v48, %v1041_v36 }
 0x271   : > { %v633_v12 = vmul.f32 %v632_v16, %v543_v10  ;;  %v693_v9 = vmul.f32 %v692_v17, %v543_v10  ;;  %v753_v13 = vmul.f32 %v752_v18, %v543_v10  ;;  %v813_v45 = vmul.f32 %v812_v19, %v543_v10 }
 0x272   : > { %v873_v27 = vmul.f32 %v872_v20, %v543_v10  ;;  %v933_v28 = vmul.f32 %v932_v21, %v543_v10  ;;  %v993_v29 = vmul.f32 %v992_v22, %v543_v10  ;;  %v1053_v31 = vmul.f32 %v1052_v23, %v543_v10 }
 0x273   : > { %v635_v32 = vadd.f32 %v633_v12, %v628_v47  ;;  %v2453_v33 = vadd.f32 %v693_v9, %v688_v46  ;;  %v2455_v34 = vadd.f32 %v753_v13, %v748_v30  ;;  %v1066_v36 = vstv %s2412_s21  ;;  %v559_v12 = vpop.f32.mrf.mxu0  ;;  %s2577_s21 = sld [smem:[#allocation7 + %s725_s15]]  ;;  %s951_s15 = sadd.s32 45, %s3261_s7 }
 0x274   : > { %v2458_v48 = vadd.f32 %v813_v45, %v808_v26  ;;  %v2460_v49 = vadd.f32 %v873_v27, %v868_v25  ;;  %v2462_v50 = vadd.f32 %v933_v28, %v928_v24  ;;  %v2464_v10 = vadd.f32 %v993_v29, %v988_v6  ;;  %s2716_s19 = sld [smem:[#allocation7 + %s951_s15]] }
 0x275   : > { %v2466_v9 = vadd.f32 %v1053_v31, %v1048_v11  ;;  %v622_v13 = vmul.f32 %v620_v55, %v517_v53  ;;  %v682_v26 = vmul.f32 %v680_v56, %v517_v53  ;;  %v742_v25 = vmul.f32 %v740_v57, %v517_v53  ;;  %v531_v56 = vpop.f32.mrf.mxu2 }
 0x276   : > { %v2474_v24 = vpop.f32.mrf.mxu1  ;;  %v802_v6 = vmul.f32 %v800_v58, %v517_v53  ;;  %v862_v30 = vmul.f32 %v860_v59, %v517_v53  ;;  %v922_v11 = vmul.f32 %v920_v60, %v517_v53  ;;  %v982_v55 = vmul.f32 %v980_v61, %v517_v53 }
 0x277   : > { %v1042_v57 = vmul.f32 %v1040_v62, %v517_v53  ;;  %v641_v46 = vmul.f32 %v639_v63, %v559_v12  ;;  %v701_v47 = vmul.f32 %v699_v0, %v559_v12  ;;  %v761_v58 = vmul.f32 %v759_v1, %v559_v12 }
 0x278   : > { %v2494_v59 = vmul.f32 %v819_v2, %v559_v12  ;;  %v2498_v60 = vmul.f32 %v879_v3, %v559_v12  ;;  %v2502_v61 = vmul.f32 %v939_v4, %v559_v12  ;;  %v2506_v51 = vmul.f32 %v999_v5, %v559_v12 }
 0x279   : > { %v627_v62 = vmul.f32 %v625_v7, %v531_v56  ;;  %v687_v63 = vmul.f32 %v685_v8, %v531_v56  ;;  %v3256_v52 = vstv %s3243_s20  ;;  %v3257_v53 = vstv %s3244_s17  ;;  %v545_v7 = vpop.f32.mrf.mxu3  ;;  %s965_s17 = sadd.s32 47, %s3261_s7  ;;  %s711_s20 = sadd.s32 13, %s3261_s7 }
 0x27a   : > { %v747_v0 = vmul.f32 %v3256_v52, %v531_v56  ;;  %v807_v1 = vmul.f32 %v3257_v53, %v531_v56  ;;  %v3258_v2 = vstv %s3245_s10  ;;  %v3259_v3 = vstv %s3246_s30  ;;  %s3263_s30 = sld [smem:[#allocation54_spill]] }
 0x27b   : > { %v867_v54 = vmul.f32 %v3258_v2, %v531_v56  ;;  %v927_v14 = vmul.f32 %v3259_v3, %v531_v56  ;;  %v3260_v4 = vstv %s3218_s27  ;;  %v1047_v5 = vmul.f32 %v1045_v15, %v531_v56  ;;  %s2588_s10 = sld [smem:[#allocation7 + %s785_s5]]  ;;  %s1011_s5 = sadd.s32 53, %s3261_s7 }
 0x27c   : > { %v987_v35 = vmul.f32 %v3260_v4, %v531_v56  ;;  %v3262_v45 = vstv %s3255_s0  ;;  %v629_v27 = vadd.f32 %v627_v62, %v622_v13  ;;  %v689_v28 = vadd.f32 %v687_v63, %v682_v26  ;;  %s2616_s13 = sld [smem:[#allocation7 + %s965_s17]]  ;;  %s778_s17 = sadd.s32 22, %s3261_s7 }
 0x27d   : > { %v2526_v8 = vmul.f32 %v3262_v45, %v559_v12  ;;  %v749_v29 = vadd.f32 %v747_v0, %v742_v25  ;;  %v809_v31 = vadd.f32 %v807_v1, %v802_v6  ;;  %v869_v52 = vadd.f32 %v867_v54, %v862_v30  ;;  %s3279_s27 = sld [smem:[#allocation51_spill]] }
 0x27e   : > { %v929_v53 = vadd.f32 %v927_v14, %v922_v11  ;;  %v2528_v2 = vadd.f32 %v987_v35, %v982_v55  ;;  %v2530_v15 = vadd.f32 %v1047_v5, %v1042_v57  ;;  %v634_v12 = vmul.f32 %v632_v16, %v545_v7  ;;  %v2538_v26 = vpop.f32.mrf.mxu1  ;;  %s2662_s0 = sld [smem:[#allocation7 + %s711_s20]]  ;;  %s1078_s20 = sadd.s32 62, %s3261_s7 }
 0x27f   : > { %v694_v56 = vmul.f32 %v692_v17, %v545_v7  ;;  %v754_v13 = vmul.f32 %v752_v18, %v545_v7  ;;  %v814_v25 = vmul.f32 %v812_v19, %v545_v7  ;;  %v874_v6 = vmul.f32 %v872_v20, %v545_v7  ;;  %v2562_v20 = vpop.f32.mrf.mxu0 }
 0x280   : > { %v934_v30 = vmul.f32 %v932_v21, %v545_v7  ;;  %v994_v11 = vmul.f32 %v992_v22, %v545_v7  ;;  %v636_v16 = vadd.f32 %v634_v12, %v629_v27  ;;  %v642_v17 = vadd.f32 %v2386_v37, %v635_v32 }
 0x281   : > { %v3265_v18 = vstv %s3263_s30  ;;  %v2560_v19 = vmul.f32 %v1052_v23, %v545_v7  ;;  %v696_v21 = vadd.f32 %v694_v56, %v689_v28  ;;  %v3268_v22 = vstv %s3264_s11  ;;  %s2675_s30 = sld [smem:[#allocation7 + %s771_s22]]  ;;  %s891_s11 = sadd.s32 37, %s3261_s7 }
 0x282   : > { %v647_v55 = vmul.f32 %v3265_v18, %v2474_v24  ;;  %v3266_v57 = vmov %v3265_v18  ;;  %v707_v37 = vmul.f32 %v3268_v22, %v2474_v24  ;;  %v3269_v32 = vmov %v3268_v22  ;;  %s2840_s22 = sld [smem:[#allocation7 + %s1018_s24]] }
 0x283   : > { %v648_v62 = vmul.f32 %v3266_v57, %v2538_v26  ;;  %v708_v63 = vmul.f32 %v3269_v32, %v2538_v26  ;;  %v643_v0 = vadd.f32 %v641_v46, %v636_v16  ;;  %v702_v23 = vadd.f32 %v2390_v38, %v2453_v33 }
 0x284   : > { %v2573_v1 = vadd.f32 %v647_v55, %v642_v17  ;;  %v756_v54 = vadd.f32 %v754_v13, %v749_v29  ;;  %v703_v3 = vadd.f32 %v701_v47, %v696_v21  ;;  %v762_v14 = vadd.f32 %v2394_v39, %v2455_v34 }
 0x285   : > { %v3271_v4 = vstv %s3267_s8  ;;  %v2591_v38 = vadd.f32 %v648_v62, %v643_v0  ;;  %v2593_v33 = vadd.f32 %v707_v37, %v702_v23  ;;  %v816_v47 = vadd.f32 %v814_v25, %v809_v31  ;;  %s2706_s8 = sld [smem:[#allocation7 + %s891_s11]] }
 0x286   : > { %v767_v46 = vmul.f32 %v3271_v4, %v2474_v24  ;;  %v3272_v35 = vmov %v3271_v4  ;;  %v763_v7 = vadd.f32 %v761_v58, %v756_v54  ;;  %v2598_v39 = vadd.f32 %v708_v63, %v703_v3 }
 0x287   : > { %v768_v5 = vmul.f32 %v3272_v35, %v2538_v26  ;;  %v822_v34 = vadd.f32 %v2398_v40, %v2458_v48  ;;  %v3274_v45 = vstv %s3270_s14  ;;  %v823_v12 = vadd.f32 %v2494_v59, %v816_v47  ;;  %v2630_v59 = vpop.f32.mrf.mxu2  ;;  %v2673_v63 = vpop.f32.mrf.mxu0  ;;  %s658_s14 = sadd.s32 6, %s3261_s7 }
 0x288   : > { %v827_v27 = vmul.f32 %v3274_v45, %v2474_v24  ;;  %v3275_v28 = vmov %v3274_v45  ;;  %v2611_v58 = vadd.f32 %v767_v46, %v762_v14  ;;  %v876_v56 = vadd.f32 %v874_v6, %v869_v52 }
 0x289   : > { %v828_v29 = vmul.f32 %v3275_v28, %v2538_v26  ;;  %v2613_v31 = vadd.f32 %v768_v5, %v763_v7  ;;  %v882_v40 = vadd.f32 %v2402_v41, %v2460_v49  ;;  %v3277_v48 = vstv %s3273_s1  ;;  %s2769_s1 = sld [smem:[#allocation7 + %s658_s14]] }
 0x28a   : > { %v887_v13 = vmul.f32 %v3277_v48, %v2474_v24  ;;  %v3278_v25 = vmov %v3277_v48  ;;  %v936_v17 = vadd.f32 %v934_v30, %v929_v53  ;;  %v2632_v52 = vadd.f32 %v827_v27, %v822_v34  ;;  %v2740_v27 = vpop.f32.mrf.mxu3 }
 0x28b   : > { %v888_v16 = vmul.f32 %v3278_v25, %v2538_v26  ;;  %v883_v6 = vadd.f32 %v2498_v60, %v876_v56  ;;  %v942_v41 = vadd.f32 %v2406_v42, %v2462_v50  ;;  %v3280_v49 = vstv %s3276_s26  ;;  %s898_s26 = sadd.s32 38, %s3261_s7 }
 0x28c   : > { %v947_v18 = vmul.f32 %v3280_v49, %v2474_v24  ;;  %v2643_v53 = vadd.f32 %v828_v29, %v823_v12  ;;  %v943_v30 = vadd.f32 %v2502_v61, %v936_v17  ;;  %v3281_v55 = vmov %v3280_v49 }
 0x28d   : > { %v948_v57 = vmul.f32 %v3281_v55, %v2538_v26  ;;  %v996_v60 = vadd.f32 %v994_v11, %v2528_v2  ;;  %v2653_v42 = vadd.f32 %v887_v13, %v882_v40  ;;  %v2655_v50 = vadd.f32 %v888_v16, %v883_v6 }
 0x28e   : > { %v2657_v62 = vadd.f32 %v947_v18, %v942_v41  ;;  %v3283_v61 = vstv %s3279_s27  ;;  %v1002_v2 = vadd.f32 %v2410_v43, %v2464_v10  ;;  %v1056_v32 = vadd.f32 %v2560_v19, %v2530_v15 }
 0x28f   : > { %v1007_v21 = vmul.f32 %v3283_v61, %v2474_v24  ;;  %v2664_v22 = vadd.f32 %v948_v57, %v943_v30  ;;  %v3284_v11 = vmov %v3283_v61  ;;  %v1003_v0 = vadd.f32 %v2506_v51, %v996_v60  ;;  %v587_v40 = vpop.f32.mrf.mxu2 }
 0x290   : > { %v1008_v37 = vmul.f32 %v3284_v11, %v2538_v26  ;;  %v1062_v23 = vadd.f32 %v2416_v44, %v2466_v9  ;;  %v1067_v43 = vmul.f32 %v1066_v36, %v2474_v24  ;;  %v1068_v10 = vmul.f32 %v1066_v36, %v2538_v26 }
 0x291   : > { %v2690_v15 = vadd.f32 %v1007_v21, %v1002_v2  ;;  %v1063_v19 = vadd.f32 %v2526_v8, %v1056_v32  ;;  %v667_v51 = vstv %s2570_s12  ;;  %v727_v54 = vstv %s2577_s21  ;;  %s1071_s12 = sadd.s32 61, %s3261_s7  ;;  %s2730_s21 = sld [smem:[#allocation7 + %s1011_s5]] }
 0x292   : > { %v2696_v3 = vadd.f32 %v1008_v37, %v1003_v0  ;;  %v2698_v44 = vadd.f32 %v1067_v43, %v1062_v23  ;;  %v2701_v36 = vmul.f32 %v667_v51, %v2562_v20  ;;  %v2704_v9 = vmul.f32 %v667_v51, %v2673_v63  ;;  %s2737_s18 = sld [smem:[#allocation7 + %s1071_s12]] }
 0x293   : > { %v2709_v24 = vadd.f32 %v1068_v10, %v1063_v19  ;;  %v2712_v8 = vmul.f32 %v727_v54, %v2562_v20  ;;  %v787_v26 = vstv %s2588_s10  ;;  %v847_v14 = vstv %s2595_s2  ;;  %s718_s10 = sadd.s32 14, %s3261_s7  ;;  %s838_s2 = sadd.s32 30, %s3261_s7 }
 0x294   : > { %v2719_v4 = vmul.f32 %v727_v54, %v2673_v63  ;;  %v2722_v46 = vmul.f32 %v787_v26, %v2562_v20  ;;  %v2725_v35 = vmul.f32 %v787_v26, %v2673_v63  ;;  %v2728_v5 = vmul.f32 %v847_v14, %v2562_v20  ;;  %s2776_s28 = sld [smem:[#allocation7 + %s718_s10]] }
 0x295   : > { %v907_v7 = vstv %s2608_s25  ;;  %v967_v47 = vstv %s2616_s13  ;;  %v1027_v34 = vstv %s2627_s6  ;;  %v1087_v45 = vstv %s2640_s4  ;;  %s2780_s25 = sld [smem:[#allocation7 + %s778_s17]]  ;;  %s958_s13 = sadd.s32 46, %s3261_s7 }
 0x296   : > { %v2743_v28 = vmul.f32 %v847_v14, %v2673_v63  ;;  %v2746_v29 = vmul.f32 %v907_v7, %v2562_v20  ;;  %v2749_v12 = vmul.f32 %v907_v7, %v2673_v63  ;;  %v2752_v56 = vmul.f32 %v967_v47, %v2562_v20  ;;  %s2784_s3 = sld [smem:[#allocation7 + %s838_s2]] }
 0x297   : > { %v2756_v48 = vmul.f32 %v967_v47, %v2673_v63  ;;  %v2759_v13 = vmul.f32 %v1027_v34, %v2562_v20  ;;  %v2762_v25 = vmul.f32 %v1027_v34, %v2673_v63  ;;  %v2767_v16 = vmul.f32 %v1087_v45, %v2562_v20  ;;  %s2819_s6 = sld [smem:[#allocation7 + %s898_s26]] }
 0x298   : > { %v653_v17 = vstv %s2650_s16  ;;  %v713_v6 = vstv %s2662_s0  ;;  %v773_v41 = vstv %s2675_s30  ;;  %v833_v49 = vstv %s2687_s29  ;;  %s2834_s27 = sld [smem:[#allocation7 + %s958_s13]] }
 0x299   : > { %v654_v18 = vmul.f32 %v653_v17, %v2630_v59  ;;  %v655_v30 = vmul.f32 %v653_v17, %v587_v40  ;;  %v714_v55 = vmul.f32 %v713_v6, %v2630_v59  ;;  %v715_v57 = vmul.f32 %v713_v6, %v587_v40  ;;  %v2817_v17 = vpop.f32.mrf.mxu3  ;;  %s2846_s7 = sld [smem:[#allocation7 + %s1078_s20]] }
 0x29a   : > { %v774_v20 = vmul.f32 %v773_v41, %v2630_v59  ;;  %v775_v60 = vmul.f32 %v773_v41, %v587_v40  ;;  %v834_v61 = vmul.f32 %v833_v49, %v2630_v59  ;;  %v835_v21 = vmul.f32 %v833_v49, %v587_v40  ;;  %s3285_s4 = sld [smem:[#allocation15_spill]] }
 0x29b   : > { %v656_v2 = vadd.f32 %v654_v18, %v2573_v1  ;;  %v657_v11 = vadd.f32 %v655_v30, %v2591_v38  ;;  %v716_v37 = vadd.f32 %v714_v55, %v2593_v33  ;;  %v717_v32 = vadd.f32 %v715_v57, %v2598_v39 }
 0x29c   : > { %v776_v0 = vadd.f32 %v774_v20, %v2611_v58  ;;  %v777_v23 = vadd.f32 %v775_v60, %v2613_v31  ;;  %v836_v43 = vadd.f32 %v834_v61, %v2632_v52  ;;  %v837_v10 = vadd.f32 %v835_v21, %v2643_v53  ;;  %v672_v60 = vld [vmem:[#allocation2 + $0x30] sm:$0xff]  ;;  %v673_v61 = vld [vmem:[#allocation2 + $0x40] sm:$0xff] }
 0x29d   : > { %v893_v19 = vstv %s2706_s8  ;;  %v953_v51 = vstv %s2716_s19  ;;  %v1013_v54 = vstv %s2730_s21  ;;  %v1073_v1 = vstv %s2737_s18 }
 0x29e   : > { %v894_v38 = vmul.f32 %v893_v19, %v2630_v59  ;;  %v895_v33 = vmul.f32 %v893_v19, %v587_v40  ;;  %v954_v39 = vmul.f32 %v953_v51, %v2630_v59  ;;  %v955_v26 = vmul.f32 %v953_v51, %v587_v40  ;;  %v732_v51 = vld [vmem:[#allocation2] sm:$0xff] }
 0x29f   : > { %v1014_v58 = vmul.f32 %v1013_v54, %v2630_v59  ;;  %v1015_v31 = vmul.f32 %v1013_v54, %v587_v40  ;;  %v1074_v52 = vmul.f32 %v1073_v1, %v2630_v59  ;;  %v1075_v53 = vmul.f32 %v1073_v1, %v587_v40  ;;  %v733_v54 = vld [vmem:[#allocation2 + $0x20] sm:$0xff] }
 0x2a0   : > { %v2806_v14 = vadd.f32 %v894_v38, %v2653_v42  ;;  %v2809_v7 = vadd.f32 %v895_v33, %v2655_v50  ;;  %v2812_v47 = vadd.f32 %v954_v39, %v2657_v62  ;;  %v2815_v34 = vadd.f32 %v955_v26, %v2664_v22  ;;  %v792_v33 = vld [vmem:[#allocation2 + $0x58] sm:$0xff]  ;;  %p1679_p6 = scmp.ne.s32.totalorder %s3285_s4, 3 }
 0x2a1   : > { %v2823_v59 = vadd.f32 %v1014_v58, %v2690_v15  ;;  %v2826_v42 = vadd.f32 %v1015_v31, %v2696_v3  ;;  %v2829_v50 = vadd.f32 %v1074_v52, %v2698_v44  ;;  %v2832_v62 = vadd.f32 %v1075_v53, %v2709_v24  ;;  %v852_v53 = vld [vmem:[#allocation2 + $0x18] sm:$0xff]  ;;  %s3286_s16 = sld [smem:[#allocation23_spill]] (!%p1679_p6) }
 0x2a2   : > { %v660_v22 = vstv %s2769_s1  ;;  %v720_v40 = vstv %s2776_s28  ;;  %v780_v6 = vstv %s2780_s25  ;;  %v840_v41 = vstv %s2784_s3  ;;  %s3287_s23 = sld [smem:[#allocation24_spill]] (!%p1679_p6) }
 0x2a3   : > { %v661_v15 = vmul.f32 %v660_v22, %v2740_v27  ;;  %v662_v49 = vmul.f32 %v660_v22, %v2817_v17  ;;  %v721_v3 = vmul.f32 %v720_v40, %v2740_v27  ;;  %v722_v44 = vmul.f32 %v720_v40, %v2817_v17  ;;  %s3288_s30 = sld [smem:[#allocation60_spill]] (!%p1679_p6) }
 0x2a4   : > { %v781_v24 = vmul.f32 %v780_v6, %v2740_v27  ;;  %v782_v18 = vmul.f32 %v780_v6, %v2817_v17  ;;  %v841_v30 = vmul.f32 %v840_v41, %v2740_v27  ;;  %v842_v55 = vmul.f32 %v840_v41, %v2817_v17  ;;  %s3290_s29 = sld [smem:[#allocation25_spill]] (!%p1679_p6) }
 0x2a5   : > { %v663_v57 = vadd.f32 %v661_v15, %v656_v2  ;;  %v664_v20 = vadd.f32 %v662_v49, %v657_v11  ;;  %v723_v21 = vadd.f32 %v721_v3, %v716_v37  ;;  %v724_v19 = vadd.f32 %v722_v44, %v717_v32  ;;  %v793_v11 = vld [vmem:[#allocation2 + $0x10] sm:$0xff]  ;;  %v853_v37 = vld [vmem:[#allocation2 + $0x38] sm:$0xff] }
 0x2a6   : > { %v783_v1 = vadd.f32 %v781_v24, %v776_v0  ;;  %v784_v38 = vadd.f32 %v782_v18, %v777_v23  ;;  %v843_v39 = vadd.f32 %v841_v30, %v836_v43  ;;  %v844_v26 = vadd.f32 %v842_v55, %v837_v10 }
 0x2a7   : > { %v670_v58 = vadd.f32 %v2701_v36, %v663_v57  ;;  %v671_v31 = vadd.f32 %v2704_v9, %v664_v20  ;;  %v730_v52 = vadd.f32 %v2712_v8, %v723_v21  ;;  %v731_v2 = vadd.f32 %v2719_v4, %v724_v19  ;;  %v913_v21 = vld [vmem:[#allocation2 + $0x60] sm:$0xff]  ;;  %v972_v19 = vld [vmem:[#allocation2 + $0x68] sm:$0xff] }
 0x2a8   : > { %v790_v32 = vadd.f32 %v2722_v46, %v783_v1  ;;  %v791_v0 = vadd.f32 %v2725_v35, %v784_v38  ;;  %v850_v23 = vadd.f32 %v2728_v5, %v843_v39  ;;  %v851_v36 = vadd.f32 %v2743_v28, %v844_v26  ;;  %v973_v1 = vld [vmem:[#allocation2 + $0x70] sm:$0xff]  ;;  %v1033_v39 = vld [vmem:[#allocation2 + $0x78] sm:$0xff] }
 0x2a9   : > { %v674_v9 = vadd.f32 %v672_v60, %v670_v58  ;;  %v675_v43 = vadd.f32 %v673_v61, %v671_v31  ;;  %v734_v8 = vadd.f32 %v732_v51, %v730_v52  ;;  %v735_v10 = vadd.f32 %v733_v54, %v731_v2  ;;  %v912_v61 = vld [vmem:[#allocation2 + $0x50] sm:$0xff]  ;;  %v1093_v31 = vld [vmem:[#allocation2 + $0x28] sm:$0xff]  ;;  %s3289_s11 = scalar_lea.vmem (!%p1679_p6), %s3288_s30, %s3287_s23 }
 0x2aa   : > { %v794_v4 = vadd.f32 %v792_v33, %v790_v32  ;;  %v795_v22 = vadd.f32 %v793_v11, %v791_v0  ;;  %v854_v40 = vadd.f32 %v852_v53, %v850_v23  ;;  %v855_v6 = vadd.f32 %v853_v37, %v851_v36 }
 0x2ab   : > { %676 = vst [vmem:[#allocation2 + $0x30] sm:$0xff] %v674_v9  ;;  %v900_v41 = vstv %s2819_s6  ;;  %v960_v15 = vstv %s2834_s27  ;;  %v1020_v49 = vstv %s2840_s22  ;;  %v1080_v46 = vstv %s2846_s7 }
 0x2ac   : > { %677 = vst [vmem:[#allocation2 + $0x40] sm:$0xff] %v675_v43  ;;  %v901_v35 = vmul.f32 %v900_v41, %v2740_v27  ;;  %v902_v5 = vmul.f32 %v900_v41, %v2817_v17  ;;  %v961_v28 = vmul.f32 %v960_v15, %v2740_v27  ;;  %v962_v3 = vmul.f32 %v960_v15, %v2817_v17 }
 0x2ad   : > { %736 = vst [vmem:[#allocation2] sm:$0xff] %v734_v8  ;;  %v1021_v44 = vmul.f32 %v1020_v49, %v2740_v27  ;;  %v1022_v24 = vmul.f32 %v1020_v49, %v2817_v17  ;;  %v1081_v18 = vmul.f32 %v1080_v46, %v2740_v27  ;;  %v1082_v30 = vmul.f32 %v1080_v46, %v2817_v17 }
 0x2ae   : > { %737 = vst [vmem:[#allocation2 + $0x20] sm:$0xff] %v735_v10  ;;  %v903_v55 = vadd.f32 %v901_v35, %v2806_v14  ;;  %v904_v57 = vadd.f32 %v902_v5, %v2809_v7  ;;  %v963_v20 = vadd.f32 %v961_v28, %v2812_v47  ;;  %v964_v60 = vadd.f32 %v962_v3, %v2815_v34 }
 0x2af   : > { %796 = vst [vmem:[#allocation2 + $0x58] sm:$0xff] %v794_v4  ;;  %v1023_v51 = vadd.f32 %v1021_v44, %v2823_v59  ;;  %v1024_v27 = vadd.f32 %v1022_v24, %v2826_v42  ;;  %v1083_v17 = vadd.f32 %v1081_v18, %v2829_v50  ;;  %v1084_v54 = vadd.f32 %v1082_v30, %v2832_v62  ;;  %v1032_v50 = vld [vmem:[#allocation2 + $0x8] sm:$0xff] }
 0x2b0   : > { %797 = vst [vmem:[#allocation2 + $0x10] sm:$0xff] %v795_v22  ;;  %v910_v14 = vadd.f32 %v2746_v29, %v903_v55  ;;  %v911_v7 = vadd.f32 %v2749_v12, %v904_v57  ;;  %v970_v47 = vadd.f32 %v2752_v56, %v963_v20  ;;  %v971_v34 = vadd.f32 %v2756_v48, %v964_v60  ;;  %v1092_v48 = vld [vmem:[#allocation2 + $0x48] sm:$0xff] }
 0x2b1   : > { %v1089_v38 = vmul.f32 %v1087_v45, %v2673_v63  ;;  %856 = vst [vmem:[#allocation2 + $0x18] sm:$0xff] %v854_v40  ;;  %v1030_v59 = vadd.f32 %v2759_v13, %v1023_v51  ;;  %v1031_v42 = vadd.f32 %v2762_v25, %v1024_v27  ;;  %v1090_v12 = vadd.f32 %v2767_v16, %v1083_v17 }
 0x2b2   : > { %857 = vst [vmem:[#allocation2 + $0x38] sm:$0xff] %v855_v6  ;;  %v914_v62 = vadd.f32 %v912_v61, %v910_v14  ;;  %v915_v33 = vadd.f32 %v913_v21, %v911_v7  ;;  %v974_v29 = vadd.f32 %v972_v19, %v970_v47  ;;  %v975_v56 = vadd.f32 %v973_v1, %v971_v34 }
 0x2b3   : > { %v1091_v26 = vadd.f32 %v1089_v38, %v1084_v54  ;;  %v1034_v58 = vadd.f32 %v1032_v50, %v1030_v59  ;;  %v1035_v63 = vadd.f32 %v1033_v39, %v1031_v42  ;;  %v1094_v45 = vadd.f32 %v1092_v48, %v1090_v12 }
 0x2b4   : > { %916 = vst [vmem:[#allocation2 + $0x50] sm:$0xff] %v914_v62 }
 0x2b5   : > { %917 = vst [vmem:[#allocation2 + $0x60] sm:$0xff] %v915_v33  ;;  %v1095_v13 = vadd.f32 %v1093_v31, %v1091_v26 }
 0x2b6   : > { %976 = vst [vmem:[#allocation2 + $0x68] sm:$0xff] %v974_v29 }
 0x2b7   : > { %977 = vst [vmem:[#allocation2 + $0x70] sm:$0xff] %v975_v56  ;;  %1101 = sbr.rel (%p1679_p6) target bundleno = 1164 (0x48c), region = 68 }
 0x2b8   : > { %1036 = vst [vmem:[#allocation2 + $0x8] sm:$0xff] %v1034_v58 }
 0x2b9   : > { %1037 = vst [vmem:[#allocation2 + $0x78] sm:$0xff] %v1035_v63 }
 0x2ba   : > { %1096 = vst [vmem:[#allocation2 + $0x48] sm:$0xff] %v1094_v45 }
 0x2bb   : > { %1097 = vst [vmem:[#allocation2 + $0x28] sm:$0xff] %v1095_v13 }
 0x2bc   : > { %v1102_v25 = vld [vmem:[#allocation2 + $0x30] sm:$0xff]  ;;  %v1103_v16 = vld [vmem:[#allocation2] sm:$0xff]  ;;  %v2891_v52 = vld [vmem:[#allocation2 + $0x58] sm:$0xff]  ;;  %vm1274_vm4 = vcmask 0   ;;  %s1681_s8 = sld [smem:[#allocation8 + $0x80]] (!%p1636_p5) }
 0x2bd   : > { %v1142_v2 = vmax.f32 %v1102_v25, %v1103_v16  ;;  %v2893_v11 = vld [vmem:[#allocation2 + $0x18] sm:$0xff]  ;;  %v1110_v53 = vld [vmem:[#allocation2 + $0x40] sm:$0xff]  ;;  %v2900_v36 = vld [vmem:[#allocation2 + $0x50] sm:$0xff]  ;;  %s1296_s12 = sld [smem:[#allocation8]] (!%p1636_p5) }
 0x2be   : > { %v2895_v37 = vld [vmem:[#allocation2 + $0x20] sm:$0xff]  ;;  %v2902_v9 = vld [vmem:[#allocation2 + $0x10] sm:$0xff]  ;;  %v2904_v43 = vld [vmem:[#allocation2 + $0x68] sm:$0xff]  ;;  %s1683_s19 = sld [smem:[#allocation8 + $0x100]] (!%p1636_p5) }
 0x2bf   : > { %v1144_v32 = vmax.f32 %v1142_v2, %v2891_v52  ;;  %v1143_v0 = vmax.f32 %v1110_v53, %v2895_v37  ;;  %v2906_v8 = vld [vmem:[#allocation2 + $0x38] sm:$0xff]  ;;  %v2910_v22 = vld [vmem:[#allocation2 + $0x8] sm:$0xff]  ;;  %v2912_v40 = vld [vmem:[#allocation2 + $0x60] sm:$0xff]  ;;  %s1684_s21 = sld [smem:[#allocation8 + $0x101]] (!%p1636_p5) }
 0x2c0   : > { %v2918_v49 = vld [vmem:[#allocation2 + $0x70] sm:$0xff]  ;;  %v1118_v46 = vld [vmem:[%s3286_s16] sm:$0xff]  ;;  %v2922_v35 = vld [vmem:[%s3286_s16 + $0x8] sm:$0xff]  ;;  %s1682_s14 = sld [smem:[#allocation8 + $0x81]] (!%p1636_p5) }
 0x2c1   : > { %v1146_v23 = vmax.f32 %v1144_v32, %v2893_v11  ;;  %v1145_v10 = vmax.f32 %v1143_v0, %v2902_v9  ;;  %v2916_v15 = vld [vmem:[#allocation2 + $0x48] sm:$0xff]  ;;  %v2925_v5 = vld [vmem:[%s3286_s16 + $0x10] sm:$0xff]  ;;  %v2929_v44 = vld [vmem:[#allocation2 + $0x78] sm:$0xff]  ;;  %v1126_v30 = vunpack.c.l.bf16 %v1118_v46  ;;  %v1127_v60 = vunpack.c.h.bf16 %v1118_v46  ;;  %s3029_s17 = sld [smem:[#allocation8 + $0x180]] (!%p1636_p5) }
 0x2c2   : > { %v1122_v24 = vld [vmem:[%s3286_s16 + $0x20] sm:$0xff]  ;;  %v2933_v18 = vld [vmem:[%s3286_s16 + $0x28] sm:$0xff]  ;;  %v1128_v61 = vunpack.c.l.bf16 %v2922_v35  ;;  %v1129_v21 = vunpack.c.h.bf16 %v2922_v35  ;;  %v1130_v19 = vunpack.c.l.bf16 %v2925_v5  ;;  %s1319_s18 = smul.f32 (!%p1636_p5), 2.0, %s1681_s8  ;;  %s3031_s1 = sld [smem:[#allocation8 + $0x102]] (!%p1636_p5) }
 0x2c3   : > { %v1148_v4 = vmax.f32 %v1146_v23, %v2900_v36  ;;  %v1147_v6 = vmax.f32 %v1145_v10, %v2906_v8  ;;  %v2939_v20 = vld [vmem:[#allocation2 + $0x28] sm:$0xff]  ;;  %v1134_v14 = vunpack.c.l.bf16 %v1122_v24  ;;  %v1135_v7 = vunpack.c.h.bf16 %v1122_v24  ;;  %s3033_s28 = sld [smem:[#allocation8 + $0x181]] (!%p1636_p5) }
 0x2c4   : > { %v1136_v47 = vunpack.c.l.bf16 %v2933_v18  ;;  %v1162_v50 = vmul.f32 %v1126_v30, %v1102_v25  ;;  %v1172_v62 = vmul.f32 %v1127_v60, %v1103_v16  ;;  %v1184_v23 = vmul.f32 %v1128_v61, %v2891_v52  ;;  %s1361_s2 = smul.f32 (!%p1636_p5), 2.0, %s1683_s19  ;;  %s3035_s13 = sld [smem:[#allocation8 + $0x182]] (!%p1636_p5) }
 0x2c5   : > { %v1150_v41 = vmax.f32 %v1148_v4, %v2904_v43  ;;  %v1149_v28 = vmax.f32 %v1147_v6, %v2912_v40  ;;  %v1163_v13 = vmul.f32 %v1134_v14, %v1110_v53  ;;  %v1173_v2 = vmul.f32 %v1135_v7, %v2895_v37  ;;  %s1381_s3 = smul.f32 (!%p1636_p5), 2.0, %s1684_s21  ;;  %s1689_s7 = sld [smem:[#allocation8 + $0x183]] (!%p1636_p5) }
 0x2c6   : > { %v1174_v6 = vadd.f32 %v1172_v62, %v1162_v50  ;;  %v1185_v30 = vmul.f32 %v1136_v47, %v2902_v9  ;;  %s3292_s0 = sld [smem:[#allocation25_spill]] (!%p1636_p5) }
 0x2c7   : > { %v1152_v3 = vmax.f32 %v1150_v41, %v2910_v22  ;;  %v1151_v55 = vmax.f32 %v1149_v28, %v2918_v49  ;;  %v1175_v61 = vadd.f32 %v1173_v2, %v1163_v13  ;;  %v1125_v2 = vld [vmem:[%s3286_s16 + $0x38] sm:$0xff]  ;;  %s1423_s27 = smul.f32 (!%p1636_p5), 2.0, %s3029_s17 }
 0x2c8   : > { %v1186_v14 = vadd.f32 %v1184_v23, %v1174_v6  ;;  %v1140_v6 = vunpack.c.l.bf16 %v1125_v2 }
 0x2c9   : > { %v2937_v57 = vmax.f32 %v1152_v3, %v2916_v15  ;;  %v1153_v51 = vmax.f32 %v1151_v55, %v2929_v44  ;;  %s1443_s22 = smul.f32 (!%p1636_p5), 2.0, %s3033_s28 }
 0x2ca   : > { %s1463_s23 = smul.f32 (!%p1636_p5), 2.0, %s3035_s13 }
 0x2cb   : > { %v1156_v27 = vsub.f32 %v1102_v25, %v2937_v57  ;;  %v1164_v17 = vsub.f32 %v1103_v16, %v2937_v57  ;;  %v1176_v54 = vsub.f32 %v2891_v52, %v2937_v57  ;;  %v1188_v34 = vsub.f32 %v2893_v11, %v2937_v57 }
 0x2cc   : > { %v2953_v1 = vmax.f32 %v1153_v51, %v2939_v20  ;;  %v1200_v29 = vsub.f32 %v2900_v36, %v2937_v57  ;;  %v1212_v58 = vsub.f32 %v2904_v43, %v2937_v57  ;;  %v1224_v0 = vsub.f32 %v2910_v22, %v2937_v57 }
 0x2cd   : > { %v1158_v38 = vmul.f32 1.442695, %v1156_v27  ;;  %v1166_v59 = vmul.f32 1.442695, %v1164_v17  ;;  %v1178_v42 = vmul.f32 1.442695, %v1176_v54  ;;  %v1236_v46 = vsub.f32 %v2916_v15, %v2937_v57 }
 0x2ce   : > { %v1190_v33 = vmul.f32 1.442695, %v1188_v34  ;;  %v1157_v39 = vsub.f32 %v1110_v53, %v2953_v1  ;;  %v1165_v12 = vsub.f32 %v2895_v37, %v2953_v1  ;;  %v1177_v56 = vsub.f32 %v2902_v9, %v2953_v1  ;;  %v1124_v54 = vld [vmem:[%s3286_s16 + $0x30] sm:$0xff] }
 0x2cf   : > { %1829 = vpow2.f32 %v1158_v38  ;;  %v1189_v26 = vsub.f32 %v2906_v8, %v2953_v1  ;;  %v1201_v48 = vsub.f32 %v2912_v40, %v2953_v1  ;;  %v1213_v16 = vsub.f32 %v2918_v49, %v2953_v1 }
 0x2d0   : > { %1831 = vpow2.f32 %v1166_v59  ;;  %v1160_v31 = vmul.f32 1.442695, %v1157_v39  ;;  %v1168_v63 = vmul.f32 1.442695, %v1165_v12  ;;  %v1180_v45 = vmul.f32 1.442695, %v1177_v56 }
 0x2d1   : > { %1833 = vpow2.f32 %v1178_v42  ;;  %v1192_v25 = vmul.f32 1.442695, %v1189_v26  ;;  %v1202_v32 = vmul.f32 1.442695, %v1200_v29  ;;  %v1204_v10 = vmul.f32 1.442695, %v1201_v48 }
 0x2d2   : > { %1835 = vpow2.f32 %v1190_v33  ;;  %v1225_v4 = vsub.f32 %v2929_v44, %v2953_v1  ;;  %v1214_v41 = vmul.f32 1.442695, %v1212_v58  ;;  %v1137_v37 = vunpack.c.h.bf16 %v2933_v18  ;;  %v1121_v26 = vld [vmem:[%s3286_s16 + $0x18] sm:$0xff] }
 0x2d3   : > { %1837 = vpow2.f32 %v1160_v31  ;;  %v1216_v28 = vmul.f32 1.442695, %v1213_v16  ;;  %v1237_v52 = vsub.f32 %v2939_v20, %v2953_v1  ;;  %v1226_v55 = vmul.f32 1.442695, %v1224_v0 }
 0x2d4   : > { %1839 = vpow2.f32 %v1168_v63  ;;  %v1196_v51 = vmul.f32 %v1129_v21, %v2893_v11  ;;  %v1228_v27 = vmul.f32 1.442695, %v1225_v4  ;;  %v1238_v7 = vmul.f32 1.442695, %v1236_v46 }
 0x2d5   : > { %v1830_v53 = vpop.eup %1829  ;;  %1841 = vpow2.f32 %v1180_v45  ;;  %v1240_v38 = vmul.f32 1.442695, %v1237_v52  ;;  %v1131_v9 = vunpack.c.h.bf16 %v2925_v5  ;;  %v1138_v11 = vunpack.c.l.bf16 %v1124_v54 }
 0x2d6   : > { %v1832_v35 = vpop.eup %1831  ;;  %1843 = vpow2.f32 %v1192_v25  ;;  %v1187_v21 = vadd.f32 %v1185_v30, %v1175_v61  ;;  %v1197_v62 = vmul.f32 %v1137_v37, %v2906_v8  ;;  %v1198_v39 = vadd.f32 %v1196_v51, %v1186_v14 }
 0x2d7   : > { %v1834_v3 = vpop.eup %1833  ;;  %v1170_v24 = vadd.f32 %v1832_v35, %v1830_v53  ;;  %1845 = vpow2.f32 %v1202_v32  ;;  %v1208_v12 = vmul.f32 %v1130_v19, %v2900_v36  ;;  %v1139_v45 = vunpack.c.h.bf16 %v1124_v54 }
 0x2d8   : > { %v1836_v60 = vpop.eup %1835  ;;  %1847 = vpow2.f32 %v1204_v10  ;;  %v1199_v13 = vadd.f32 %v1197_v62, %v1187_v21  ;;  %v1209_v8 = vmul.f32 %v1138_v11, %v2912_v40  ;;  %v1132_v32 = vunpack.c.l.bf16 %v1121_v26 }
 0x2d9   : > { %v1838_v17 = vpop.eup %1837  ;;  %v1182_v18 = vadd.f32 %v1834_v3, %v1170_v24  ;;  %1849 = vpow2.f32 %v1214_v41  ;;  %v1210_v23 = vadd.f32 %v1208_v12, %v1198_v39  ;;  %v1220_v36 = vmul.f32 %v1131_v9, %v2904_v43 }
 0x2da   : > { %v1840_v34 = vpop.eup %1839  ;;  %1851 = vpow2.f32 %v1216_v28  ;;  %v1211_v41 = vadd.f32 %v1209_v8, %v1199_v13  ;;  %v1221_v46 = vmul.f32 %v1139_v45, %v2918_v49  ;;  %v1133_v37 = vunpack.c.h.bf16 %v1121_v26 }
 0x2db   : > { %v1842_v59 = vpop.eup %1841  ;;  %v1171_v47 = vadd.f32 %v1840_v34, %v1838_v17  ;;  %v1194_v42 = vadd.f32 %v1836_v60, %v1182_v18  ;;  %1853 = vpow2.f32 %v1226_v55  ;;  %v1222_v40 = vadd.f32 %v1220_v36, %v1210_v23 }
 0x2dc   : > { %v1844_v50 = vpop.eup %1843  ;;  %1855 = vpow2.f32 %v1228_v27  ;;  %v1232_v52 = vmul.f32 %v1132_v32, %v2910_v22  ;;  %v1141_v24 = vunpack.c.h.bf16 %v1125_v2  ;;  %v1223_v43 = vadd.f32 %v1221_v46, %v1211_v41 }
 0x2dd   : > { %v1846_v33 = vpop.eup %1845  ;;  %v1183_v29 = vadd.f32 %v1842_v59, %v1171_v47  ;;  %1857 = vpow2.f32 %v1238_v7  ;;  %v1233_v30 = vmul.f32 %v1140_v6, %v2929_v44  ;;  %v1244_v60 = vmul.f32 %v1133_v37, %v2916_v15  ;;  %v1828_v44 = vld [vmem:[%s3289_s11] ss:$0 sm:$0xff] }
 0x2de   : > { %v1848_v56 = vpop.eup %1847  ;;  %v1206_v48 = vadd.f32 %v1846_v33, %v1194_v42  ;;  %1859 = vpow2.f32 %v1240_v38  ;;  %v1234_v55 = vadd.f32 %v1232_v52, %v1222_v40  ;;  %v1245_v49 = vmul.f32 %v1141_v24, %v2939_v20 }
 0x2df   : > { %v1850_v58 = vpop.eup %1849  ;;  %v1195_v31 = vadd.f32 %v1844_v50, %v1183_v29  ;;  %v1235_v51 = vadd.f32 %v1233_v30, %v1223_v43 }
 0x2e0   : > { %v1852_v63 = vpop.eup %1851  ;;  %v1218_v25 = vadd.f32 %v1850_v58, %v1206_v48  ;;  %v1246_v27 = vadd.f32 %v1244_v60, %v1234_v55 }
 0x2e1   : > { %v1854_v16 = vpop.eup %1853  ;;  %v1207_v0 = vadd.f32 %v1848_v56, %v1195_v31  ;;  %v1247_v18 = vadd.f32 %v1245_v49, %v1235_v51 }
 0x2e2   : > { %v1856_v5 = vpop.eup %1855  ;;  %v1230_v19 = vadd.f32 %v1854_v16, %v1218_v25 }
 0x2e3   : > { %v1858_v10 = vpop.eup %1857  ;;  %v1219_v4 = vadd.f32 %v1852_v63, %v1207_v0 }
 0x2e4   : > { %v1860_v53 = vpop.eup %1859  ;;  %v1242_v35 = vadd.f32 %v1858_v10, %v1230_v19 }
 0x2e5   : > { %v1231_v28 = vadd.f32 %v1856_v5, %v1219_v4 }
 0x2e6   : > { %1861 = vlog2.f32 %v1242_v35 }
 0x2e7   : > { %v1243_v3 = vadd.f32 %v1860_v53, %v1231_v28 }
 0x2e9   : > { %1863 = vlog2.f32 %v1243_v3 }
 0x2ec   : > { %v1862_v61 = vpop.eup %1861 }
 0x2ed   : > { %v1249_v17 = vmul.f32 0.6931472, %v1862_v61 }
 0x2ef   : > { %v1864_v54 = vpop.eup %1863  ;;  %v1252_v22 = vadd.f32 %v1249_v17, %v2937_v57 }
 0x2f0   : > { %v1251_v14 = vmul.f32 0.6931472, %v1864_v54 }
 0x2f1   : > { %v1255_v7 = vsub.f32 %v1246_v27, %v1252_v22 }
 0x2f2   : > { %v1253_v15 = vadd.f32 %v1251_v14, %v2953_v1 }
 0x2f3   : > { %v1260_v38 = vmul.f32 %v1828_v44, %v1255_v7 }
 0x2f4   : > { %v1256_v34 = vsub.f32 %v1247_v18, %v1253_v15 }
 0x2f6   : > { %v1261_v59 = vmul.f32 %v1828_v44, %v1256_v34 }
 0x2f8   : > { %v1262_v20 = vadd.f32 %v1261_v59, %v1260_v38 }
 0x2fa   : > { %1263 = vadd.xlane.f32.xlu0 %v1262_v20 }
 0x36d   : > { %v1264_v9 = vpop.xlane.xlu0 %1263 }
 0x36e   : > { %v1265_v47 = vrot.slane %v1264_v9, 4 }
 0x370   : > { %v1266_v42 = vadd.f32 %v1265_v47, %v1264_v9 }
 0x372   : > { %v1267_v57 = vrot.slane %v1266_v42, 2 }
 0x374   : > { %v1268_v50 = vadd.f32 %v1267_v57, %v1266_v42 }
 0x376   : > { %v1269_v11 = vrot.slane %v1268_v50, 1 }
 0x378   : > { %v1270_v21 = vadd.f32 %v1269_v11, %v1268_v50 }
 0x37a   : > { %1703 = vpush %v1270_v21 }
 0x3ab   : > { %s1704_s15 = spop %1703  ;;  %1278 = sbr.rel (%p1636_p5) target bundleno = 1164 (0x48c), region = 72 }
 0x3ac   : > { %v1272_v62 = vstv %s1704_s15 }
 0x3ad   : > { %v1273_v33 = vsub.f32 0.0, %v1272_v62 }
 0x3af   : > { %1275 = vst.msk [vmem:[%s3290_s29] sm:$0x1] %vm1274_vm4, %v1273_v33 }
 0x3b0   : > { %v1301_v1 = vld [vmem:[#allocation3 + $0x10] sm:$0xff]  ;;  %v1302_v29 = vld [vmem:[#allocation3 + $0x18] sm:$0xff]  ;;  %v1343_v39 = vld [vmem:[#allocation3 + $0x20] sm:$0xff] }
 0x3b1   : > { %v1344_v12 = vld [vmem:[#allocation3 + $0x28] sm:$0xff]  ;;  %v1365_v56 = vmul.f32 %v1343_v39, %v1301_v1  ;;  %v1323_v26 = vmul.f32 %v1301_v1, %v1301_v1  ;;  %v1324_v48 = vmul.f32 %v1302_v29, %v1302_v29  ;;  %v1279_v58 = vld [vmem:[#allocation3] sm:$0xff]  ;;  %v1385_v8 = vmul.f32 %v1343_v39, %v1343_v39  ;;  %v1405_v3 = vld [vmem:[#allocation3 + $0x30] sm:$0xff] }
 0x3b2   : > { %v1280_v31 = vld [vmem:[#allocation3 + $0x8] sm:$0xff]  ;;  %v1366_v63 = vmul.f32 %v1344_v12, %v1302_v29  ;;  %v1281_v45 = vmul.f32 %v1279_v58, %v1279_v58  ;;  %v1386_v32 = vmul.f32 %v1344_v12, %v1344_v12  ;;  %v1345_v4 = vmul.f32 %v1343_v39, %v1279_v58  ;;  %v1406_v24 = vld [vmem:[#allocation3 + $0x38] sm:$0xff] }
 0x3b3   : > { %v1282_v13 = vmul.f32 %v1280_v31, %v1280_v31  ;;  %v1367_v25 = vsel %vm423_vm2, %v1365_v56, 0.0  ;;  %v1325_v16 = vsel %vm423_vm2, %v1323_v26, 0.0  ;;  %v1326_v2 = vsel %vm423_vm2, %v1324_v48, 0.0 }
 0x3b4   : > { %v1368_v0 = vsel %vm423_vm2, %v1366_v63, 0.0  ;;  %v1327_v23 = vadd.f32 %v1326_v2, %v1325_v16  ;;  %v1283_v36 = vsel %vm423_vm2, %v1281_v45, 0.0  ;;  %v1346_v53 = vmul.f32 %v1344_v12, %v1280_v31 }
 0x3b5   : > { %v1284_v5 = vsel %vm423_vm2, %v1282_v13, 0.0  ;;  %v1369_v19 = vadd.f32 %v1368_v0, %v1367_v25  ;;  %v1303_v6 = vmul.f32 %v1301_v1, %v1279_v58  ;;  %v1304_v41 = vmul.f32 %v1302_v29, %v1280_v31 }
 0x3b6   : > { %v1285_v10 = vadd.f32 %v1284_v5, %v1283_v36  ;;  %1328 = vadd.xlane.f32.xlu1 %v1327_v23  ;;  %v1387_v46 = vsel %vm423_vm2, %v1385_v8, 0.0  ;;  %v1347_v35 = vsel %vm423_vm2, %v1345_v4, 0.0  ;;  %v1388_v37 = vsel %vm423_vm2, %v1386_v32, 0.0 }
 0x3b7   : > { %1370 = vadd.xlane.f32.xlu2 %v1369_v19  ;;  %v1348_v40 = vsel %vm423_vm2, %v1346_v53, 0.0  ;;  %v1305_v28 = vsel %vm423_vm2, %v1303_v6, 0.0  ;;  %v1306_v52 = vsel %vm423_vm2, %v1304_v41, 0.0  ;;  %v1389_v30 = vadd.f32 %v1388_v37, %v1387_v46 }
 0x3b8   : > { %1286 = vadd.xlane.f32.xlu0 %v1285_v10  ;;  %v1349_v43 = vadd.f32 %v1348_v40, %v1347_v35  ;;  %v1307_v55 = vadd.f32 %v1306_v52, %v1305_v28  ;;  %v1427_v60 = vmul.f32 %v1405_v3, %v1301_v1  ;;  %v1428_v61 = vmul.f32 %v1406_v24, %v1302_v29 }
 0x3b9   : > { %v1447_v51 = vmul.f32 %v1405_v3, %v1343_v39  ;;  %v1448_v49 = vmul.f32 %v1406_v24, %v1344_v12  ;;  %v1407_v27 = vmul.f32 %v1405_v3, %v1279_v58  ;;  %v1408_v17 = vmul.f32 %v1406_v24, %v1280_v31 }
 0x3ba   : > { %v1429_v54 = vsel %vm423_vm2, %v1427_v60, 0.0  ;;  %v1430_v22 = vsel %vm423_vm2, %v1428_v61, 0.0  ;;  %v1467_v59 = vmul.f32 %v1405_v3, %v1405_v3  ;;  %v1468_v20 = vmul.f32 %v1406_v24, %v1406_v24 }
 0x3bb   : > { %v1449_v18 = vsel %vm423_vm2, %v1447_v51, 0.0  ;;  %v1450_v14 = vsel %vm423_vm2, %v1448_v49, 0.0  ;;  %v1409_v44 = vsel %vm423_vm2, %v1407_v27, 0.0  ;;  %v1410_v7 = vsel %vm423_vm2, %v1408_v17, 0.0 }
 0x3bc   : > { %v1431_v15 = vadd.f32 %v1430_v22, %v1429_v54  ;;  %v1451_v34 = vadd.f32 %v1450_v14, %v1449_v18  ;;  %v1411_v38 = vadd.f32 %v1410_v7, %v1409_v44  ;;  %v1469_v9 = vsel %vm423_vm2, %v1467_v59, 0.0 }
 0x3bd   : > { %v1470_v47 = vsel %vm423_vm2, %v1468_v20, 0.0 }
 0x3be   : > { %1350 = vadd.xlane.f32.xlu1 %v1349_v43  ;;  %v1471_v42 = vadd.f32 %v1470_v47, %v1469_v9 }
 0x3bf   : > { %1390 = vadd.xlane.f32.xlu2 %v1389_v30 }
 0x3c0   : > { %1308 = vadd.xlane.f32.xlu0 %v1307_v55 }
 0x3c6   : > { %1432 = vadd.xlane.f32.xlu1 %v1431_v15 }
 0x3c7   : > { %1452 = vadd.xlane.f32.xlu2 %v1451_v34 }
 0x3c8   : > { %1412 = vadd.xlane.f32.xlu0 %v1411_v38 }
 0x3d0   : > { %1472 = vadd.xlane.f32.xlu0 %v1471_v42 }
 0x429   : > { %v1329_v57 = vpop.xlane.xlu1 %1328 }
 0x42a   : > { %v1371_v50 = vpop.xlane.xlu2 %1370  ;;  %v1330_v11 = vrot.slane %v1329_v57, 4 }
 0x42b   : > { %v1287_v21 = vpop.xlane.xlu0 %1286  ;;  %v1372_v33 = vrot.slane %v1371_v50, 4 }
 0x42c   : > { %v1288_v62 = vrot.slane %v1287_v21, 4  ;;  %v1331_v29 = vadd.f32 %v1330_v11, %v1329_v57 }
 0x42d   : > { %v1373_v12 = vadd.f32 %v1372_v33, %v1371_v50 }
 0x42e   : > { %v1289_v1 = vadd.f32 %v1288_v62, %v1287_v21  ;;  %v1332_v48 = vrot.slane %v1331_v29, 2 }
 0x42f   : > { %v1374_v25 = vrot.slane %v1373_v12, 2 }
 0x430   : > { %v1290_v39 = vrot.slane %v1289_v1, 2  ;;  %v1333_v36 = vadd.f32 %v1332_v48, %v1331_v29  ;;  %v1297_v29 = vstv %s1296_s12 }
 0x431   : > { %v1351_v56 = vpop.xlane.xlu1 %1350  ;;  %v1375_v4 = vadd.f32 %v1374_v25, %v1373_v12  ;;  %v1382_v25 = vstv %s1381_s3 }
 0x432   : > { %v1291_v26 = vadd.f32 %v1290_v39, %v1289_v1  ;;  %v1391_v58 = vpop.xlane.xlu2 %1390  ;;  %v1352_v31 = vrot.slane %v1351_v56, 4  ;;  %v1334_v40 = vrot.slane %v1333_v36, 1  ;;  %v1320_v39 = vstv %s1319_s18 }
 0x433   : > { %v1309_v63 = vpop.xlane.xlu0 %1308  ;;  %v1392_v45 = vrot.slane %v1391_v58, 4  ;;  %v1376_v55 = vrot.slane %v1375_v4, 1 }
 0x434   : > { %v1310_v13 = vrot.slane %v1309_v63, 4  ;;  %v1292_v8 = vrot.slane %v1291_v26, 1  ;;  %v1353_v16 = vadd.f32 %v1352_v31, %v1351_v56  ;;  %v1335_v17 = vadd.f32 %v1334_v40, %v1333_v36 }
 0x435   : > { %v1393_v2 = vadd.f32 %v1392_v45, %v1391_v58  ;;  %v1377_v44 = vadd.f32 %v1376_v55, %v1375_v4  ;;  %v1339_v56 = vstv %s1682_s14 }
 0x436   : > { %v1311_v32 = vadd.f32 %v1310_v13, %v1309_v63  ;;  %v1293_v0 = vadd.f32 %v1292_v8, %v1291_v26  ;;  %v1354_v23 = vrot.slane %v1353_v16, 2  ;;  %v1362_v63 = vstv %s1361_s2 }
 0x437   : > { %v1394_v5 = vrot.slane %v1393_v2, 2 }
 0x438   : > { %v1312_v19 = vrot.slane %v1311_v32, 2  ;;  %1705 = vpush %v1293_v0  ;;  %v1355_v10 = vadd.f32 %v1354_v23, %v1353_v16  ;;  %v1401_v0 = vstv %s3031_s1 }
 0x439   : > { %v1433_v53 = vpop.xlane.xlu1 %1432  ;;  %v1395_v41 = vadd.f32 %v1394_v5, %v1393_v2 }
 0x43a   : > { %v1313_v6 = vadd.f32 %v1312_v19, %v1311_v32  ;;  %v1453_v46 = vpop.xlane.xlu2 %1452  ;;  %v1434_v35 = vrot.slane %v1433_v53, 4  ;;  %v1356_v28 = vrot.slane %v1355_v10, 1  ;;  %v1424_v19 = vstv %s1423_s27 }
 0x43b   : > { %v1413_v37 = vpop.xlane.xlu0 %1412  ;;  %v1454_v52 = vrot.slane %v1453_v46, 4  ;;  %v1396_v43 = vrot.slane %v1395_v41, 1 }
 0x43c   : > { %v1414_v3 = vrot.slane %v1413_v37, 4  ;;  %v1314_v24 = vrot.slane %v1313_v6, 1  ;;  %v1435_v30 = vadd.f32 %v1434_v35, %v1433_v53  ;;  %v1357_v49 = vadd.f32 %v1356_v28, %v1355_v10 }
 0x43d   : > { %v1455_v60 = vadd.f32 %v1454_v52, %v1453_v46  ;;  %v1397_v18 = vadd.f32 %v1396_v43, %v1395_v41  ;;  %v1483_v52 = vstv %s1689_s7 }
 0x43e   : > { %v1415_v61 = vadd.f32 %v1414_v3, %v1413_v37  ;;  %v1315_v51 = vadd.f32 %v1314_v24, %v1313_v6  ;;  %v1436_v27 = vrot.slane %v1435_v30, 2  ;;  %v1444_v6 = vstv %s1443_s22 }
 0x43f   : > { %v1456_v54 = vrot.slane %v1455_v60, 2  ;;  %v1464_v37 = vstv %s1463_s23 }
 0x440   : > { %v1416_v22 = vrot.slane %v1415_v61, 2  ;;  %1707 = vpush %v1315_v51  ;;  %v1437_v14 = vadd.f32 %v1436_v27, %v1435_v30 }
 0x441   : > { %1709 = vpush %v1335_v17  ;;  %v1457_v7 = vadd.f32 %v1456_v54, %v1455_v60 }
 0x442   : > { %1711 = vpush %v1357_v49  ;;  %v1417_v15 = vadd.f32 %v1416_v22, %v1415_v61  ;;  %v1438_v38 = vrot.slane %v1437_v14, 1  ;;  %v1486_v61 = vld [vmem:[%s3292_s0] sm:$0x1] }
 0x443   : > { %1713 = vpush %v1377_v44  ;;  %v1473_v34 = vpop.xlane.xlu0 %1472  ;;  %v1458_v9 = vrot.slane %v1457_v7, 1 }
 0x444   : > { %1715 = vpush %v1397_v18  ;;  %v1474_v59 = vrot.slane %v1473_v34, 4  ;;  %v1418_v20 = vrot.slane %v1417_v15, 1  ;;  %v1439_v47 = vadd.f32 %v1438_v38, %v1437_v14 }
 0x445   : > { %v1459_v50 = vadd.f32 %v1458_v9, %v1457_v7 }
 0x446   : > { %v1475_v42 = vadd.f32 %v1474_v59, %v1473_v34  ;;  %v1419_v57 = vadd.f32 %v1418_v20, %v1417_v15 }
 0x448   : > { %v1476_v11 = vrot.slane %v1475_v42, 2  ;;  %1717 = vpush %v1419_v57 }
 0x449   : > { %1719 = vpush %v1439_v47 }
 0x44a   : > { %v1477_v21 = vadd.f32 %v1476_v11, %v1475_v42  ;;  %1721 = vpush %v1459_v50 }
 0x44c   : > { %v1478_v62 = vrot.slane %v1477_v21, 1 }
 0x44e   : > { %v1479_v33 = vadd.f32 %v1478_v62, %v1477_v21 }
 0x450   : > { %1723 = vpush %v1479_v33 }
 0x469   : > { %s1706_s10 = spop %1705 }
 0x46a   : > { %v1295_v1 = vstv %s1706_s10 }
 0x46b   : > { %v1298_v26 = vmul.f32 %v1297_v29, %v1295_v1 }
 0x471   : > { %s1708_s25 = spop %1707 }
 0x472   : > { %v1317_v12 = vstv %s1708_s25  ;;  %s1710_s26 = spop %1709 }
 0x473   : > { %v1321_v48 = vmul.f32 %v1320_v39, %v1317_v12  ;;  %v1337_v58 = vstv %s1710_s26  ;;  %s1712_s24 = spop %1711 }
 0x474   : > { %v1359_v31 = vstv %s1712_s24  ;;  %s1714_s6 = spop %1713  ;;  %v1340_v13 = vmul.f32 %v1339_v56, %v1337_v58 }
 0x475   : > { %v1322_v45 = vadd.f32 %v1321_v48, %v1298_v26  ;;  %s1716_s20 = spop %1715  ;;  %v1379_v8 = vstv %s1714_s6  ;;  %v1363_v2 = vmul.f32 %v1362_v63, %v1359_v31 }
 0x476   : > { %v1399_v32 = vstv %s1716_s20  ;;  %v1383_v36 = vmul.f32 %v1382_v25, %v1379_v8 }
 0x477   : > { %v1341_v16 = vadd.f32 %v1340_v13, %v1322_v45  ;;  %v1402_v4 = vmul.f32 %v1401_v0, %v1399_v32 }
 0x479   : > { %v1364_v23 = vadd.f32 %v1363_v2, %v1341_v16  ;;  %s1718_s4 = spop %1717 }
 0x47a   : > { %v1421_v5 = vstv %s1718_s4  ;;  %s1720_s16 = spop %1719 }
 0x47b   : > { %v1384_v10 = vadd.f32 %v1383_v36, %v1364_v23  ;;  %s1722_s9 = spop %1721  ;;  %v1441_v53 = vstv %s1720_s16  ;;  %v1425_v46 = vmul.f32 %v1424_v19, %v1421_v5 }
 0x47c   : > { %v1461_v35 = vstv %s1722_s9  ;;  %v1445_v28 = vmul.f32 %v1444_v6, %v1441_v53 }
 0x47d   : > { %v1403_v41 = vadd.f32 %v1402_v4, %v1384_v10  ;;  %v1465_v24 = vmul.f32 %v1464_v37, %v1461_v35 }
 0x47f   : > { %v1426_v40 = vadd.f32 %v1425_v46, %v1403_v41 }
 0x481   : > { %v1446_v3 = vadd.f32 %v1445_v28, %v1426_v40  ;;  %s1724_s30 = spop %1723 }
 0x482   : > { %v1481_v43 = vstv %s1724_s30 }
 0x483   : > { %v1466_v30 = vadd.f32 %v1465_v24, %v1446_v3  ;;  %v1484_v55 = vmul.f32 %v1483_v52, %v1481_v43 }
 0x485   : > { %v1485_v60 = vadd.f32 %v1484_v55, %v1466_v30 }
 0x487   : > { %v1487_v51 = vmul.f32 0.001, %v1485_v60 }
 0x489   : > { %v1488_v49 = vadd.f32 %v1487_v51, %v1486_v61 }
 0x48b   : > { %1489 = vst.msk [vmem:[%s3292_s0] sm:$0x1] %vm1274_vm4, %v1488_v49 }
 0x48c PF: > { %s3293_s11 = sld [smem:[#allocation19_spill]] }
 0x48d   : > { %s3294_s21 = sld [smem:[#allocation13_spill]] }
 0x48e   : > { %s3295_s22 = sld [smem:[#allocation14_spill]] }
 0x48f   : > { %s3296_s23 = sld [smem:[#allocation22_spill]] }
 0x490   : > { %s3297_s24 = sld [smem:[#allocation17_spill]] }
 0x491   : > { %s3298_s25 = sld [smem:[#allocation18_spill]] }
 0x492   : > { %s21_s28 = sadd.s32 1, %s3293_s11   ;;  %s3299_s26 = sld [smem:[#allocation20_spill]] }
 0x493   : > { %p18_p7 = scmp.ge.s32.totalorder %s21_s28, 10   ;;  %s3300_s27 = sld [smem:[#allocation21_spill]] }
 0x495   :  { %20 = sbr.rel (!%p18_p7) target bundleno = 15 (0xf), region = 122 }
 0x49a   :  { %1507 = vsyncpa [#allocation5], 1 }
 0x49b   :  { %1509 = vsyncpa [#allocation5 + $0x1], 1 }
 0x49c   :  { %1510 = vsyncpa [#allocation6], 1 }
 0x49d   :  { %1512 = vsyncpa [#allocation6 + $0x1], 1 }
 0x49e   :  { %1513 = vsyncpa [#allocation9], 1 }

</bundles_post_ra>
